<compile_context>
chip_gen: v6e
topology: v6e:2x2x1
jax: 0.10.0
libtpu: 0.0.40
codegen_flags: <defaults>
</compile_context>

<pallas_src>
import functools

import jax
import jax.numpy as jnp
from jax.experimental import pallas as pl
from jax.experimental.pallas import tpu as pltpu

# ----- scaled-down BERT-base-uncased config (same structure, small dims) -----
VOCAB = 1000          # bert-base: 30522
HIDDEN = 256          # bert-base: 768
N_LAYERS = 2          # bert-base: 12
N_HEADS = 4           # bert-base: 12
HEAD_DIM = HIDDEN // N_HEADS
INTERMEDIATE = 512    # bert-base: 3072
MAX_POS = 128
TYPE_VOCAB = 2
NUM_CLASSES = 8       # stands in for config.NUM_CLASSES
PAD_CLASSES = 128     # classifier lane axis padded to a full vreg lane width
LN_EPS = 1e-12


# --------------------------- Pallas kernels ----------------------------------
def _layer_norm(h, g, b, eps):
    """LayerNorm of h:(M,H) with gamma/beta:(1,H); all f32."""
    mu = jnp.mean(h, axis=-1, keepdims=True)
    d = h - mu
    var = jnp.mean(d * d, axis=-1, keepdims=True)
    return d * jax.lax.rsqrt(var + eps) * g + b


def _emb_ln_kernel(x_ref, g_ref, b_ref, o_ref, *, eps):
    o_ref[...] = _layer_norm(x_ref[...], g_ref[...], b_ref[...], eps)


def embedding_layernorm(x, gamma, beta, tm=64):
    """LayerNorm(x) * gamma + beta;  x:(M,H), gamma/beta:(1,H)."""
    M, H = x.shape
    tm = min(tm, M)
    assert M % tm == 0
    return pl.pallas_call(
        functools.partial(_emb_ln_kernel, eps=LN_EPS),
        out_shape=jax.ShapeDtypeStruct((M, H), jnp.float32),
        grid=(M // tm,),
        in_specs=[
            pl.BlockSpec((tm, H), lambda i: (i, 0)),
            pl.BlockSpec((1, H), lambda i: (0, 0)),
            pl.BlockSpec((1, H), lambda i: (0, 0)),
        ],
        out_specs=pl.BlockSpec((tm, H), lambda i: (i, 0)),
        compiler_params=pltpu.CompilerParams(dimension_semantics=("parallel",)),
    )(x, gamma, beta)


def _encoder_layer_kernel(x_ref, m_ref,
                          wqkv_ref, bqkv_ref, wo_ref, bo_ref,
                          ln1g_ref, ln1b_ref,
                          w1_ref, b1_ref, w2_ref, b2_ref,
                          ln2g_ref, ln2b_ref,
                          o_ref, *, hidden, n_heads, head_dim, eps):
    x = x_ref[0]                    # (S, H) f32
    mask = m_ref[0]                 # (1, S) f32, additive (-10000 on masked)

    # ---- fused QKV projection (single lane-dense MXU call, bf16 operands) ----
    x_bf = x.astype(jnp.bfloat16)
    qkv = jnp.dot(x_bf, wqkv_ref[...],
                  preferred_element_type=jnp.float32) + bqkv_ref[...]   # (S, 3H)
    q = qkv[:, :hidden].astype(jnp.bfloat16)
    k = qkv[:, hidden:2 * hidden].astype(jnp.bfloat16)
    v = qkv[:, 2 * hidden:].astype(jnp.bfloat16)

    # ---- per-head masked softmax attention (all heads in one grid step) ----
    scale = 1.0 / float(head_dim) ** 0.5
    ctx_heads = []
    for h in range(n_heads):
        lo, hi = h * head_dim, (h + 1) * head_dim
        qh, kh, vh = q[:, lo:hi], k[:, lo:hi], v[:, lo:hi]          # (S, D)
        # NT matmul: contract last dims, no explicit K transpose.
        s = jax.lax.dot_general(qh, kh, (((1,), (1,)), ((), ())),
                                preferred_element_type=jnp.float32)  # (S, S)
        s = s * scale + mask
        s = s - jnp.max(s, axis=-1, keepdims=True)
        p = jnp.exp(s)
        p = p * pl.reciprocal(jnp.sum(p, axis=-1, keepdims=True), approx=True)
        ctx_heads.append(jnp.dot(p.astype(jnp.bfloat16), vh,
                                 preferred_element_type=jnp.float32))  # (S, D)
    ctx = jnp.concatenate(ctx_heads, axis=-1)                          # (S, H)

    # ---- attention output projection + residual + LayerNorm (fused) ----
    attn_out = jnp.dot(ctx.astype(jnp.bfloat16), wo_ref[...],
                       preferred_element_type=jnp.float32) + bo_ref[...]
    x1 = _layer_norm(attn_out + x, ln1g_ref[...], ln1b_ref[...], eps)

    # ---- fused FFN: w1 -> GELU -> w2, + residual + LayerNorm ----
    ff = jnp.dot(x1.astype(jnp.bfloat16), w1_ref[...],
                 preferred_element_type=jnp.float32) + b1_ref[...]
    # TODO(synk): HF BERT uses exact erf GELU; tanh approximation used here.
    ff = 0.5 * ff * (1.0 + jnp.tanh(0.7978845608028654 *
                                    (ff + 0.044715 * ff * ff * ff)))
    ff2 = jnp.dot(ff.astype(jnp.bfloat16), w2_ref[...],
                  preferred_element_type=jnp.float32) + b2_ref[...]
    x2 = _layer_norm(ff2 + x1, ln2g_ref[...], ln2b_ref[...], eps)

    o_ref[0] = x2.astype(o_ref.dtype)


def encoder_layer(x, mask_add, lp):
    """One full BERT encoder layer in a single pallas_call; grid over batch."""
    B, S, H = x.shape
    I = INTERMEDIATE
    return pl.pallas_call(
        functools.partial(_encoder_layer_kernel, hidden=H, n_heads=N_HEADS,
                          head_dim=HEAD_DIM, eps=LN_EPS),
        out_shape=jax.ShapeDtypeStruct((B, S, H), jnp.float32),
        grid=(B,),
        in_specs=[
            pl.BlockSpec((1, S, H), lambda b: (b, 0, 0)),     # x
            pl.BlockSpec((1, 1, S), lambda b: (b, 0, 0)),     # additive mask
            pl.BlockSpec((H, 3 * H), lambda b: (0, 0)),       # wqkv (bf16)
            pl.BlockSpec((1, 3 * H), lambda b: (0, 0)),       # bqkv
            pl.BlockSpec((H, H), lambda b: (0, 0)),           # wo (bf16)
            pl.BlockSpec((1, H), lambda b: (0, 0)),           # bo
            pl.BlockSpec((1, H), lambda b: (0, 0)),           # ln1_g
            pl.BlockSpec((1, H), lambda b: (0, 0)),           # ln1_b
            pl.BlockSpec((H, I), lambda b: (0, 0)),           # w1 (bf16)
            pl.BlockSpec((1, I), lambda b: (0, 0)),           # b1
            pl.BlockSpec((I, H), lambda b: (0, 0)),           # w2 (bf16)
            pl.BlockSpec((1, H), lambda b: (0, 0)),           # b2
            pl.BlockSpec((1, H), lambda b: (0, 0)),           # ln2_g
            pl.BlockSpec((1, H), lambda b: (0, 0)),           # ln2_b
        ],
        out_specs=pl.BlockSpec((1, S, H), lambda b: (b, 0, 0)),
        compiler_params=pltpu.CompilerParams(dimension_semantics=("parallel",)),
    )(x, mask_add, lp["wqkv"], lp["bqkv"], lp["wo"], lp["bo"],
      lp["ln1_g"], lp["ln1_b"], lp["w1"], lp["b1"], lp["w2"], lp["b2"],
      lp["ln2_g"], lp["ln2_b"])


def _pooler_cls_kernel(cls_ref, wp_ref, bp_ref, wc_ref, bc_ref, o_ref):
    # pooler: tanh(CLS @ Wp + bp)
    pooled = jnp.tanh(jnp.dot(cls_ref[...].astype(jnp.bfloat16), wp_ref[...],
                              preferred_element_type=jnp.float32) + bp_ref[...])
    # Dropout(0.3) is identity at inference (eval mode).
    # classifier: pooled @ Wc_pad + bc_pad  (lane-padded to 128 classes)
    o_ref[...] = (jnp.dot(pooled.astype(jnp.bfloat16), wc_ref[...],
                          preferred_element_type=jnp.float32) + bc_ref[...]
                  ).astype(o_ref.dtype)


def pooler_classifier(cls, wp, bp, wc_pad, bc_pad):
    B, _ = cls.shape
    return pl.pallas_call(
        _pooler_cls_kernel,
        out_shape=jax.ShapeDtypeStruct((B, PAD_CLASSES), jnp.float32),
    )(cls, wp, bp, wc_pad, bc_pad)


# ---------------------- deterministic parameter init -------------------------
def init_params(key):
    ks = iter(jax.random.split(key, 64))

    def nrm(shape):
        return jax.random.normal(next(ks), shape, jnp.float32) * 0.02

    out_w = nrm((HIDDEN, NUM_CLASSES))                       # nn.Linear(768, NUM_CLASSES)
    out_w_pad = jnp.zeros((HIDDEN, PAD_CLASSES), jnp.float32).at[:, :NUM_CLASSES].set(out_w)

    params = dict(
        word_emb=nrm((VOCAB, HIDDEN)),
        pos_emb=nrm((MAX_POS, HIDDEN)),
        type_emb=nrm((TYPE_VOCAB, HIDDEN)),
        emb_ln_g=jnp.ones((1, HIDDEN), jnp.float32),
        emb_ln_b=jnp.zeros((1, HIDDEN), jnp.float32),
        layers=[],
        pooler_w=nrm((HIDDEN, HIDDEN)).astype(jnp.bfloat16),
        pooler_b=jnp.zeros((1, HIDDEN), jnp.float32),
        out_w=out_w_pad.astype(jnp.bfloat16),
        out_b=jnp.zeros((1, PAD_CLASSES), jnp.float32),
    )
    for _ in range(N_LAYERS):
        wq, wk, wv = nrm((HIDDEN, HIDDEN)), nrm((HIDDEN, HIDDEN)), nrm((HIDDEN, HIDDEN))
        params["layers"].append(dict(
            # fused QKV weight: (H, 3H), bf16 MXU operands
            wqkv=jnp.concatenate([wq, wk, wv], axis=1).astype(jnp.bfloat16),
            bqkv=jnp.zeros((1, 3 * HIDDEN), jnp.float32),
            wo=nrm((HIDDEN, HIDDEN)).astype(jnp.bfloat16),
            bo=jnp.zeros((1, HIDDEN), jnp.float32),
            ln1_g=jnp.ones((1, HIDDEN), jnp.float32),
            ln1_b=jnp.zeros((1, HIDDEN), jnp.float32),
            w1=nrm((HIDDEN, INTERMEDIATE)).astype(jnp.bfloat16),
            b1=jnp.zeros((1, INTERMEDIATE), jnp.float32),
            w2=nrm((INTERMEDIATE, HIDDEN)).astype(jnp.bfloat16),
            b2=jnp.zeros((1, HIDDEN), jnp.float32),
            ln2_g=jnp.ones((1, HIDDEN), jnp.float32),
            ln2_b=jnp.zeros((1, HIDDEN), jnp.float32),
        ))
    return params


# ------------------------------ forward pass ----------------------------------
def bert_base_uncased_forward(params, ids, mask, token_type_ids):
    B, S = ids.shape

    # --- embeddings: gathers are glue; LayerNorm is a Pallas kernel ---
    we = params["word_emb"][ids]                        # (B,S,H)
    pe = params["pos_emb"][:S][None, :, :]              # (1,S,H)
    te = params["type_emb"][token_type_ids]             # (B,S,H)
    emb = (we + pe + te).reshape(B * S, HIDDEN)
    x = embedding_layernorm(emb, params["emb_ln_g"], params["emb_ln_b"])
    x = x.reshape(B, S, HIDDEN)

    # additive attention mask, BERT-style: (1 - mask) * -10000
    mask_add = ((1.0 - mask.astype(jnp.float32)) * -10000.0).reshape(B, 1, S)

    # --- transformer encoder: one fused pallas_call per layer ---
    for lp in params["layers"]:
        x = encoder_layer(x, mask_add, lp)

    # --- pooler (tanh on CLS) + dropout(identity) + classifier, one kernel ---
    cls = x[:, 0, :]                                                   # (B,H)
    logits_pad = pooler_classifier(cls, params["pooler_w"], params["pooler_b"],
                                   params["out_w"], params["out_b"])   # (B,128)
    return logits_pad[:, :NUM_CLASSES]                                 # (B,NUM_CLASSES)


if __name__ == "__main__":
    key = jax.random.PRNGKey(0)
    pkey, ikey = jax.random.split(key)
    params = init_params(pkey)

    B, S = 2, 64
    ids = jax.random.randint(ikey, (B, S), 0, VOCAB, dtype=jnp.int32)
    mask = jnp.ones((B, S), dtype=jnp.int32)
    token_type_ids = jnp.zeros((B, S), dtype=jnp.int32)

    logits = jax.jit(bert_base_uncased_forward)(params, ids, mask, token_type_ids)
    jax.block_until_ready(logits)
    assert logits.shape == (B, NUM_CLASSES) and logits.dtype == jnp.float32
    print("KERNEL_OK")
</pallas_src>

<mosaic_0001>
module attributes {stable_mosaic.version = 11 : i64} {
  func.func @_emb_ln_kernel(%arg0: i32, %arg1: memref<64x256xf32, #tpu.memory_space<vmem>>, %arg2: memref<1x256xf32, #tpu.memory_space<vmem>>, %arg3: memref<1x256xf32, #tpu.memory_space<vmem>>, %arg4: memref<64x256xf32, #tpu.memory_space<vmem>>) attributes {dimension_semantics = [#tpu.dimension_semantics<parallel>], iteration_bounds = array<i64: 2>, scalar_prefetch = 0 : i64, scratch_operands = 0 : i64, tpu.core_type = #tpu.core_type<tc>, window_params = [{transform_indices = @transform_0, window_bounds = array<i64: 64, 256>}, {pipeline_mode = #tpu.pipeline_mode<synchronous>, transform_indices = @transform_1, window_bounds = array<i64: 1, 256>}, {pipeline_mode = #tpu.pipeline_mode<synchronous>, transform_indices = @transform_2, window_bounds = array<i64: 1, 256>}, {transform_indices = @transform_3, window_bounds = array<i64: 64, 256>}]} {
    %c0 = arith.constant 0 : index
    %c0_0 = arith.constant 0 : index
    %0 = vector.load %arg1[%c0, %c0_0] : memref<64x256xf32, #tpu.memory_space<vmem>>, vector<64x256xf32>
    %c0_1 = arith.constant 0 : index
    %c0_2 = arith.constant 0 : index
    %1 = vector.load %arg2[%c0_1, %c0_2] : memref<1x256xf32, #tpu.memory_space<vmem>>, vector<1x256xf32>
    %c0_3 = arith.constant 0 : index
    %c0_4 = arith.constant 0 : index
    %2 = vector.load %arg3[%c0_3, %c0_4] : memref<1x256xf32, #tpu.memory_space<vmem>>, vector<1x256xf32>
    %cst = arith.constant dense<0.000000e+00> : vector<64xf32>
    %3 = vector.multi_reduction <add>, %0, %cst [1] : vector<64x256xf32> to vector<64xf32>
    %4 = vector.shape_cast %3 : vector<64xf32> to vector<64x1xf32>
    %cst_5 = arith.constant 2.560000e+02 : f32
    %5 = vector.broadcast %cst_5 : f32 to vector<64x1xf32>
    %6 = arith.divf %4, %5 : vector<64x1xf32>
    %7 = vector.broadcast %6 : vector<64x1xf32> to vector<64x256xf32>
    %8 = arith.subf %0, %7 : vector<64x256xf32>
    %9 = arith.mulf %8, %8 : vector<64x256xf32>
    %cst_6 = arith.constant dense<0.000000e+00> : vector<64xf32>
    %10 = vector.multi_reduction <add>, %9, %cst_6 [1] : vector<64x256xf32> to vector<64xf32>
    %11 = vector.shape_cast %10 : vector<64xf32> to vector<64x1xf32>
    %cst_7 = arith.constant 2.560000e+02 : f32
    %12 = vector.broadcast %cst_7 : f32 to vector<64x1xf32>
    %13 = arith.divf %11, %12 : vector<64x1xf32>
    %cst_8 = arith.constant 9.99999996E-13 : f32
    %14 = vector.broadcast %cst_8 : f32 to vector<64x1xf32>
    %15 = arith.addf %13, %14 : vector<64x1xf32>
    %16 = math.rsqrt %15 : vector<64x1xf32>
    %17 = vector.broadcast %16 : vector<64x1xf32> to vector<64x256xf32>
    %18 = arith.mulf %8, %17 : vector<64x256xf32>
    %19 = vector.broadcast %1 : vector<1x256xf32> to vector<64x256xf32>
    %20 = arith.mulf %18, %19 : vector<64x256xf32>
    %21 = vector.broadcast %2 : vector<1x256xf32> to vector<64x256xf32>
    %22 = arith.addf %20, %21 : vector<64x256xf32>
    %c0_9 = arith.constant 0 : index
    %c0_10 = arith.constant 0 : index
    %23 = vector.load %arg4[%c0_9, %c0_10] : memref<64x256xf32, #tpu.memory_space<vmem>>, vector<64x256xf32>
    tpu.vector_store %arg4[%c0_9, %c0_10], %22 {strides = array<i32>} : memref<64x256xf32, #tpu.memory_space<vmem>>, vector<64x256xf32>,
    return
  }
  func.func @transform_0(%arg0: i32) -> (i32, i32) {
    %c0_i32 = arith.constant 0 : i32
    %c0_i32_0 = arith.constant 0 : i32
    return %arg0, %c0_i32 : i32, i32
  }
  func.func @transform_1(%arg0: i32) -> (i32, i32) {
    %c0_i32 = arith.constant 0 : i32
    %c0_i32_0 = arith.constant 0 : i32
    %c0_i32_1 = arith.constant 0 : i32
    return %c0_i32, %c0_i32_0 : i32, i32
  }
  func.func @transform_2(%arg0: i32) -> (i32, i32) {
    %c0_i32 = arith.constant 0 : i32
    %c0_i32_0 = arith.constant 0 : i32
    %c0_i32_1 = arith.constant 0 : i32
    return %c0_i32, %c0_i32_0 : i32, i32
  }
  func.func @transform_3(%arg0: i32) -> (i32, i32) {
    %c0_i32 = arith.constant 0 : i32
    %c0_i32_0 = arith.constant 0 : i32
    return %arg0, %c0_i32 : i32, i32
  }
}

module attributes {stable_mosaic.version = 11 : i64} {
  func.func @_pooler_cls_kernel(%arg0: memref<2x256xf32, #tpu.memory_space<vmem>>, %arg1: memref<256x256xbf16, #tpu.memory_space<vmem>>, %arg2: memref<1x256xf32, #tpu.memory_space<vmem>>, %arg3: memref<256x128xbf16, #tpu.memory_space<vmem>>, %arg4: memref<1x128xf32, #tpu.memory_space<vmem>>, %arg5: memref<2x128xf32, #tpu.memory_space<vmem>>) attributes {dimension_semantics = [], scalar_prefetch = 0 : i64, scratch_operands = 0 : i64, tpu.core_type = #tpu.core_type<tc>} {
    %c0 = arith.constant 0 : index
    %c0_0 = arith.constant 0 : index
    %0 = vector.load %arg0[%c0, %c0_0] : memref<2x256xf32, #tpu.memory_space<vmem>>, vector<2x256xf32>
    %1 = arith.truncf %0 : vector<2x256xf32> to vector<2x256xbf16>
    %c0_1 = arith.constant 0 : index
    %c0_2 = arith.constant 0 : index
    %2 = vector.load %arg1[%c0_1, %c0_2] : memref<256x256xbf16, #tpu.memory_space<vmem>>, vector<256x256xbf16>
    %cst = arith.constant dense<0.000000e+00> : vector<2x256xf32>
    %3 = tpu.matmul %1, %2, %cst {dimension_numbers = #tpu.dot_dimension_numbers<[1], [0], [0], [1], [0, 0, 1, 1], [], []>} : vector<2x256xbf16>, vector<256x256xbf16>, vector<2x256xf32> -> vector<2x256xf32>
    %c0_3 = arith.constant 0 : index
    %c0_4 = arith.constant 0 : index
    %4 = vector.load %arg2[%c0_3, %c0_4] : memref<1x256xf32, #tpu.memory_space<vmem>>, vector<1x256xf32>
    %5 = vector.broadcast %4 : vector<1x256xf32> to vector<2x256xf32>
    %6 = arith.addf %3, %5 : vector<2x256xf32>
    %7 = math.tanh %6 : vector<2x256xf32>
    %8 = arith.truncf %7 : vector<2x256xf32> to vector<2x256xbf16>
    %c0_5 = arith.constant 0 : index
    %c0_6 = arith.constant 0 : index
    %9 = vector.load %arg3[%c0_5, %c0_6] : memref<256x128xbf16, #tpu.memory_space<vmem>>, vector<256x128xbf16>
    %cst_7 = arith.constant dense<0.000000e+00> : vector<2x128xf32>
    %10 = tpu.matmul %8, %9, %cst_7 {dimension_numbers = #tpu.dot_dimension_numbers<[1], [0], [0], [1], [0, 0, 1, 1], [], []>} : vector<2x256xbf16>, vector<256x128xbf16>, vector<2x128xf32> -> vector<2x128xf32>
    %c0_8 = arith.constant 0 : index
    %c0_9 = arith.constant 0 : index
    %11 = vector.load %arg4[%c0_8, %c0_9] : memref<1x128xf32, #tpu.memory_space<vmem>>, vector<1x128xf32>
    %12 = vector.broadcast %11 : vector<1x128xf32> to vector<2x128xf32>
    %13 = arith.addf %10, %12 : vector<2x128xf32>
    %c0_10 = arith.constant 0 : index
    %c0_11 = arith.constant 0 : index
    %14 = vector.load %arg5[%c0_10, %c0_11] : memref<2x128xf32, #tpu.memory_space<vmem>>, vector<2x128xf32>
    tpu.vector_store %arg5[%c0_10, %c0_11], %13 {strides = array<i32>} : memref<2x128xf32, #tpu.memory_space<vmem>>, vector<2x128xf32>,
    return
  }
}

module attributes {stable_mosaic.version = 11 : i64} {
  func.func @_encoder_layer_kernel(%arg0: i32, %arg1: memref<1x64x256xf32, #tpu.memory_space<vmem>>, %arg2: memref<1x1x64xf32, #tpu.memory_space<vmem>>, %arg3: memref<256x768xbf16, #tpu.memory_space<vmem>>, %arg4: memref<1x768xf32, #tpu.memory_space<vmem>>, %arg5: memref<256x256xbf16, #tpu.memory_space<vmem>>, %arg6: memref<1x256xf32, #tpu.memory_space<vmem>>, %arg7: memref<1x256xf32, #tpu.memory_space<vmem>>, %arg8: memref<1x256xf32, #tpu.memory_space<vmem>>, %arg9: memref<256x512xbf16, #tpu.memory_space<vmem>>, %arg10: memref<1x512xf32, #tpu.memory_space<vmem>>, %arg11: memref<512x256xbf16, #tpu.memory_space<vmem>>, %arg12: memref<1x256xf32, #tpu.memory_space<vmem>>, %arg13: memref<1x256xf32, #tpu.memory_space<vmem>>, %arg14: memref<1x256xf32, #tpu.memory_space<vmem>>, %arg15: memref<1x64x256xf32, #tpu.memory_space<vmem>>) attributes {dimension_semantics = [#tpu.dimension_semantics<parallel>], iteration_bounds = array<i64: 2>, scalar_prefetch = 0 : i64, scratch_operands = 0 : i64, tpu.core_type = #tpu.core_type<tc>, window_params = [{transform_indices = @transform_0, window_bounds = array<i64: 1, 64, 256>}, {transform_indices = @transform_1, window_bounds = array<i64: 1, 1, 64>}, {pipeline_mode = #tpu.pipeline_mode<synchronous>, transform_indices = @transform_2, window_bounds = array<i64: 256, 768>}, {pipeline_mode = #tpu.pipeline_mode<synchronous>, transform_indices = @transform_3, window_bounds = array<i64: 1, 768>}, {pipeline_mode = #tpu.pipeline_mode<synchronous>, transform_indices = @transform_4, window_bounds = array<i64: 256, 256>}, {pipeline_mode = #tpu.pipeline_mode<synchronous>, transform_indices = @transform_5, window_bounds = array<i64: 1, 256>}, {pipeline_mode = #tpu.pipeline_mode<synchronous>, transform_indices = @transform_6, window_bounds = array<i64: 1, 256>}, {pipeline_mode = #tpu.pipeline_mode<synchronous>, transform_indices = @transform_7, window_bounds = array<i64: 1, 256>}, {pipeline_mode = #tpu.pipeline_mode<synchronous>, transform_indices = @transform_8, window_bounds = array<i64: 256, 512>}, {pipeline_mode = #tpu.pipeline_mode<synchronous>, transform_indices = @transform_9, window_bounds = array<i64: 1, 512>}, {pipeline_mode = #tpu.pipeline_mode<synchronous>, transform_indices = @transform_10, window_bounds = array<i64: 512, 256>}, {pipeline_mode = #tpu.pipeline_mode<synchronous>, transform_indices = @transform_11, window_bounds = array<i64: 1, 256>}, {pipeline_mode = #tpu.pipeline_mode<synchronous>, transform_indices = @transform_12, window_bounds = array<i64: 1, 256>}, {pipeline_mode = #tpu.pipeline_mode<synchronous>, transform_indices = @transform_13, window_bounds = array<i64: 1, 256>}, {transform_indices = @transform_14, window_bounds = array<i64: 1, 64, 256>}]} {
    %c0 = arith.constant 0 : index
    %c0_0 = arith.constant 0 : index
    %c0_1 = arith.constant 0 : index
    %0 = vector.load %arg1[%c0, %c0_0, %c0_1] : memref<1x64x256xf32, #tpu.memory_space<vmem>>, vector<1x64x256xf32>
    %1 = vector.shape_cast %0 : vector<1x64x256xf32> to vector<64x256xf32>
    %c0_2 = arith.constant 0 : index
    %c0_3 = arith.constant 0 : index
    %c0_4 = arith.constant 0 : index
    %2 = vector.load %arg2[%c0_2, %c0_3, %c0_4] : memref<1x1x64xf32, #tpu.memory_space<vmem>>, vector<1x1x64xf32>
    %3 = vector.shape_cast %2 : vector<1x1x64xf32> to vector<1x64xf32>
    %4 = arith.truncf %1 : vector<64x256xf32> to vector<64x256xbf16>
    %c0_5 = arith.constant 0 : index
    %c0_6 = arith.constant 0 : index
    %5 = vector.load %arg3[%c0_5, %c0_6] : memref<256x768xbf16, #tpu.memory_space<vmem>>, vector<256x768xbf16>
    %cst = arith.constant dense<0.000000e+00> : vector<64x768xf32>
    %6 = tpu.matmul %4, %5, %cst {dimension_numbers = #tpu.dot_dimension_numbers<[1], [0], [0], [1], [0, 0, 1, 1], [], []>} : vector<64x256xbf16>, vector<256x768xbf16>, vector<64x768xf32> -> vector<64x768xf32>
    %c0_7 = arith.constant 0 : index
    %c0_8 = arith.constant 0 : index
    %7 = vector.load %arg4[%c0_7, %c0_8] : memref<1x768xf32, #tpu.memory_space<vmem>>, vector<1x768xf32>
    %8 = vector.broadcast %7 : vector<1x768xf32> to vector<64x768xf32>
    %9 = arith.addf %6, %8 : vector<64x768xf32>
    %10 = vector.extract_strided_slice %9 {offsets = [0, 0], sizes = [64, 256], strides = [1, 1]} : vector<64x768xf32> to vector<64x256xf32>
    %11 = arith.truncf %10 : vector<64x256xf32> to vector<64x256xbf16>
    %12 = vector.extract_strided_slice %9 {offsets = [0, 256], sizes = [64, 256], strides = [1, 1]} : vector<64x768xf32> to vector<64x256xf32>
    %13 = arith.truncf %12 : vector<64x256xf32> to vector<64x256xbf16>
    %14 = vector.extract_strided_slice %9 {offsets = [0, 512], sizes = [64, 256], strides = [1, 1]} : vector<64x768xf32> to vector<64x256xf32>
    %15 = arith.truncf %14 : vector<64x256xf32> to vector<64x256xbf16>
    %16 = vector.extract_strided_slice %11 {offsets = [0, 0], sizes = [64, 64], strides = [1, 1]} : vector<64x256xbf16> to vector<64x64xbf16>
    %17 = vector.extract_strided_slice %13 {offsets = [0, 0], sizes = [64, 64], strides = [1, 1]} : vector<64x256xbf16> to vector<64x64xbf16>
    %18 = vector.extract_strided_slice %15 {offsets = [0, 0], sizes = [64, 64], strides = [1, 1]} : vector<64x256xbf16> to vector<64x64xbf16>
    %cst_9 = arith.constant dense<0.000000e+00> : vector<64x64xf32>
    %19 = tpu.matmul %16, %17, %cst_9 {dimension_numbers = #tpu.dot_dimension_numbers<[1], [1], [0], [0], [0, 0, 1, 0], [], []>} : vector<64x64xbf16>, vector<64x64xbf16>, vector<64x64xf32> -> vector<64x64xf32>
    %cst_10 = arith.constant 1.250000e-01 : f32
    %20 = vector.broadcast %cst_10 : f32 to vector<64x64xf32>
    %21 = arith.mulf %19, %20 : vector<64x64xf32>
    %22 = vector.broadcast %3 : vector<1x64xf32> to vector<64x64xf32>
    %23 = arith.addf %21, %22 : vector<64x64xf32>
    %cst_11 = arith.constant dense<0xFF800000> : vector<64xf32>
    %24 = vector.multi_reduction <maximumf>, %23, %cst_11 [1] : vector<64x64xf32> to vector<64xf32>
    %25 = vector.shape_cast %24 : vector<64xf32> to vector<64x1xf32>
    %26 = vector.broadcast %25 : vector<64x1xf32> to vector<64x64xf32>
    %27 = arith.subf %23, %26 : vector<64x64xf32>
    %28 = math.exp %27 : vector<64x64xf32>
    %cst_12 = arith.constant dense<0.000000e+00> : vector<64xf32>
    %29 = vector.multi_reduction <add>, %28, %cst_12 [1] : vector<64x64xf32> to vector<64xf32>
    %30 = vector.shape_cast %29 : vector<64xf32> to vector<64x1xf32>
    %31 = tpu.reciprocal %30 {approx = true} : vector<64x1xf32> -> vector<64x1xf32>
    %32 = vector.broadcast %31 : vector<64x1xf32> to vector<64x64xf32>
    %33 = arith.mulf %28, %32 : vector<64x64xf32>
    %34 = arith.truncf %33 : vector<64x64xf32> to vector<64x64xbf16>
    %cst_13 = arith.constant dense<0.000000e+00> : vector<64x64xf32>
    %35 = tpu.matmul %34, %18, %cst_13 {dimension_numbers = #tpu.dot_dimension_numbers<[1], [0], [0], [1], [0, 0, 1, 1], [], []>} : vector<64x64xbf16>, vector<64x64xbf16>, vector<64x64xf32> -> vector<64x64xf32>
    %36 = vector.extract_strided_slice %11 {offsets = [0, 64], sizes = [64, 64], strides = [1, 1]} : vector<64x256xbf16> to vector<64x64xbf16>
    %37 = vector.extract_strided_slice %13 {offsets = [0, 64], sizes = [64, 64], strides = [1, 1]} : vector<64x256xbf16> to vector<64x64xbf16>
    %38 = vector.extract_strided_slice %15 {offsets = [0, 64], sizes = [64, 64], strides = [1, 1]} : vector<64x256xbf16> to vector<64x64xbf16>
    %cst_14 = arith.constant dense<0.000000e+00> : vector<64x64xf32>
    %39 = tpu.matmul %36, %37, %cst_14 {dimension_numbers = #tpu.dot_dimension_numbers<[1], [1], [0], [0], [0, 0, 1, 0], [], []>} : vector<64x64xbf16>, vector<64x64xbf16>, vector<64x64xf32> -> vector<64x64xf32>
    %cst_15 = arith.constant 1.250000e-01 : f32
    %40 = vector.broadcast %cst_15 : f32 to vector<64x64xf32>
    %41 = arith.mulf %39, %40 : vector<64x64xf32>
    %42 = vector.broadcast %3 : vector<1x64xf32> to vector<64x64xf32>
    %43 = arith.addf %41, %42 : vector<64x64xf32>
    %cst_16 = arith.constant dense<0xFF800000> : vector<64xf32>
    %44 = vector.multi_reduction <maximumf>, %43, %cst_16 [1] : vector<64x64xf32> to vector<64xf32>
    %45 = vector.shape_cast %44 : vector<64xf32> to vector<64x1xf32>
    %46 = vector.broadcast %45 : vector<64x1xf32> to vector<64x64xf32>
    %47 = arith.subf %43, %46 : vector<64x64xf32>
    %48 = math.exp %47 : vector<64x64xf32>
    %cst_17 = arith.constant dense<0.000000e+00> : vector<64xf32>
    %49 = vector.multi_reduction <add>, %48, %cst_17 [1] : vector<64x64xf32> to vector<64xf32>
    %50 = vector.shape_cast %49 : vector<64xf32> to vector<64x1xf32>
    %51 = tpu.reciprocal %50 {approx = true} : vector<64x1xf32> -> vector<64x1xf32>
    %52 = vector.broadcast %51 : vector<64x1xf32> to vector<64x64xf32>
    %53 = arith.mulf %48, %52 : vector<64x64xf32>
    %54 = arith.truncf %53 : vector<64x64xf32> to vector<64x64xbf16>
    %cst_18 = arith.constant dense<0.000000e+00> : vector<64x64xf32>
    %55 = tpu.matmul %54, %38, %cst_18 {dimension_numbers = #tpu.dot_dimension_numbers<[1], [0], [0], [1], [0, 0, 1, 1], [], []>} : vector<64x64xbf16>, vector<64x64xbf16>, vector<64x64xf32> -> vector<64x64xf32>
    %56 = vector.extract_strided_slice %11 {offsets = [0, 128], sizes = [64, 64], strides = [1, 1]} : vector<64x256xbf16> to vector<64x64xbf16>
    %57 = vector.extract_strided_slice %13 {offsets = [0, 128], sizes = [64, 64], strides = [1, 1]} : vector<64x256xbf16> to vector<64x64xbf16>
    %58 = vector.extract_strided_slice %15 {offsets = [0, 128], sizes = [64, 64], strides = [1, 1]} : vector<64x256xbf16> to vector<64x64xbf16>
    %cst_19 = arith.constant dense<0.000000e+00> : vector<64x64xf32>
    %59 = tpu.matmul %56, %57, %cst_19 {dimension_numbers = #tpu.dot_dimension_numbers<[1], [1], [0], [0], [0, 0, 1, 0], [], []>} : vector<64x64xbf16>, vector<64x64xbf16>, vector<64x64xf32> -> vector<64x64xf32>
    %cst_20 = arith.constant 1.250000e-01 : f32
    %60 = vector.broadcast %cst_20 : f32 to vector<64x64xf32>
    %61 = arith.mulf %59, %60 : vector<64x64xf32>
    %62 = vector.broadcast %3 : vector<1x64xf32> to vector<64x64xf32>
    %63 = arith.addf %61, %62 : vector<64x64xf32>
    %cst_21 = arith.constant dense<0xFF800000> : vector<64xf32>
    %64 = vector.multi_reduction <maximumf>, %63, %cst_21 [1] : vector<64x64xf32> to vector<64xf32>
    %65 = vector.shape_cast %64 : vector<64xf32> to vector<64x1xf32>
    %66 = vector.broadcast %65 : vector<64x1xf32> to vector<64x64xf32>
    %67 = arith.subf %63, %66 : vector<64x64xf32>
    %68 = math.exp %67 : vector<64x64xf32>
    %cst_22 = arith.constant dense<0.000000e+00> : vector<64xf32>
    %69 = vector.multi_reduction <add>, %68, %cst_22 [1] : vector<64x64xf32> to vector<64xf32>
    %70 = vector.shape_cast %69 : vector<64xf32> to vector<64x1xf32>
    %71 = tpu.reciprocal %70 {approx = true} : vector<64x1xf32> -> vector<64x1xf32>
    %72 = vector.broadcast %71 : vector<64x1xf32> to vector<64x64xf32>
    %73 = arith.mulf %68, %72 : vector<64x64xf32>
    %74 = arith.truncf %73 : vector<64x64xf32> to vector<64x64xbf16>
    %cst_23 = arith.constant dense<0.000000e+00> : vector<64x64xf32>
    %75 = tpu.matmul %74, %58, %cst_23 {dimension_numbers = #tpu.dot_dimension_numbers<[1], [0], [0], [1], [0, 0, 1, 1], [], []>} : vector<64x64xbf16>, vector<64x64xbf16>, vector<64x64xf32> -> vector<64x64xf32>
    %76 = vector.extract_strided_slice %11 {offsets = [0, 192], sizes = [64, 64], strides = [1, 1]} : vector<64x256xbf16> to vector<64x64xbf16>
    %77 = vector.extract_strided_slice %13 {offsets = [0, 192], sizes = [64, 64], strides = [1, 1]} : vector<64x256xbf16> to vector<64x64xbf16>
    %78 = vector.extract_strided_slice %15 {offsets = [0, 192], sizes = [64, 64], strides = [1, 1]} : vector<64x256xbf16> to vector<64x64xbf16>
    %cst_24 = arith.constant dense<0.000000e+00> : vector<64x64xf32>
    %79 = tpu.matmul %76, %77, %cst_24 {dimension_numbers = #tpu.dot_dimension_numbers<[1], [1], [0], [0], [0, 0, 1, 0], [], []>} : vector<64x64xbf16>, vector<64x64xbf16>, vector<64x64xf32> -> vector<64x64xf32>
    %cst_25 = arith.constant 1.250000e-01 : f32
    %80 = vector.broadcast %cst_25 : f32 to vector<64x64xf32>
    %81 = arith.mulf %79, %80 : vector<64x64xf32>
    %82 = vector.broadcast %3 : vector<1x64xf32> to vector<64x64xf32>
    %83 = arith.addf %81, %82 : vector<64x64xf32>
    %cst_26 = arith.constant dense<0xFF800000> : vector<64xf32>
    %84 = vector.multi_reduction <maximumf>, %83, %cst_26 [1] : vector<64x64xf32> to vector<64xf32>
    %85 = vector.shape_cast %84 : vector<64xf32> to vector<64x1xf32>
    %86 = vector.broadcast %85 : vector<64x1xf32> to vector<64x64xf32>
    %87 = arith.subf %83, %86 : vector<64x64xf32>
    %88 = math.exp %87 : vector<64x64xf32>
    %cst_27 = arith.constant dense<0.000000e+00> : vector<64xf32>
    %89 = vector.multi_reduction <add>, %88, %cst_27 [1] : vector<64x64xf32> to vector<64xf32>
    %90 = vector.shape_cast %89 : vector<64xf32> to vector<64x1xf32>
    %91 = tpu.reciprocal %90 {approx = true} : vector<64x1xf32> -> vector<64x1xf32>
    %92 = vector.broadcast %91 : vector<64x1xf32> to vector<64x64xf32>
    %93 = arith.mulf %88, %92 : vector<64x64xf32>
    %94 = arith.truncf %93 : vector<64x64xf32> to vector<64x64xbf16>
    %cst_28 = arith.constant dense<0.000000e+00> : vector<64x64xf32>
    %95 = tpu.matmul %94, %78, %cst_28 {dimension_numbers = #tpu.dot_dimension_numbers<[1], [0], [0], [1], [0, 0, 1, 1], [], []>} : vector<64x64xbf16>, vector<64x64xbf16>, vector<64x64xf32> -> vector<64x64xf32>
    %96 = tpu.concatenate %35, %55, %75, %95 in 1 : vector<64x64xf32>, vector<64x64xf32>, vector<64x64xf32>, vector<64x64xf32> -> vector<64x256xf32>
    %97 = arith.truncf %96 : vector<64x256xf32> to vector<64x256xbf16>
    %c0_29 = arith.constant 0 : index
    %c0_30 = arith.constant 0 : index
    %98 = vector.load %arg5[%c0_29, %c0_30] : memref<256x256xbf16, #tpu.memory_space<vmem>>, vector<256x256xbf16>
    %cst_31 = arith.constant dense<0.000000e+00> : vector<64x256xf32>
    %99 = tpu.matmul %97, %98, %cst_31 {dimension_numbers = #tpu.dot_dimension_numbers<[1], [0], [0], [1], [0, 0, 1, 1], [], []>} : vector<64x256xbf16>, vector<256x256xbf16>, vector<64x256xf32> -> vector<64x256xf32>
    %c0_32 = arith.constant 0 : index
    %c0_33 = arith.constant 0 : index
    %100 = vector.load %arg6[%c0_32, %c0_33] : memref<1x256xf32, #tpu.memory_space<vmem>>, vector<1x256xf32>
    %101 = vector.broadcast %100 : vector<1x256xf32> to vector<64x256xf32>
    %102 = arith.addf %99, %101 : vector<64x256xf32>
    %103 = arith.addf %102, %1 : vector<64x256xf32>
    %c0_34 = arith.constant 0 : index
    %c0_35 = arith.constant 0 : index
    %104 = vector.load %arg7[%c0_34, %c0_35] : memref<1x256xf32, #tpu.memory_space<vmem>>, vector<1x256xf32>
    %c0_36 = arith.constant 0 : index
    %c0_37 = arith.constant 0 : index
    %105 = vector.load %arg8[%c0_36, %c0_37] : memref<1x256xf32, #tpu.memory_space<vmem>>, vector<1x256xf32>
    %cst_38 = arith.constant dense<0.000000e+00> : vector<64xf32>
    %106 = vector.multi_reduction <add>, %103, %cst_38 [1] : vector<64x256xf32> to vector<64xf32>
    %107 = vector.shape_cast %106 : vector<64xf32> to vector<64x1xf32>
    %cst_39 = arith.constant 2.560000e+02 : f32
    %108 = vector.broadcast %cst_39 : f32 to vector<64x1xf32>
    %109 = arith.divf %107, %108 : vector<64x1xf32>
    %110 = vector.broadcast %109 : vector<64x1xf32> to vector<64x256xf32>
    %111 = arith.subf %103, %110 : vector<64x256xf32>
    %112 = arith.mulf %111, %111 : vector<64x256xf32>
    %cst_40 = arith.constant dense<0.000000e+00> : vector<64xf32>
    %113 = vector.multi_reduction <add>, %112, %cst_40 [1] : vector<64x256xf32> to vector<64xf32>
    %114 = vector.shape_cast %113 : vector<64xf32> to vector<64x1xf32>
    %cst_41 = arith.constant 2.560000e+02 : f32
    %115 = vector.broadcast %cst_41 : f32 to vector<64x1xf32>
    %116 = arith.divf %114, %115 : vector<64x1xf32>
    %cst_42 = arith.constant 9.99999996E-13 : f32
    %117 = vector.broadcast %cst_42 : f32 to vector<64x1xf32>
    %118 = arith.addf %116, %117 : vector<64x1xf32>
    %119 = math.rsqrt %118 : vector<64x1xf32>
    %120 = vector.broadcast %119 : vector<64x1xf32> to vector<64x256xf32>
    %121 = arith.mulf %111, %120 : vector<64x256xf32>
    %122 = vector.broadcast %104 : vector<1x256xf32> to vector<64x256xf32>
    %123 = arith.mulf %121, %122 : vector<64x256xf32>
    %124 = vector.broadcast %105 : vector<1x256xf32> to vector<64x256xf32>
    %125 = arith.addf %123, %124 : vector<64x256xf32>
    %126 = arith.truncf %125 : vector<64x256xf32> to vector<64x256xbf16>
    %c0_43 = arith.constant 0 : index
    %c0_44 = arith.constant 0 : index
    %127 = vector.load %arg9[%c0_43, %c0_44] : memref<256x512xbf16, #tpu.memory_space<vmem>>, vector<256x512xbf16>
    %cst_45 = arith.constant dense<0.000000e+00> : vector<64x512xf32>
    %128 = tpu.matmul %126, %127, %cst_45 {dimension_numbers = #tpu.dot_dimension_numbers<[1], [0], [0], [1], [0, 0, 1, 1], [], []>} : vector<64x256xbf16>, vector<256x512xbf16>, vector<64x512xf32> -> vector<64x512xf32>
    %c0_46 = arith.constant 0 : index
    %c0_47 = arith.constant 0 : index
    %129 = vector.load %arg10[%c0_46, %c0_47] : memref<1x512xf32, #tpu.memory_space<vmem>>, vector<1x512xf32>
    %130 = vector.broadcast %129 : vector<1x512xf32> to vector<64x512xf32>
    %131 = arith.addf %128, %130 : vector<64x512xf32>
    %cst_48 = arith.constant 5.000000e-01 : f32
    %132 = vector.broadcast %cst_48 : f32 to vector<64x512xf32>
    %133 = arith.mulf %132, %131 : vector<64x512xf32>
    %cst_49 = arith.constant 4.471500e-02 : f32
    %134 = vector.broadcast %cst_49 : f32 to vector<64x512xf32>
    %135 = arith.mulf %134, %131 : vector<64x512xf32>
    %136 = arith.mulf %135, %131 : vector<64x512xf32>
    %137 = arith.mulf %136, %131 : vector<64x512xf32>
    %138 = arith.addf %131, %137 : vector<64x512xf32>
    %cst_50 = arith.constant 0.797884583 : f32
    %139 = vector.broadcast %cst_50 : f32 to vector<64x512xf32>
    %140 = arith.mulf %139, %138 : vector<64x512xf32>
    %141 = math.tanh %140 : vector<64x512xf32>
    %cst_51 = arith.constant 1.000000e+00 : f32
    %142 = vector.broadcast %cst_51 : f32 to vector<64x512xf32>
    %143 = arith.addf %142, %141 : vector<64x512xf32>
    %144 = arith.mulf %133, %143 : vector<64x512xf32>
    %145 = arith.truncf %144 : vector<64x512xf32> to vector<64x512xbf16>
    %c0_52 = arith.constant 0 : index
    %c0_53 = arith.constant 0 : index
    %146 = vector.load %arg11[%c0_52, %c0_53] : memref<512x256xbf16, #tpu.memory_space<vmem>>, vector<512x256xbf16>
    %cst_54 = arith.constant dense<0.000000e+00> : vector<64x256xf32>
    %147 = tpu.matmul %145, %146, %cst_54 {dimension_numbers = #tpu.dot_dimension_numbers<[1], [0], [0], [1], [0, 0, 1, 1], [], []>} : vector<64x512xbf16>, vector<512x256xbf16>, vector<64x256xf32> -> vector<64x256xf32>
    %c0_55 = arith.constant 0 : index
    %c0_56 = arith.constant 0 : index
    %148 = vector.load %arg12[%c0_55, %c0_56] : memref<1x256xf32, #tpu.memory_space<vmem>>, vector<1x256xf32>
    %149 = vector.broadcast %148 : vector<1x256xf32> to vector<64x256xf32>
    %150 = arith.addf %147, %149 : vector<64x256xf32>
    %151 = arith.addf %150, %125 : vector<64x256xf32>
    %c0_57 = arith.constant 0 : index
    %c0_58 = arith.constant 0 : index
    %152 = vector.load %arg13[%c0_57, %c0_58] : memref<1x256xf32, #tpu.memory_space<vmem>>, vector<1x256xf32>
    %c0_59 = arith.constant 0 : index
    %c0_60 = arith.constant 0 : index
    %153 = vector.load %arg14[%c0_59, %c0_60] : memref<1x256xf32, #tpu.memory_space<vmem>>, vector<1x256xf32>
    %cst_61 = arith.constant dense<0.000000e+00> : vector<64xf32>
    %154 = vector.multi_reduction <add>, %151, %cst_61 [1] : vector<64x256xf32> to vector<64xf32>
    %155 = vector.shape_cast %154 : vector<64xf32> to vector<64x1xf32>
    %cst_62 = arith.constant 2.560000e+02 : f32
    %156 = vector.broadcast %cst_62 : f32 to vector<64x1xf32>
    %157 = arith.divf %155, %156 : vector<64x1xf32>
    %158 = vector.broadcast %157 : vector<64x1xf32> to vector<64x256xf32>
    %159 = arith.subf %151, %158 : vector<64x256xf32>
    %160 = arith.mulf %159, %159 : vector<64x256xf32>
    %cst_63 = arith.constant dense<0.000000e+00> : vector<64xf32>
    %161 = vector.multi_reduction <add>, %160, %cst_63 [1] : vector<64x256xf32> to vector<64xf32>
    %162 = vector.shape_cast %161 : vector<64xf32> to vector<64x1xf32>
    %cst_64 = arith.constant 2.560000e+02 : f32
    %163 = vector.broadcast %cst_64 : f32 to vector<64x1xf32>
    %164 = arith.divf %162, %163 : vector<64x1xf32>
    %cst_65 = arith.constant 9.99999996E-13 : f32
    %165 = vector.broadcast %cst_65 : f32 to vector<64x1xf32>
    %166 = arith.addf %164, %165 : vector<64x1xf32>
    %167 = math.rsqrt %166 : vector<64x1xf32>
    %168 = vector.broadcast %167 : vector<64x1xf32> to vector<64x256xf32>
    %169 = arith.mulf %159, %168 : vector<64x256xf32>
    %170 = vector.broadcast %152 : vector<1x256xf32> to vector<64x256xf32>
    %171 = arith.mulf %169, %170 : vector<64x256xf32>
    %172 = vector.broadcast %153 : vector<1x256xf32> to vector<64x256xf32>
    %173 = arith.addf %171, %172 : vector<64x256xf32>
    %c0_66 = arith.constant 0 : index
    %c0_67 = arith.constant 0 : index
    %c0_68 = arith.constant 0 : index
    %174 = vector.load %arg15[%c0_66, %c0_67, %c0_68] : memref<1x64x256xf32, #tpu.memory_space<vmem>>, vector<1x64x256xf32>
    %175 = vector.shape_cast %174 : vector<1x64x256xf32> to vector<64x256xf32>
    %176 = vector.shape_cast %173 : vector<64x256xf32> to vector<1x64x256xf32>
    tpu.vector_store %arg15[%c0_66, %c0_67, %c0_68], %176 {strides = array<i32>} : memref<1x64x256xf32, #tpu.memory_space<vmem>>, vector<1x64x256xf32>,
    return
  }
  func.func @transform_0(%arg0: i32) -> (i32, i32, i32) {
    %c0_i32 = arith.constant 0 : i32
    %c0_i32_0 = arith.constant 0 : i32
    %c0_i32_1 = arith.constant 0 : i32
    return %arg0, %c0_i32, %c0_i32_0 : i32, i32, i32
  }
  func.func @transform_1(%arg0: i32) -> (i32, i32, i32) {
    %c0_i32 = arith.constant 0 : i32
    %c0_i32_0 = arith.constant 0 : i32
    %c0_i32_1 = arith.constant 0 : i32
    return %arg0, %c0_i32, %c0_i32_0 : i32, i32, i32
  }
  func.func @transform_2(%arg0: i32) -> (i32, i32) {
    %c0_i32 = arith.constant 0 : i32
    %c0_i32_0 = arith.constant 0 : i32
    %c0_i32_1 = arith.constant 0 : i32
    return %c0_i32, %c0_i32_0 : i32, i32
  }
  func.func @transform_3(%arg0: i32) -> (i32, i32) {
    %c0_i32 = arith.constant 0 : i32
    %c0_i32_0 = arith.constant 0 : i32
    %c0_i32_1 = arith.constant 0 : i32
    return %c0_i32, %c0_i32_0 : i32, i32
  }
  func.func @transform_4(%arg0: i32) -> (i32, i32) {
    %c0_i32 = arith.constant 0 : i32
    %c0_i32_0 = arith.constant 0 : i32
    %c0_i32_1 = arith.constant 0 : i32
    return %c0_i32, %c0_i32_0 : i32, i32
  }
  func.func @transform_5(%arg0: i32) -> (i32, i32) {
    %c0_i32 = arith.constant 0 : i32
    %c0_i32_0 = arith.constant 0 : i32
    %c0_i32_1 = arith.constant 0 : i32
    return %c0_i32, %c0_i32_0 : i32, i32
  }
  func.func @transform_6(%arg0: i32) -> (i32, i32) {
    %c0_i32 = arith.constant 0 : i32
    %c0_i32_0 = arith.constant 0 : i32
    %c0_i32_1 = arith.constant 0 : i32
    return %c0_i32, %c0_i32_0 : i32, i32
  }
  func.func @transform_7(%arg0: i32) -> (i32, i32) {
    %c0_i32 = arith.constant 0 : i32
    %c0_i32_0 = arith.constant 0 : i32
    %c0_i32_1 = arith.constant 0 : i32
    return %c0_i32, %c0_i32_0 : i32, i32
  }
  func.func @transform_8(%arg0: i32) -> (i32, i32) {
    %c0_i32 = arith.constant 0 : i32
    %c0_i32_0 = arith.constant 0 : i32
    %c0_i32_1 = arith.constant 0 : i32
    return %c0_i32, %c0_i32_0 : i32, i32
  }
  func.func @transform_9(%arg0: i32) -> (i32, i32) {
    %c0_i32 = arith.constant 0 : i32
    %c0_i32_0 = arith.constant 0 : i32
    %c0_i32_1 = arith.constant 0 : i32
    return %c0_i32, %c0_i32_0 : i32, i32
  }
  func.func @transform_10(%arg0: i32) -> (i32, i32) {
    %c0_i32 = arith.constant 0 : i32
    %c0_i32_0 = arith.constant 0 : i32
    %c0_i32_1 = arith.constant 0 : i32
    return %c0_i32, %c0_i32_0 : i32, i32
  }
  func.func @transform_11(%arg0: i32) -> (i32, i32) {
    %c0_i32 = arith.constant 0 : i32
    %c0_i32_0 = arith.constant 0 : i32
    %c0_i32_1 = arith.constant 0 : i32
    return %c0_i32, %c0_i32_0 : i32, i32
  }
  func.func @transform_12(%arg0: i32) -> (i32, i32) {
    %c0_i32 = arith.constant 0 : i32
    %c0_i32_0 = arith.constant 0 : i32
    %c0_i32_1 = arith.constant 0 : i32
    return %c0_i32, %c0_i32_0 : i32, i32
  }
  func.func @transform_13(%arg0: i32) -> (i32, i32) {
    %c0_i32 = arith.constant 0 : i32
    %c0_i32_0 = arith.constant 0 : i32
    %c0_i32_1 = arith.constant 0 : i32
    return %c0_i32, %c0_i32_0 : i32, i32
  }
  func.func @transform_14(%arg0: i32) -> (i32, i32, i32) {
    %c0_i32 = arith.constant 0 : i32
    %c0_i32_0 = arith.constant 0 : i32
    %c0_i32_1 = arith.constant 0 : i32
    return %arg0, %c0_i32, %c0_i32_0 : i32, i32, i32
  }
}

</mosaic_0001>

<bundles_post_ra>
// kernel: bert_base_uncased_forward.4
= control target key start
LH: loop header
LB: loop body
LE: loop exit
PB: predicated region body
PF: predicated region fallthrough
CT: control target
= control target key end

     0   :  { %s521_s12 = smov 0   ;;  %s689_s0 = inlined_call_operand.vmem [shape: f32[128,256], index: 0, kind: input, shape index: {}]   ;;  %s690_s1 = inlined_call_operand.vmem [shape: f32[1,256], index: 1, kind: input, shape index: {}]   ;;  %s691_s2 = inlined_call_operand.vmem [shape: f32[1,256], index: 2, kind: input, shape index: {}]   ;;  %s692_s3 = inlined_call_operand.vmem [shape: f32[128,256], index: 3, kind: output, shape index: {}]  }
   0x1 LB: > { %s454_s13 = sadd.s32 4294967295, %s499_s12   ;;  %p458_p0 = scmp.ge.s32.totalorder %s499_s12, 1  ;;  %s499_s12 = sphi %s521_s12, %s13_s12  }
   0x2   : > { %p139_p1 = scmp.lt.s32.totalorder %s499_s12, 3 }
   0x4   : > { %p140_p2 = pnand %p458_p0, %p139_p1 }
   0x5   : > { %s459_s14 = sshll.u32 (!%p140_p2), %s454_s13, 3 }
   0x6   : > { %143 = sbr.rel (%p140_p2) target bundleno = 342 (0x156), region = 32  ;;  %p166_p3 = scmp.lt.s32.totalorder (!%p140_p2), %s459_s14, 15 }
   0xb   : > { %s694_s14 = smov (!%p166_p3, %s459_s14), 15 }
   0xc   : > { %s467_s15 = sshll.u32 %s694_s14, 4 }
   0xd   : > { %s170_s18 = scalar_lea.vmem %s689_s0, %s467_s15  ;;  %s624_s25 = scalar_lea.vmem %s692_s3, %s467_s15 }
   0xe   : > { %v179_v0 = vld [vmem:[%s170_s18] sm:$0xff]  ;;  %v180_v1 = vld [vmem:[%s170_s18 + $0x8] sm:$0xff]  ;;  %v181_v5 = vld [vmem:[%s170_s18 + $0x10] sm:$0xff] }
   0xf   : > { %v183_v2 = vld [vmem:[%s170_s18 + $0x20] sm:$0xff]  ;;  %v197_v3 = vadd.f32 %v180_v1, %v179_v0  ;;  %v184_v4 = vld [vmem:[%s170_s18 + $0x28] sm:$0xff]  ;;  %v182_v6 = vld [vmem:[%s170_s18 + $0x18] sm:$0xff] }
  0x10   : > { %v203_v7 = vadd.f32 %v184_v4, %v183_v2  ;;  %v185_v8 = vld [vmem:[%s170_s18 + $0x30] sm:$0xff]  ;;  %v186_v9 = vld [vmem:[%s170_s18 + $0x38] sm:$0xff]  ;;  %v200_v10 = vadd.f32 %v182_v6, %v181_v5  ;;  %v187_v12 = vld [vmem:[%s170_s18 + $0x40] sm:$0xff] }
  0x11   : > { %198 = vadd.xlane.f32.xlu0 %v197_v3  ;;  %v206_v11 = vadd.f32 %v186_v9, %v185_v8  ;;  %v188_v13 = vld [vmem:[%s170_s18 + $0x48] sm:$0xff]  ;;  %v189_v14 = vld [vmem:[%s170_s18 + $0x50] sm:$0xff]  ;;  %v190_v15 = vld [vmem:[%s170_s18 + $0x58] sm:$0xff] }
  0x12   : > { %204 = vadd.xlane.f32.xlu1 %v203_v7  ;;  %v209_v16 = vadd.f32 %v188_v13, %v187_v12  ;;  %v212_v17 = vadd.f32 %v190_v15, %v189_v14  ;;  %v191_v18 = vld [vmem:[%s170_s18 + $0x60] sm:$0xff]  ;;  %v192_v19 = vld [vmem:[%s170_s18 + $0x68] sm:$0xff]  ;;  %v193_v20 = vld [vmem:[%s170_s18 + $0x70] sm:$0xff] }
  0x13   : > { %v194_v21 = vld [vmem:[%s170_s18 + $0x78] sm:$0xff]  ;;  %v215_v22 = vadd.f32 %v192_v19, %v191_v18 }
  0x14   : > { %v218_v23 = vadd.f32 %v194_v21, %v193_v20 }
  0x15   : > { %201 = vadd.xlane.f32.xlu0 %v200_v10 }
  0x16   : > { %207 = vadd.xlane.f32.xlu1 %v206_v11 }
  0x19   : > { %210 = vadd.xlane.f32.xlu0 %v209_v16 }
  0x1a   : > { %213 = vadd.xlane.f32.xlu1 %v212_v17 }
  0x1d   : > { %216 = vadd.xlane.f32.xlu0 %v215_v22 }
  0x1e   : > { %219 = vadd.xlane.f32.xlu1 %v218_v23 }
  0x9a   : > { %v199_v24 = vpop.xlane.xlu0 %198 }
  0x9b   : > { %v222_v25 = vmul.f32 0.00390625, %v199_v24  ;;  %v205_v26 = vpop.xlane.xlu1 %204 }
  0x9c   : > { %v224_v27 = vmul.f32 0.00390625, %v205_v26 }
  0x9d   : > { %v537_v28 = vsub.f32 %v179_v0, %v222_v25  ;;  %v539_v29 = vsub.f32 %v180_v1, %v222_v25 }
  0x9e   : > { %v541_v30 = vsub.f32 %v183_v2, %v224_v27  ;;  %v543_v31 = vsub.f32 %v184_v4, %v224_v27  ;;  %v202_v32 = vpop.xlane.xlu0 %201 }
  0x9f   : > { %v223_v33 = vmul.f32 0.00390625, %v202_v32  ;;  %v208_v34 = vpop.xlane.xlu1 %207  ;;  %v246_v35 = vmul.f32 %v537_v28, %v537_v28  ;;  %v247_v36 = vmul.f32 %v539_v29, %v539_v29 }
  0xa0   : > { %v225_v37 = vmul.f32 0.00390625, %v208_v34  ;;  %v250_v38 = vmul.f32 %v541_v30, %v541_v30  ;;  %v251_v39 = vmul.f32 %v543_v31, %v543_v31 }
  0xa1   : > { %v553_v40 = vsub.f32 %v181_v5, %v223_v33  ;;  %v555_v41 = vsub.f32 %v182_v6, %v223_v33  ;;  %v262_v42 = vadd.f32 %v247_v36, %v246_v35 }
  0xa2   : > { %v557_v43 = vsub.f32 %v185_v8, %v225_v37  ;;  %v559_v44 = vsub.f32 %v186_v9, %v225_v37  ;;  %v211_v45 = vpop.xlane.xlu0 %210  ;;  %v268_v48 = vadd.f32 %v251_v39, %v250_v38 }
  0xa3   : > { %v226_v46 = vmul.f32 0.00390625, %v211_v45  ;;  %263 = vadd.xlane.f32.xlu0 %v262_v42  ;;  %v214_v47 = vpop.xlane.xlu1 %213  ;;  %v248_v49 = vmul.f32 %v553_v40, %v553_v40  ;;  %v249_v50 = vmul.f32 %v555_v41, %v555_v41 }
  0xa4   : > { %v227_v51 = vmul.f32 0.00390625, %v214_v47  ;;  %v252_v52 = vmul.f32 %v557_v43, %v557_v43  ;;  %v253_v53 = vmul.f32 %v559_v44, %v559_v44  ;;  %v195_v47 = vld [vmem:[%s690_s1] sm:$0x3] }
  0xa5   : > { %v569_v54 = vsub.f32 %v187_v12, %v226_v46  ;;  %v571_v55 = vsub.f32 %v188_v13, %v226_v46  ;;  %v265_v56 = vadd.f32 %v249_v50, %v248_v49 }
  0xa6   : > { %v573_v57 = vsub.f32 %v189_v14, %v227_v51  ;;  %v575_v58 = vsub.f32 %v190_v15, %v227_v51  ;;  %v217_v59 = vpop.xlane.xlu0 %216  ;;  %v271_v62 = vadd.f32 %v253_v53, %v252_v52 }
  0xa7   : > { %v228_v60 = vmul.f32 0.00390625, %v217_v59  ;;  %269 = vadd.xlane.f32.xlu0 %v268_v48  ;;  %266 = vadd.xlane.f32.xlu1 %v265_v56  ;;  %v220_v61 = vpop.xlane.xlu1 %219  ;;  %v254_v63 = vmul.f32 %v569_v54, %v569_v54  ;;  %v255_v0 = vmul.f32 %v571_v55, %v571_v55  ;;  %v196_v48 = vld [vmem:[%s691_s2] sm:$0x3] }
  0xa8   : > { %v229_v1 = vmul.f32 0.00390625, %v220_v61  ;;  %v256_v2 = vmul.f32 %v573_v57, %v573_v57  ;;  %v257_v3 = vmul.f32 %v575_v58, %v575_v58 }
  0xa9   : > { %v585_v4 = vsub.f32 %v191_v18, %v228_v60  ;;  %v587_v5 = vsub.f32 %v192_v19, %v228_v60  ;;  %v274_v6 = vadd.f32 %v255_v0, %v254_v63  ;;  %v327_v19 = vlaneseq }
  0xaa   : > { %v589_v7 = vsub.f32 %v193_v20, %v229_v1  ;;  %v591_v8 = vsub.f32 %v194_v21, %v229_v1  ;;  %v277_v9 = vadd.f32 %v257_v3, %v256_v2 }
  0xab   : > { %272 = vadd.xlane.f32.xlu1 %v271_v62  ;;  %275 = vadd.xlane.f32.xlu0 %v274_v6  ;;  %v258_v10 = vmul.f32 %v585_v4, %v585_v4  ;;  %v259_v11 = vmul.f32 %v587_v5, %v587_v5  ;;  %v328_v26 = vshrl.u32 %v327_v19, 7 }
  0xac   : > { %v260_v12 = vmul.f32 %v589_v7, %v589_v7  ;;  %v261_v13 = vmul.f32 %v591_v8, %v591_v8 }
  0xad   : > { %v280_v14 = vadd.f32 %v259_v11, %v258_v10  ;;  %v329_v37 = vsub.s32 0, %v328_v26  ;;  %v333_v42 = vsub.s32 1, %v328_v26 }
  0xae   : > { %v283_v15 = vadd.f32 %v261_v13, %v260_v12 }
  0xaf   : > { %278 = vadd.xlane.f32.xlu1 %v277_v9  ;;  %281 = vadd.xlane.f32.xlu0 %v280_v14  ;;  %v607_v52 = vrot.slane %v195_v47, %v329_v37  ;;  %v609_v53 = vrot.slane %v195_v47, %v333_v42  ;;  %v611_v60 = vrot.slane %v196_v48, %v329_v37 }
  0xb0   : > { %v613_v61 = vrot.slane %v196_v48, %v333_v42 }
  0xb3   : > { %284 = vadd.xlane.f32.xlu1 %v283_v15 }
 0x12c   : > { %v264_v16 = vpop.xlane.xlu0 %263 }
 0x12d   : > { %v286_v17 = vmul.f32 0.00390625, %v264_v16 }
 0x12f   : > { %v294_v18 = vadd.f32 1e-12, %v286_v17 }
 0x130   : > { %v267_v20 = vpop.xlane.xlu1 %266  ;;  %v270_v21 = vpop.xlane.xlu0 %269 }
 0x131   : > { %477 = vrsqrt.f32 %v294_v18  ;;  %v287_v22 = vmul.f32 0.00390625, %v267_v20  ;;  %v288_v23 = vmul.f32 0.00390625, %v270_v21 }
 0x133   : > { %v295_v24 = vadd.f32 1e-12, %v287_v22  ;;  %v296_v25 = vadd.f32 1e-12, %v288_v23 }
 0x134   : > { %v273_v27 = vpop.xlane.xlu1 %272  ;;  %v276_v32 = vpop.xlane.xlu0 %275 }
 0x135   : > { %479 = vrsqrt.f32 %v295_v24  ;;  %v289_v33 = vmul.f32 0.00390625, %v273_v27  ;;  %v290_v34 = vmul.f32 0.00390625, %v276_v32 }
 0x136   : > { %481 = vrsqrt.f32 %v296_v25 }
 0x137   : > { %v297_v35 = vadd.f32 1e-12, %v289_v33  ;;  %v298_v36 = vadd.f32 1e-12, %v290_v34 }
 0x138   : > { %v279_v38 = vpop.xlane.xlu1 %278  ;;  %v282_v39 = vpop.xlane.xlu0 %281 }
 0x139   : > { %483 = vrsqrt.f32 %v297_v35  ;;  %v291_v45 = vmul.f32 0.00390625, %v279_v38  ;;  %v292_v46 = vmul.f32 0.00390625, %v282_v39 }
 0x13a   : > { %485 = vrsqrt.f32 %v298_v36 }
 0x13b   : > { %v299_v49 = vadd.f32 1e-12, %v291_v45  ;;  %v300_v50 = vadd.f32 1e-12, %v292_v46 }
 0x13c   : > { %v285_v51 = vpop.xlane.xlu1 %284 }
 0x13d   : > { %487 = vrsqrt.f32 %v299_v49  ;;  %v293_v56 = vmul.f32 0.00390625, %v285_v51 }
 0x13e   : > { %v478_v59 = vpop.eup %477  ;;  %489 = vrsqrt.f32 %v300_v50 }
 0x13f   : > { %v310_v62 = vmul.f32 %v478_v59, %v537_v28  ;;  %v311_v63 = vmul.f32 %v478_v59, %v539_v29  ;;  %v301_v0 = vadd.f32 1e-12, %v293_v56 }
 0x141   : > { %v337_v1 = vmul.f32 %v607_v52, %v310_v62  ;;  %v338_v2 = vmul.f32 %v609_v53, %v311_v63  ;;  %491 = vrsqrt.f32 %v301_v0 }
 0x142   : > { %v480_v3 = vpop.eup %479 }
 0x143   : > { %v482_v6 = vpop.eup %481  ;;  %v364_v28 = vadd.f32 %v611_v60, %v337_v1  ;;  %v365_v29 = vadd.f32 %v613_v61, %v338_v2  ;;  %v312_v9 = vmul.f32 %v480_v3, %v553_v40  ;;  %v313_v10 = vmul.f32 %v480_v3, %v555_v41 }
 0x144   : > { %v314_v11 = vmul.f32 %v482_v6, %v541_v30  ;;  %v315_v12 = vmul.f32 %v482_v6, %v543_v31 }
 0x145   : > { %380 = vst [vmem:[%s624_s25] sm:$0xff] %v364_v28  ;;  %381 = vst [vmem:[%s624_s25 + $0x8] sm:$0xff] %v365_v29  ;;  %v339_v13 = vmul.f32 %v607_v52, %v312_v9  ;;  %v340_v14 = vmul.f32 %v609_v53, %v313_v10 }
 0x146   : > { %v484_v15 = vpop.eup %483  ;;  %v341_v16 = vmul.f32 %v607_v52, %v314_v11  ;;  %v342_v40 = vmul.f32 %v609_v53, %v315_v12 }
 0x147   : > { %v486_v41 = vpop.eup %485  ;;  %v366_v30 = vadd.f32 %v611_v60, %v339_v13  ;;  %v367_v31 = vadd.f32 %v613_v61, %v340_v14  ;;  %v316_v17 = vmul.f32 %v484_v15, %v557_v43  ;;  %v317_v18 = vmul.f32 %v484_v15, %v559_v44 }
 0x148   : > { %v368_v19 = vadd.f32 %v611_v60, %v341_v16  ;;  %v369_v20 = vadd.f32 %v613_v61, %v342_v40  ;;  %v318_v21 = vmul.f32 %v486_v41, %v569_v54  ;;  %v319_v22 = vmul.f32 %v486_v41, %v571_v55 }
 0x149   : > { %382 = vst [vmem:[%s624_s25 + $0x10] sm:$0xff] %v366_v30  ;;  %383 = vst [vmem:[%s624_s25 + $0x18] sm:$0xff] %v367_v31  ;;  %v343_v23 = vmul.f32 %v607_v52, %v316_v17  ;;  %v344_v24 = vmul.f32 %v609_v53, %v317_v18 }
 0x14a   : > { %v488_v25 = vpop.eup %487  ;;  %384 = vst [vmem:[%s624_s25 + $0x20] sm:$0xff] %v368_v19  ;;  %385 = vst [vmem:[%s624_s25 + $0x28] sm:$0xff] %v369_v20  ;;  %v345_v43 = vmul.f32 %v607_v52, %v318_v21  ;;  %v346_v44 = vmul.f32 %v609_v53, %v319_v22 }
 0x14b   : > { %v490_v54 = vpop.eup %489  ;;  %v370_v55 = vadd.f32 %v611_v60, %v343_v23  ;;  %v371_v26 = vadd.f32 %v613_v61, %v344_v24  ;;  %v320_v27 = vmul.f32 %v488_v25, %v573_v57  ;;  %v321_v32 = vmul.f32 %v488_v25, %v575_v58 }
 0x14c   : > { %v372_v33 = vadd.f32 %v611_v60, %v345_v43  ;;  %v373_v34 = vadd.f32 %v613_v61, %v346_v44  ;;  %v322_v35 = vmul.f32 %v490_v54, %v585_v4  ;;  %v323_v36 = vmul.f32 %v490_v54, %v587_v5 }
 0x14d   : > { %386 = vst [vmem:[%s624_s25 + $0x30] sm:$0xff] %v370_v55  ;;  %387 = vst [vmem:[%s624_s25 + $0x38] sm:$0xff] %v371_v26  ;;  %v347_v37 = vmul.f32 %v607_v52, %v320_v27  ;;  %v348_v38 = vmul.f32 %v609_v53, %v321_v32 }
 0x14e   : > { %v492_v57 = vpop.eup %491  ;;  %388 = vst [vmem:[%s624_s25 + $0x40] sm:$0xff] %v372_v33  ;;  %389 = vst [vmem:[%s624_s25 + $0x48] sm:$0xff] %v373_v34  ;;  %v349_v58 = vmul.f32 %v607_v52, %v322_v35  ;;  %v350_v4 = vmul.f32 %v609_v53, %v323_v36 }
 0x14f   : > { %v374_v5 = vadd.f32 %v611_v60, %v347_v37  ;;  %v375_v39 = vadd.f32 %v613_v61, %v348_v38  ;;  %v324_v42 = vmul.f32 %v492_v57, %v589_v7  ;;  %v325_v45 = vmul.f32 %v492_v57, %v591_v8 }
 0x150   : > { %v376_v46 = vadd.f32 %v611_v60, %v349_v58  ;;  %v377_v47 = vadd.f32 %v613_v61, %v350_v4 }
 0x151   : > { %390 = vst [vmem:[%s624_s25 + $0x50] sm:$0xff] %v374_v5  ;;  %391 = vst [vmem:[%s624_s25 + $0x58] sm:$0xff] %v375_v39  ;;  %v351_v48 = vmul.f32 %v607_v52, %v324_v42  ;;  %v352_v49 = vmul.f32 %v609_v53, %v325_v45 }
 0x152   : > { %392 = vst [vmem:[%s624_s25 + $0x60] sm:$0xff] %v376_v46  ;;  %393 = vst [vmem:[%s624_s25 + $0x68] sm:$0xff] %v377_v47 }
 0x153   : > { %v378_v50 = vadd.f32 %v611_v60, %v351_v48  ;;  %v379_v51 = vadd.f32 %v613_v61, %v352_v49 }
 0x155   : > { %394 = vst [vmem:[%s624_s25 + $0x70] sm:$0xff] %v378_v50  ;;  %395 = vst [vmem:[%s624_s25 + $0x78] sm:$0xff] %v379_v51 }
 0x156 PF: > { %s13_s12 = sadd.s32 1, %s499_s12  }
 0x157   : > { %p10_p4 = scmp.ge.s32.totalorder %s13_s12, 4  }
 0x159   :  { %12 = sbr.rel (!%p10_p4) target bundleno = 1 (0x1), region = 62 }

// kernel: bert_base_uncased_forward.7
= control target key start
LH: loop header
LB: loop body
LE: loop exit
PB: predicated region body
PF: predicated region fallthrough
CT: control target
= control target key end

     0   :  { %s825_s0 = inlined_call_operand.vmem [shape: f32[2,256], index: 0, kind: input, shape index: {}]   ;;  %s826_s1 = inlined_call_operand.vmem [shape: bf16[256,256], index: 1, kind: input, shape index: {}]   ;;  %s827_s2 = inlined_call_operand.vmem [shape: f32[1,256], index: 2, kind: input, shape index: {}]   ;;  %s828_s3 = inlined_call_operand.vmem [shape: bf16[256,128], index: 3, kind: input, shape index: {}]   ;;  %s829_s4 = inlined_call_operand.vmem [shape: f32[1,128], index: 4, kind: input, shape index: {}]   ;;  %s830_s5 = inlined_call_operand.hbm [shape: f32[2,128], index: 5, kind: output, shape index: {}]  }
   0x1   :  { %v548_v0 = vld [vmem:[%s826_s1 + $0x74] ss:$8 sps:$4 sm:$0xff]   ;;  %v550_v1 = vld [vmem:[%s826_s1 + $0x70] ss:$8 sps:$4 sm:$0xff]   ;;  %v551_v2 = vld [vmem:[%s826_s1 + $0x64] ss:$8 sps:$4 sm:$0xff]  }
   0x2   :  { %240 = vmatprep.subr.bf16.mxu0 %v548_v0  ;;  %v553_v3 = vld [vmem:[%s826_s1 + $0x60] ss:$8 sps:$4 sm:$0xff]   ;;  %v554_v4 = vld [vmem:[%s826_s1 + $0x54] ss:$8 sps:$4 sm:$0xff]   ;;  %v556_v5 = vld [vmem:[%s826_s1 + $0x50] ss:$8 sps:$4 sm:$0xff]  }
   0x3   :  { %241 = vmatpush1.bf16.msra.mxu0 %v550_v1  ;;  %v557_v6 = vld [vmem:[%s826_s1 + $0x44] ss:$8 sps:$4 sm:$0xff]   ;;  %v559_v7 = vld [vmem:[%s826_s1 + $0x40] ss:$8 sps:$4 sm:$0xff]   ;;  %v560_v8 = vld [vmem:[%s826_s1 + $0x34] ss:$8 sps:$4 sm:$0xff]  }
   0x4   :  { %242 = vmatprep.subr.bf16.mxu0 %v551_v2  ;;  %v562_v9 = vld [vmem:[%s826_s1 + $0x30] ss:$8 sps:$4 sm:$0xff]   ;;  %v563_v10 = vld [vmem:[%s826_s1 + $0x24] ss:$8 sps:$4 sm:$0xff]   ;;  %v565_v11 = vld [vmem:[%s826_s1 + $0x20] ss:$8 sps:$4 sm:$0xff]  }
   0x5   :  { %v566_v12 = vld [vmem:[%s826_s1 + $0x14] ss:$8 sps:$4 sm:$0xff]   ;;  %v568_v13 = vld [vmem:[%s826_s1 + $0x10] ss:$8 sps:$4 sm:$0xff]   ;;  %v569_v15 = vld [vmem:[%s826_s1 + $0x4] ss:$8 sps:$4 sm:$0xff]  }
   0x6   :  { %v475_v14 = vld.sshfl [vmem:[%s825_s0] sm:$0x33 pattern:$0x76325410]  ;;  %v596_v17 = vld [vmem:[%s828_s3 + $0x78] sm:$0xff]   ;;  %v598_v20 = vld [vmem:[%s828_s3 + $0x70] sm:$0xff]  }
   0x7   :  { %243 = vmatpush1.bf16.msra.mxu0 %v553_v3  ;;  %v31_v16 = vcombine.high %v475_v14, %v475_v14  ;;  %v597_v18 = vld [vmem:[%s828_s3 + $0x38] sm:$0xff]   ;;  %525 = vmatprep.subr.bf16.mxu1 %v596_v17  ;;  %v571_v21 = vld [vmem:[%s826_s1] ss:$8 sps:$4 sm:$0xff]   ;;  %v599_v22 = vld [vmem:[%s828_s3 + $0x30] sm:$0xff]  }
   0x8   :  { %244 = vmatprep.subr.bf16.mxu0 %v554_v4  ;;  %526 = vmatpush3.bf16.msra.mxu1 %v597_v18  ;;  %v600_v23 = vld [vmem:[%s828_s3 + $0x68] sm:$0xff]   ;;  %v572_v24 = vld [vmem:[%s826_s1 + $0xf4] ss:$8 sps:$4 sm:$0xff]   ;;  %v574_v26 = vld [vmem:[%s826_s1 + $0xf0] ss:$8 sps:$4 sm:$0xff]  }
   0x9   :  { %v35_v19 = vpack.c.bf16 %v31_v16, %v31_v16  ;;  %527 = vmatprep.subr.bf16.mxu1 %v598_v20  ;;  %v601_v25 = vld [vmem:[%s828_s3 + $0x28] sm:$0xff]  }
   0xa   :  { %v575_v27 = vld [vmem:[%s826_s1 + $0xe4] ss:$8 sps:$4 sm:$0xff]   ;;  %v577_v28 = vld [vmem:[%s826_s1 + $0xe0] ss:$8 sps:$4 sm:$0xff]  }
   0xb   :  { %245 = vmatpush1.bf16.msra.mxu0 %v556_v5  ;;  %272 = vmatprep.mubr.bf16.mxu0 %v35_v19 }
   0xc   :  { %246 = vmatprep.subr.bf16.mxu0 %v557_v6  ;;  %528 = vmatpush3.bf16.msra.mxu1 %v599_v22 }
   0xd   :  { %529 = vmatprep.subr.bf16.mxu1 %v600_v23 }
   0xf   :  { %247 = vmatpush1.bf16.msra.mxu0 %v559_v7 }
  0x10   :  { %248 = vmatprep.subr.bf16.mxu0 %v560_v8  ;;  %530 = vmatpush3.bf16.msra.mxu1 %v601_v25 }
  0x13   :  { %249 = vmatpush1.bf16.msra.mxu0 %v562_v9 }
  0x14   :  { %250 = vmatprep.subr.bf16.mxu0 %v563_v10 }
  0x17   :  { %251 = vmatpush1.bf16.msra.mxu0 %v565_v11 }
  0x18   :  { %252 = vmatprep.subr.bf16.mxu0 %v566_v12 }
  0x1b   :  { %253 = vmatpush1.bf16.msra.mxu0 %v568_v13 }
  0x1c   :  { %254 = vmatprep.subr.bf16.mxu0 %v569_v15 }
  0x1f   :  { %255 = vmatpush1.bf16.msra.mxu0 %v571_v21 }
  0x20   :  { %256 = vmatprep.subr.bf16.mxu0 %v572_v24 }
  0x23   :  { %257 = vmatpush2.bf16.msra.mxu0 %v574_v26 }
  0x24   :  { %10 = vsyncpa [#allocation3], 0  ;;  %258 = vmatprep.subr.bf16.mxu0 %v575_v27  ;;  %v578_v29 = vld [vmem:[%s826_s1 + $0xd4] ss:$8 sps:$4 sm:$0xff]   ;;  %v580_v30 = vld [vmem:[%s826_s1 + $0xd0] ss:$8 sps:$4 sm:$0xff]   ;;  %v34_v41 = vpack.c.bf16 %v475_v14, %v475_v14  ;;  %v70_v52 = vlaneseq }
  0x25   :  { %v581_v31 = vld [vmem:[%s826_s1 + $0xc4] ss:$8 sps:$4 sm:$0xff]   ;;  %v583_v32 = vld [vmem:[%s826_s1 + $0xc0] ss:$8 sps:$4 sm:$0xff]   ;;  %v584_v33 = vld [vmem:[%s826_s1 + $0xb4] ss:$8 sps:$4 sm:$0xff]  }
  0x26   :  { %v586_v34 = vld [vmem:[%s826_s1 + $0xb0] ss:$8 sps:$4 sm:$0xff]   ;;  %v587_v35 = vld [vmem:[%s826_s1 + $0xa4] ss:$8 sps:$4 sm:$0xff]   ;;  %v589_v36 = vld [vmem:[%s826_s1 + $0xa0] ss:$8 sps:$4 sm:$0xff]  }
  0x27   :  { %259 = vmatpush2.bf16.msra.mxu0 %v577_v28  ;;  %v590_v37 = vld [vmem:[%s826_s1 + $0x94] ss:$8 sps:$4 sm:$0xff]   ;;  %v592_v38 = vld [vmem:[%s826_s1 + $0x90] ss:$8 sps:$4 sm:$0xff]   ;;  %v593_v39 = vld [vmem:[%s826_s1 + $0x84] ss:$8 sps:$4 sm:$0xff]  }
  0x28   :  { %260 = vmatprep.subr.bf16.mxu0 %v578_v29  ;;  %v595_v40 = vld [vmem:[%s826_s1 + $0x80] ss:$8 sps:$4 sm:$0xff]   ;;  %v604_v44 = vld [vmem:[%s828_s3 + $0x58] sm:$0xff]   ;;  %v606_v46 = vld [vmem:[%s828_s3 + $0x50] sm:$0xff]   ;;  %v71_v53 = vshrl.u32 %v70_v52, 7  ;;  %s638_s14 = smov [#allocation2]  }
  0x29   :  { %v602_v42 = vld [vmem:[%s828_s3 + $0x60] sm:$0xff]   ;;  %v605_v45 = vld [vmem:[%s828_s3 + $0x18] sm:$0xff]   ;;  %v607_v47 = vld [vmem:[%s828_s3 + $0x10] sm:$0xff]   ;;  %s467_s15 = sshll.u32 %s638_s14, 4  ;;  %s468_s15 = int_to_ptr.vmem [resolvable:$true] %s467_s15 }
  0x2a   :  { %v603_v43 = vld [vmem:[%s828_s3 + $0x20] sm:$0xff]   ;;  %531 = vmatprep.subr.bf16.mxu1 %v602_v42  ;;  %v608_v48 = vld [vmem:[%s828_s3 + $0x48] sm:$0xff]   ;;  %v72_v54 = vsub.s32 0, %v71_v53  ;;  %v76_v56 = vsub.s32 1, %v71_v53  ;;  %s616_s16 = scalar_lea.vmem %s468_s15, 32  ;;  %p621_p1 = scmp.lt.s32.totalorder %s468_s15, %s468_s15 }
  0x2b   :  { %261 = vmatpush2.bf16.msra.mxu0 %v580_v30  ;;  %532 = vmatpush3.bf16.msra.mxu1 %v603_v43  ;;  %v609_v49 = vld [vmem:[%s828_s3 + $0x8] sm:$0xff]   ;;  %v610_v50 = vld [vmem:[%s828_s3 + $0x40] sm:$0xff]   ;;  %p617_p0 = scmp.ne.s32.totalorder %s468_s15, %s616_s16  ;;  %p622_p2 = scmp.lt.s32.totalorder %s616_s16, %s616_s16 }
  0x2c   :  { %262 = vmatprep.subr.bf16.mxu0 %v581_v31  ;;  %533 = vmatprep.subr.bf16.mxu1 %v604_v44  ;;  %v611_v51 = vld [vmem:[%s828_s3] sm:$0xff]  }
  0x2d   :  { %v68_v55 = vld [vmem:[%s827_s2] sm:$0x3]  ;;  %p623_p3 = por %p622_p2, %p621_p1 }
  0x2e   :  { %v73_v57 = vrot.slane %v68_v55, %v72_v54  ;;  %v77_v58 = vrot.slane %v68_v55, %v76_v56  ;;  %v508_v7 = vld [vmem:[%s829_s4] ss:$0 sm:$0xff] }
  0x2f   :  { %263 = vmatpush2.bf16.msra.mxu0 %v583_v32  ;;  %534 = vmatpush3.bf16.msra.mxu1 %v605_v45  ;;  %p624_p4 = pnand %p623_p3, %p617_p0 }
  0x30   :  { %264 = vmatprep.subr.bf16.mxu0 %v584_v33  ;;  %535 = vmatprep.subr.bf16.mxu1 %v606_v46 }
  0x33   :  { %265 = vmatpush2.bf16.msra.mxu0 %v586_v34  ;;  %536 = vmatpush3.bf16.msra.mxu1 %v607_v47 }
  0x34   :  { %266 = vmatprep.subr.bf16.mxu0 %v587_v35  ;;  %537 = vmatprep.subr.bf16.mxu1 %v608_v48 }
  0x37   :  { %267 = vmatpush2.bf16.msra.mxu0 %v589_v36  ;;  %538 = vmatpush3.bf16.msra.mxu1 %v609_v49 }
  0x38   :  { %268 = vmatprep.subr.bf16.mxu0 %v590_v37  ;;  %539 = vmatprep.subr.bf16.mxu1 %v610_v50 }
  0x3b   :  { %269 = vmatpush2.bf16.msra.mxu0 %v592_v38  ;;  %540 = vmatpush3.bf16.msra.mxu1 %v611_v51 }
  0x3c   :  { %270 = vmatprep.subr.bf16.mxu0 %v593_v39 }
  0x3f   :  { %271 = vmatpush2.bf16.msra.mxu0 %v595_v40 }
  0x42   :  { %273 = vmatmul.mubr.bf16.vlgmr.msra.gmra.mxu0 %v34_v41 }
 0x102   :  { %v274_v59 = vpop.f32.mrf.mxu0 }
 0x103   :  { %v275_v60 = vadd.f32 %v274_v59, %v73_v57 }
 0x104   :  { %v276_v61 = vpop.f32.mrf.mxu0 }
 0x105   :  { %v277_v62 = vadd.f32 %v276_v61, %v77_v58  ;;  %612 = vtanh.f32 %v275_v60 }
 0x106   :  { %v278_v63 = vpop.f32.mrf.mxu0 }
 0x107   :  { %614 = vtanh.f32 %v277_v62 }
 0x108   :  { %v279_v0 = vpop.f32.mrf.mxu0 }
 0x112   :  { %v613_v1 = vpop.eup %612 }
 0x113   :  { %v283_v4 = vpack.c.bf16 %v613_v1, %v613_v1 }
 0x114   :  { %v615_v2 = vpop.eup %614 }
 0x115   :  { %v284_v3 = vpack.c.bf16 %v615_v2, %v615_v2 }
 0x117   :  { %452 = vmatprep.mubr.bf16.mxu1 %v284_v3 }
 0x118   :  { %453 = vmatmul.mubr.bf16.vlgmr.msra.gmra.mxu1 %v283_v4 }
 0x1d8   :  { %v541_v5 = vpop.f32.mrf.mxu1 }
 0x1da   :  { %v542_v6 = vpop.f32.mrf.mxu1 }
 0x1db   :  { %v543_v8 = vadd.f32 %v542_v6, %v541_v5 }
 0x1dc   :  { %v544_v9 = vpop.f32.mrf.mxu1 }
 0x1dd   :  { %v455_v10 = vadd.f32 %v543_v8, %v508_v7 }
 0x1de   :  { %v545_v11 = vpop.f32.mrf.mxu1 }
 0x1df   :  { %460 = vst [vmem:[#allocation2] sm:$0x3] %v455_v10 }
 0x1e0   :  { %627 = shalt.err (!%p624_p4)
}
 0x1e1   :  { %470 = dma.vmem_to_hbm [thread:$0]  %s468_s15, 32, %s830_s5, [#allocation3]  }
 0x1e2   :  { %636 = dma.done.wait [#allocation3], 32  }
 0x1e3   :  { %637 = vsyncadd [#allocation3], 4294967264 }
 0x1e4   :  { %474 = vsyncpa [#allocation3], 1 }

// kernel: bert_base_uncased_forward.5
= control target key start
LH: loop header
LB: loop body
LE: loop exit
PB: predicated region body
PF: predicated region fallthrough
CT: control target
= control target key end

     0   :  { %s6062_s29 = smov 0   ;;  %s8421_s0 = inlined_call_operand.vmem [shape: f32[2,64,256], index: 0, kind: input, shape index: {}]   ;;  %s8422_s1 = inlined_call_operand.vmem [shape: f32[2,1,64], index: 1, kind: input, shape index: {}]   ;;  %s8423_s2 = inlined_call_operand.vmem [shape: bf16[256,768], index: 2, kind: input, shape index: {}]   ;;  %s8424_s3 = inlined_call_operand.vmem [shape: f32[1,768], index: 3, kind: input, shape index: {}]   ;;  %s8425_s4 = inlined_call_operand.vmem [shape: bf16[256,256], index: 4, kind: input, shape index: {}]   ;;  %s8426_s5 = inlined_call_operand.vmem [shape: f32[1,256], index: 5, kind: input, shape index: {}]   ;;  %s8427_s6 = inlined_call_operand.vmem [shape: f32[1,256], index: 6, kind: input, shape index: {}]   ;;  %s8428_s7 = inlined_call_operand.vmem [shape: f32[1,256], index: 7, kind: input, shape index: {}]   ;;  %s8429_s8 = inlined_call_operand.vmem [shape: bf16[256,512], index: 8, kind: input, shape index: {}]   ;;  %s8430_s9 = inlined_call_operand.vmem [shape: f32[1,512], index: 9, kind: input, shape index: {}]   ;;  %s8431_s10 = inlined_call_operand.vmem [shape: bf16[512,256], index: 10, kind: input, shape index: {}]   ;;  %s8432_s11 = inlined_call_operand.vmem [shape: f32[1,256], index: 11, kind: input, shape index: {}]   ;;  %s8433_s12 = inlined_call_operand.vmem [shape: f32[1,256], index: 12, kind: input, shape index: {}]   ;;  %s8434_s13 = inlined_call_operand.vmem [shape: f32[1,256], index: 13, kind: input, shape index: {}]   ;;  %s8435_s14 = inlined_call_operand.vmem [shape: f32[2,64,256], index: 14, kind: output, shape index: {}]  }
   0x1 LB: > { %s4794_s30 = sadd.s32 4294967295, %s5984_s29   ;;  %p4798_p0 = scmp.ge.s32.totalorder %s5984_s29, 1  ;;  %s5984_s29 = sphi %s6062_s29, %s24_s29  }
   0x2   : > { %p420_p1 = scmp.lt.s32.totalorder %s5984_s29, 3 }
   0x4   : > { %p421_p2 = pnand %p4798_p0, %p420_p1 }
   0x6   : > { %424 = sbr.rel (%p421_p2) target bundleno = 3844 (0xf04), region = 76 }
   0xb   : > { %v5353_v0 = vld [vmem:[%s8423_s2 + $0x154] ss:$24 sps:$4 sm:$0xff]   ;;  %v5357_v2 = vld [vmem:[%s8423_s2 + $0x150] ss:$24 sps:$4 sm:$0xff]   ;;  %v5359_v4 = vld [vmem:[%s8423_s2 + $0x124] ss:$24 sps:$4 sm:$0xff]  }
   0xc   : > { %v5355_v1 = vld [vmem:[%s8423_s2 + $0x15c] ss:$24 sps:$4 sm:$0xff]   ;;  %1116 = vmatprep.subr.bf16.mxu0 %v5353_v0  ;;  %v5358_v3 = vld [vmem:[%s8423_s2 + $0x158] ss:$24 sps:$4 sm:$0xff]   ;;  %v5361_v5 = vld [vmem:[%s8423_s2 + $0x12c] ss:$24 sps:$4 sm:$0xff]  }
   0xd   : > { %1189 = vmatprep.subr.bf16.mxu1 %v5355_v1  ;;  %1117 = vmatpush1.bf16.msra.mxu0 %v5357_v2  ;;  %v5363_v6 = vld [vmem:[%s8423_s2 + $0x120] ss:$24 sps:$4 sm:$0xff]   ;;  %v5365_v8 = vld [vmem:[%s8423_s2 + $0xf4] ss:$24 sps:$4 sm:$0xff]   ;;  %v5369_v10 = vld [vmem:[%s8423_s2 + $0xf0] ss:$24 sps:$4 sm:$0xff]  }
   0xe   : > { %1190 = vmatpush1.bf16.msra.mxu1 %v5358_v3  ;;  %1118 = vmatprep.subr.bf16.mxu0 %v5359_v4  ;;  %v5364_v7 = vld [vmem:[%s8423_s2 + $0x128] ss:$24 sps:$4 sm:$0xff]   ;;  %v5367_v9 = vld [vmem:[%s8423_s2 + $0xfc] ss:$24 sps:$4 sm:$0xff]   ;;  %v5370_v11 = vld [vmem:[%s8423_s2 + $0xf8] ss:$24 sps:$4 sm:$0xff]  }
   0xf   : > { %1191 = vmatprep.subr.bf16.mxu1 %v5361_v5  ;;  %v5371_v12 = vld [vmem:[%s8423_s2 + $0xc4] ss:$24 sps:$4 sm:$0xff]   ;;  %v5375_v14 = vld [vmem:[%s8423_s2 + $0xc0] ss:$24 sps:$4 sm:$0xff]   ;;  %v5377_v16 = vld [vmem:[%s8423_s2 + $0x94] ss:$24 sps:$4 sm:$0xff]  }
  0x10   : > { %v5373_v13 = vld [vmem:[%s8423_s2 + $0xcc] ss:$24 sps:$4 sm:$0xff]   ;;  %v5376_v15 = vld [vmem:[%s8423_s2 + $0xc8] ss:$24 sps:$4 sm:$0xff]   ;;  %v5379_v17 = vld [vmem:[%s8423_s2 + $0x9c] ss:$24 sps:$4 sm:$0xff]  }
  0x11   : > { %1119 = vmatpush1.bf16.msra.mxu0 %v5363_v6  ;;  %v5381_v18 = vld [vmem:[%s8423_s2 + $0x90] ss:$24 sps:$4 sm:$0xff]   ;;  %v5383_v20 = vld [vmem:[%s8423_s2 + $0x64] ss:$24 sps:$4 sm:$0xff]   ;;  %v5387_v22 = vld [vmem:[%s8423_s2 + $0x60] ss:$24 sps:$4 sm:$0xff]  }
  0x12   : > { %1192 = vmatpush1.bf16.msra.mxu1 %v5364_v7  ;;  %1120 = vmatprep.subr.bf16.mxu0 %v5365_v8  ;;  %v5382_v19 = vld [vmem:[%s8423_s2 + $0x98] ss:$24 sps:$4 sm:$0xff]   ;;  %v5385_v21 = vld [vmem:[%s8423_s2 + $0x6c] ss:$24 sps:$4 sm:$0xff]   ;;  %v5388_v23 = vld [vmem:[%s8423_s2 + $0x68] ss:$24 sps:$4 sm:$0xff]  }
  0x13   : > { %1193 = vmatprep.subr.bf16.mxu1 %v5367_v9  ;;  %v5389_v24 = vld [vmem:[%s8423_s2 + $0x34] ss:$24 sps:$4 sm:$0xff]   ;;  %v5393_v26 = vld [vmem:[%s8423_s2 + $0x30] ss:$24 sps:$4 sm:$0xff]   ;;  %v5395_v28 = vld [vmem:[%s8423_s2 + $0x4] ss:$24 sps:$4 sm:$0xff]  }
  0x14   : > { %v5391_v25 = vld [vmem:[%s8423_s2 + $0x3c] ss:$24 sps:$4 sm:$0xff]   ;;  %v5394_v27 = vld [vmem:[%s8423_s2 + $0x38] ss:$24 sps:$4 sm:$0xff]   ;;  %v5397_v29 = vld [vmem:[%s8423_s2 + $0xc] ss:$24 sps:$4 sm:$0xff]  }
  0x15   : > { %1121 = vmatpush1.bf16.msra.mxu0 %v5369_v10  ;;  %v5399_v30 = vld [vmem:[%s8423_s2] ss:$24 sps:$4 sm:$0xff]   ;;  %v5401_v32 = vld [vmem:[%s8423_s2 + $0x2d4] ss:$24 sps:$4 sm:$0xff]   ;;  %p469_p3 = scmp.lt.s32.totalorder %s4794_s30, 1  ;;  %vm1359_vm0 = vcmask 523264  }
  0x16   : > { %1194 = vmatpush1.bf16.msra.mxu1 %v5370_v11  ;;  %1122 = vmatprep.subr.bf16.mxu0 %v5371_v12  ;;  %v5400_v31 = vld [vmem:[%s8423_s2 + $0x8] ss:$24 sps:$4 sm:$0xff]   ;;  %v5403_v33 = vld [vmem:[%s8423_s2 + $0x2dc] ss:$24 sps:$4 sm:$0xff]   ;;  %v5406_v35 = vld [vmem:[%s8423_s2 + $0x2d8] ss:$24 sps:$4 sm:$0xff]  }
  0x17   : > { %1195 = vmatprep.subr.bf16.mxu1 %v5373_v13  ;;  %v5405_v34 = vld [vmem:[%s8423_s2 + $0x2d0] ss:$24 sps:$4 sm:$0xff]   ;;  %v5407_v36 = vld [vmem:[%s8423_s2 + $0x2a4] ss:$24 sps:$4 sm:$0xff]   ;;  %s8523_s30 = smov (!%p469_p3, %s4794_s30), 1  ;;  %s5986_s24 = smov 64  }
  0x18   : > { %v5409_v37 = vld [vmem:[%s8423_s2 + $0x2ac] ss:$24 sps:$4 sm:$0xff]   ;;  %v5411_v38 = vld [vmem:[%s8423_s2 + $0x2a0] ss:$24 sps:$4 sm:$0xff]   ;;  %s5094_s27 = sshll.u32 %s8523_s30, 7  ;;  %s6568_s23 = scalar_lea.vmem %s8422_s1, %s8523_s30 }
  0x19   : > { %1123 = vmatpush1.bf16.msra.mxu0 %v5375_v14  ;;  %v5412_v39 = vld [vmem:[%s8423_s2 + $0x2a8] ss:$24 sps:$4 sm:$0xff]   ;;  %v5413_v40 = vld [vmem:[%s8423_s2 + $0x274] ss:$24 sps:$4 sm:$0xff]   ;;  %v5418_v43 = vld [vmem:[%s8423_s2 + $0x278] ss:$24 sps:$4 sm:$0xff]   ;;  %s6214_s22 = scalar_lea.vmem %s8421_s0, %s5094_s27  ;;  %s8356_s20 = scalar_lea.vmem %s8435_s14, %s5094_s27 }
  0x1a   : > { %1196 = vmatpush1.bf16.msra.mxu1 %v5376_v15  ;;  %1124 = vmatprep.subr.bf16.mxu0 %v5377_v16  ;;  %v5415_v41 = vld [vmem:[%s8423_s2 + $0x27c] ss:$24 sps:$4 sm:$0xff]   ;;  %v5417_v42 = vld [vmem:[%s8423_s2 + $0x270] ss:$24 sps:$4 sm:$0xff]   ;;  %v5421_v45 = vld [vmem:[%s8423_s2 + $0x24c] ss:$24 sps:$4 sm:$0xff]  }
  0x1b   : > { %1197 = vmatprep.subr.bf16.mxu1 %v5379_v17  ;;  %v5419_v44 = vld [vmem:[%s8423_s2 + $0x244] ss:$24 sps:$4 sm:$0xff]   ;;  %v484_v46 = vld [vmem:[%s6214_s22 + $0x8] sm:$0xff]  ;;  %v5423_v47 = vld [vmem:[%s8423_s2 + $0x240] ss:$24 sps:$4 sm:$0xff]  }
  0x1c   : > { %v486_v48 = vld [vmem:[%s6214_s22 + $0x18] sm:$0xff]  ;;  %v5424_v49 = vld [vmem:[%s8423_s2 + $0x248] ss:$24 sps:$4 sm:$0xff]   ;;  %v5425_v51 = vld [vmem:[%s8423_s2 + $0x214] ss:$24 sps:$4 sm:$0xff]  }
  0x1d   : > { %1125 = vmatpush1.bf16.msra.mxu0 %v5381_v18  ;;  %v6230_v50 = vpack.c.bf16 %v486_v48, %v484_v46  ;;  %v5427_v52 = vld [vmem:[%s8423_s2 + $0x21c] ss:$24 sps:$4 sm:$0xff]   ;;  %v5429_v53 = vld [vmem:[%s8423_s2 + $0x210] ss:$24 sps:$4 sm:$0xff]   ;;  %v5433_v56 = vld [vmem:[%s8423_s2 + $0x1ec] ss:$24 sps:$4 sm:$0xff]  }
  0x1e   : > { %1198 = vmatpush1.bf16.msra.mxu1 %v5382_v19  ;;  %1126 = vmatprep.subr.bf16.mxu0 %v5383_v20  ;;  %v5430_v54 = vld [vmem:[%s8423_s2 + $0x218] ss:$24 sps:$4 sm:$0xff]   ;;  %v5431_v55 = vld [vmem:[%s8423_s2 + $0x1e4] ss:$24 sps:$4 sm:$0xff]   ;;  %v5436_v58 = vld [vmem:[%s8423_s2 + $0x1e8] ss:$24 sps:$4 sm:$0xff]  }
  0x1f   : > { %1199 = vmatprep.subr.bf16.mxu1 %v5385_v21  ;;  %1221 = vmatprep.mubr.bf16.mxu1 %v6230_v50  ;;  %v5435_v57 = vld [vmem:[%s8423_s2 + $0x1e0] ss:$24 sps:$4 sm:$0xff]   ;;  %v5437_v59 = vld [vmem:[%s8423_s2 + $0x1b4] ss:$24 sps:$4 sm:$0xff]   ;;  %v5441_v61 = vld [vmem:[%s8423_s2 + $0x1b0] ss:$24 sps:$4 sm:$0xff]  }
  0x20   : > { %1148 = vmatprep.mubr.bf16.mxu0 %v6230_v50  ;;  %v5439_v60 = vld [vmem:[%s8423_s2 + $0x1bc] ss:$24 sps:$4 sm:$0xff]   ;;  %v5442_v62 = vld [vmem:[%s8423_s2 + $0x1b8] ss:$24 sps:$4 sm:$0xff]   ;;  %v5445_v0 = vld [vmem:[%s8423_s2 + $0x18c] ss:$24 sps:$4 sm:$0xff]  }
  0x21   : > { %1127 = vmatpush1.bf16.msra.mxu0 %v5387_v22  ;;  %v5443_v63 = vld [vmem:[%s8423_s2 + $0x184] ss:$24 sps:$4 sm:$0xff]   ;;  %v5447_v1 = vld [vmem:[%s8423_s2 + $0x180] ss:$24 sps:$4 sm:$0xff]   ;;  %v485_v4 = vld [vmem:[%s6214_s22 + $0x10] sm:$0xff] }
  0x22   : > { %1200 = vmatpush1.bf16.msra.mxu1 %v5388_v23  ;;  %1128 = vmatprep.subr.bf16.mxu0 %v5389_v24  ;;  %v5448_v2 = vld [vmem:[%s8423_s2 + $0x188] ss:$24 sps:$4 sm:$0xff]   ;;  %v5451_v5 = vld [vmem:[%s8423_s2 + $0x164] ss:$24 sps:$4 sm:$0xff]   ;;  %v5454_v11 = vld [vmem:[%s8423_s2 + $0x134] ss:$24 sps:$4 sm:$0xff]  }
  0x23   : > { %1201 = vmatprep.subr.bf16.mxu1 %v5391_v25  ;;  %v483_v3 = vld [vmem:[%s6214_s22] sm:$0xff]  ;;  %v488_v6 = vld [vmem:[%s6214_s22 + $0x28] sm:$0xff]  ;;  %v490_v7 = vld [vmem:[%s6214_s22 + $0x38] sm:$0xff] }
  0x24   : > { %v6289_v8 = vpack.c.bf16 %v485_v4, %v483_v3  ;;  %v5449_v9 = vld [vmem:[%s8423_s2 + $0x160] ss:$24 sps:$4 sm:$0xff]   ;;  %v6294_v10 = vpack.c.bf16 %v490_v7, %v488_v6  ;;  %v5452_v12 = vld [vmem:[%s8423_s2 + $0x130] ss:$24 sps:$4 sm:$0xff]   ;;  %v5457_v15 = vld [vmem:[%s8423_s2 + $0x104] ss:$24 sps:$4 sm:$0xff]  }
  0x25   : > { %1129 = vmatpush1.bf16.msra.mxu0 %v5393_v26  ;;  %v487_v13 = vld [vmem:[%s6214_s22 + $0x20] sm:$0xff]  ;;  %v489_v14 = vld [vmem:[%s6214_s22 + $0x30] sm:$0xff]  ;;  %v492_v16 = vld [vmem:[%s6214_s22 + $0x48] sm:$0xff] }
  0x26   : > { %1202 = vmatpush1.bf16.msra.mxu1 %v5394_v27  ;;  %1130 = vmatprep.subr.bf16.mxu0 %v5395_v28  ;;  %v494_v17 = vld [vmem:[%s6214_s22 + $0x58] sm:$0xff]  ;;  %v6316_v19 = vpack.c.bf16 %v489_v14, %v487_v13  ;;  %v5460_v20 = vld [vmem:[%s8423_s2 + $0xd4] ss:$24 sps:$4 sm:$0xff]   ;;  %v5458_v22 = vld [vmem:[%s8423_s2 + $0xd0] ss:$24 sps:$4 sm:$0xff]  }
  0x27   : > { %1203 = vmatprep.subr.bf16.mxu1 %v5397_v29  ;;  %v5455_v18 = vld [vmem:[%s8423_s2 + $0x100] ss:$24 sps:$4 sm:$0xff]   ;;  %v6321_v21 = vpack.c.bf16 %v494_v17, %v492_v16  ;;  %v493_v24 = vld [vmem:[%s6214_s22 + $0x50] sm:$0xff]  ;;  %v5463_v25 = vld [vmem:[%s8423_s2 + $0xa4] ss:$24 sps:$4 sm:$0xff]  }
  0x28   : > { %v491_v23 = vld [vmem:[%s6214_s22 + $0x40] sm:$0xff]  ;;  %v496_v26 = vld [vmem:[%s6214_s22 + $0x68] sm:$0xff]  ;;  %v498_v27 = vld [vmem:[%s6214_s22 + $0x78] sm:$0xff] }
  0x29   : > { %1131 = vmatpush1.bf16.msra.mxu0 %v5399_v30  ;;  %v5461_v28 = vld [vmem:[%s8423_s2 + $0xa0] ss:$24 sps:$4 sm:$0xff]   ;;  %v504_v29 = vpack.c.bf16 %v493_v24, %v491_v23  ;;  %v5466_v30 = vld [vmem:[%s8423_s2 + $0x74] ss:$24 sps:$4 sm:$0xff]   ;;  %v5487_v48 = vld [vmem:[%s8423_s2 + $0x224] ss:$24 sps:$4 sm:$0xff]  }
  0x2a   : > { %1204 = vmatpush1.bf16.msra.mxu1 %v5400_v31  ;;  %1132 = vmatprep.subr.bf16.mxu0 %v5401_v32  ;;  %v507_v31 = vpack.c.bf16 %v498_v27, %v496_v26  ;;  %v5464_v32 = vld [vmem:[%s8423_s2 + $0x70] ss:$24 sps:$4 sm:$0xff]   ;;  %v5484_v46 = vld [vmem:[%s8423_s2 + $0x254] ss:$24 sps:$4 sm:$0xff]  }
  0x2b   : > { %1205 = vmatprep.subr.bf16.mxu1 %v5403_v33  ;;  %v495_v33 = vld [vmem:[%s6214_s22 + $0x60] sm:$0xff] }
  0x2d   : > { %1133 = vmatpush2.bf16.msra.mxu0 %v5405_v34  ;;  %v497_v34 = vld [vmem:[%s6214_s22 + $0x70] sm:$0xff] }
  0x2e   : > { %1206 = vmatpush2.bf16.msra.mxu1 %v5406_v35  ;;  %1134 = vmatprep.subr.bf16.mxu0 %v5407_v36  ;;  %v5469_v35 = vld [vmem:[%s8423_s2 + $0x44] ss:$24 sps:$4 sm:$0xff]   ;;  %v5467_v36 = vld [vmem:[%s8423_s2 + $0x40] ss:$24 sps:$4 sm:$0xff]  }
  0x2f   : > { %1207 = vmatprep.subr.bf16.mxu1 %v5409_v37  ;;  %v506_v37 = vpack.c.bf16 %v497_v34, %v495_v33 }
  0x31   : > { %1135 = vmatpush2.bf16.msra.mxu0 %v5411_v38  ;;  %v5472_v38 = vld [vmem:[%s8423_s2 + $0x14] ss:$24 sps:$4 sm:$0xff]  }
  0x32   : > { %1208 = vmatpush2.bf16.msra.mxu1 %v5412_v39  ;;  %1136 = vmatprep.subr.bf16.mxu0 %v5413_v40  ;;  %v5470_v39 = vld [vmem:[%s8423_s2 + $0x10] ss:$24 sps:$4 sm:$0xff]   ;;  %v5475_v40 = vld [vmem:[%s8423_s2 + $0x2e4] ss:$24 sps:$4 sm:$0xff]  }
  0x33   : > { %1209 = vmatprep.subr.bf16.mxu1 %v5415_v41  ;;  %v5473_v41 = vld [vmem:[%s8423_s2 + $0x2e0] ss:$24 sps:$4 sm:$0xff]  }
  0x35   : > { %1137 = vmatpush2.bf16.msra.mxu0 %v5417_v42  ;;  %v5478_v42 = vld [vmem:[%s8423_s2 + $0x2b4] ss:$24 sps:$4 sm:$0xff]  }
  0x36   : > { %1210 = vmatpush2.bf16.msra.mxu1 %v5418_v43  ;;  %1138 = vmatprep.subr.bf16.mxu0 %v5419_v44  ;;  %v5476_v43 = vld [vmem:[%s8423_s2 + $0x2b0] ss:$24 sps:$4 sm:$0xff]   ;;  %v5481_v44 = vld [vmem:[%s8423_s2 + $0x284] ss:$24 sps:$4 sm:$0xff]  }
  0x37   : > { %1211 = vmatprep.subr.bf16.mxu1 %v5421_v45  ;;  %v5479_v45 = vld [vmem:[%s8423_s2 + $0x280] ss:$24 sps:$4 sm:$0xff]  }
  0x39   : > { %1139 = vmatpush2.bf16.msra.mxu0 %v5423_v47  ;;  %v5482_v47 = vld [vmem:[%s8423_s2 + $0x250] ss:$24 sps:$4 sm:$0xff]  }
  0x3a   : > { %1212 = vmatpush2.bf16.msra.mxu1 %v5424_v49  ;;  %1140 = vmatprep.subr.bf16.mxu0 %v5425_v51  ;;  %v5485_v49 = vld [vmem:[%s8423_s2 + $0x220] ss:$24 sps:$4 sm:$0xff]   ;;  %v5488_v51 = vld [vmem:[%s8423_s2 + $0x1f0] ss:$24 sps:$4 sm:$0xff]  }
  0x3b   : > { %1213 = vmatprep.subr.bf16.mxu1 %v5427_v52  ;;  %v5493_v52 = vld [vmem:[%s8423_s2 + $0x1c4] ss:$24 sps:$4 sm:$0xff]  }
  0x3d   : > { %1141 = vmatpush2.bf16.msra.mxu0 %v5429_v53  ;;  %v5491_v53 = vld [vmem:[%s8423_s2 + $0x1c0] ss:$24 sps:$4 sm:$0xff]  }
  0x3e   : > { %1214 = vmatpush2.bf16.msra.mxu1 %v5430_v54  ;;  %1142 = vmatprep.subr.bf16.mxu0 %v5431_v55  ;;  %v5496_v54 = vld [vmem:[%s8423_s2 + $0x194] ss:$24 sps:$4 sm:$0xff]   ;;  %v5494_v55 = vld [vmem:[%s8423_s2 + $0x190] ss:$24 sps:$4 sm:$0xff]  }
  0x3f   : > { %1215 = vmatprep.subr.bf16.mxu1 %v5433_v56  ;;  %v606_v56 = vlaneseq }
  0x41   : > { %1143 = vmatpush2.bf16.msra.mxu0 %v5435_v57  ;;  %v6413_v57 = vshrl.u32 %v606_v56, 7 }
  0x42   : > { %1216 = vmatpush2.bf16.msra.mxu1 %v5436_v58  ;;  %1144 = vmatprep.subr.bf16.mxu0 %v5437_v59 }
  0x43   : > { %1217 = vmatprep.subr.bf16.mxu1 %v5439_v60  ;;  %v620_v58 = vsub.s32 3, %v6413_v57  ;;  %v6417_v59 = vsub.s32 0, %v6413_v57  ;;  %v6420_v60 = vsub.s32 1, %v6413_v57 }
  0x45   : > { %1145 = vmatpush2.bf16.msra.mxu0 %v5441_v61  ;;  %8464 = vst [vmem:[#allocation2_spill] sm:$0xff] %v6417_v59  ;;  %8465 = vst [vmem:[#allocation3_spill] sm:$0xff] %v6420_v60  ;;  %v6425_v61 = vld [vmem:[%s8424_s3] sm:$0x3f] }
  0x46   : > { %1218 = vmatpush2.bf16.msra.mxu1 %v5442_v62  ;;  %1146 = vmatprep.subr.bf16.mxu0 %v5443_v63  ;;  %v6430_v62 = vrot.slane %v6425_v61, %v620_v58  ;;  %v6434_v63 = vrot.slane %v6425_v61, %v6417_v59 }
  0x47   : > { %1219 = vmatprep.subr.bf16.mxu1 %v5445_v0 }
  0x49   : > { %1147 = vmatpush2.bf16.msra.mxu0 %v5447_v1 }
  0x4a   : > { %1220 = vmatpush2.bf16.msra.mxu1 %v5448_v2  ;;  %1262 = vmatprep.subr.bf16.mxu0 %v5451_v5  ;;  %v613_v2 = vrot.slane %v6425_v61, %v6420_v60 }
  0x4c   : > { %1149 = vmatmul.mubr.bf16.vlgmr.msra.gmra.mxu0 %v6289_v8 }
  0x4d   : > { %1222 = vmatmul.mubr.bf16.vlgmr.msra.gmra.mxu1 %v6289_v8  ;;  %1263 = vmatpush1.bf16.msra.mxu0 %v5449_v9 }
  0x4e   : > { %1231 = vmatprep.mubr.bf16.mxu1 %v6294_v10  ;;  %1264 = vmatprep.subr.bf16.mxu0 %v5454_v11 }
  0x4f   : > { %1158 = vmatprep.mubr.bf16.mxu0 %v6294_v10 }
  0x51   : > { %1265 = vmatpush1.bf16.msra.mxu0 %v5452_v12 }
  0x52   : > { %1266 = vmatprep.subr.bf16.mxu0 %v5457_v15 }
  0x54   : > { %1159 = vmatmul.mubr.bf16.gmra.mxu0 %v6316_v19 }
  0x55   : > { %1232 = vmatmul.mubr.bf16.gmra.mxu1 %v6316_v19  ;;  %1267 = vmatpush1.bf16.msra.mxu0 %v5455_v18 }
  0x56   : > { %1241 = vmatprep.mubr.bf16.mxu1 %v6321_v21  ;;  %1268 = vmatprep.subr.bf16.mxu0 %v5460_v20 }
  0x57   : > { %1168 = vmatprep.mubr.bf16.mxu0 %v6321_v21 }
  0x59   : > { %1269 = vmatpush1.bf16.msra.mxu0 %v5458_v22 }
  0x5a   : > { %1270 = vmatprep.subr.bf16.mxu0 %v5463_v25 }
  0x5c   : > { %1169 = vmatmul.mubr.bf16.gmra.mxu0 %v504_v29 }
  0x5d   : > { %1242 = vmatmul.mubr.bf16.gmra.mxu1 %v504_v29  ;;  %1271 = vmatpush1.bf16.msra.mxu0 %v5461_v28 }
  0x5e   : > { %1251 = vmatprep.mubr.bf16.mxu1 %v507_v31  ;;  %1272 = vmatprep.subr.bf16.mxu0 %v5466_v30 }
  0x5f   : > { %1178 = vmatprep.mubr.bf16.mxu0 %v507_v31 }
  0x61   : > { %1273 = vmatpush1.bf16.msra.mxu0 %v5464_v32 }
  0x62   : > { %1274 = vmatprep.subr.bf16.mxu0 %v5469_v35 }
  0x64   : > { %1179 = vmatmul.mubr.bf16.gmra.mxu0 %v506_v37 }
  0x65   : > { %1252 = vmatmul.mubr.bf16.gmra.mxu1 %v506_v37  ;;  %1275 = vmatpush1.bf16.msra.mxu0 %v5467_v36 }
  0x66   : > { %1294 = vmatprep.mubr.bf16.mxu0 %v6230_v50  ;;  %1276 = vmatprep.subr.bf16.mxu0 %v5472_v38  ;;  %v5490_v50 = vld [vmem:[%s8423_s2 + $0x1f4] ss:$24 sps:$4 sm:$0xff]  }
  0x69   : > { %1277 = vmatpush1.bf16.msra.mxu0 %v5470_v39 }
  0x6a   : > { %1278 = vmatprep.subr.bf16.mxu0 %v5475_v40 }
  0x6d   : > { %1279 = vmatpush2.bf16.msra.mxu0 %v5473_v41 }
  0x6e   : > { %1280 = vmatprep.subr.bf16.mxu0 %v5478_v42  ;;  %v616_v42 = vsub.s32 2, %v6413_v57 }
  0x71   : > { %1281 = vmatpush2.bf16.msra.mxu0 %v5476_v43 }
  0x72   : > { %1282 = vmatprep.subr.bf16.mxu0 %v5481_v44 }
  0x75   : > { %1283 = vmatpush2.bf16.msra.mxu0 %v5479_v45 }
  0x76   : > { %1284 = vmatprep.subr.bf16.mxu0 %v5484_v46 }
  0x79   : > { %1285 = vmatpush2.bf16.msra.mxu0 %v5482_v47 }
  0x7a   : > { %1286 = vmatprep.subr.bf16.mxu0 %v5487_v48 }
  0x7d   : > { %1287 = vmatpush2.bf16.msra.mxu0 %v5485_v49 }
  0x7e   : > { %1288 = vmatprep.subr.bf16.mxu0 %v5490_v50 }
  0x81   : > { %1289 = vmatpush2.bf16.msra.mxu0 %v5488_v51  ;;  %v617_v51 = vrot.slane %v6425_v61, %v616_v42 }
  0x82   : > { %1290 = vmatprep.subr.bf16.mxu0 %v5493_v52 }
  0x85   : > { %1291 = vmatpush2.bf16.msra.mxu0 %v5491_v53 }
  0x86   : > { %1292 = vmatprep.subr.bf16.mxu0 %v5496_v54 }
  0x89   : > { %1293 = vmatpush2.bf16.msra.mxu0 %v5494_v55 }
  0x8c   : > { %1295 = vmatmul.mubr.bf16.vlgmr.msra.gmra.mxu0 %v6289_v8 }
  0x8d   : > { %1304 = vmatprep.mubr.bf16.mxu0 %v6294_v10 }
  0x94   : > { %1305 = vmatmul.mubr.bf16.gmra.mxu0 %v6316_v19 }
  0x95   : > { %1314 = vmatprep.mubr.bf16.mxu0 %v6321_v21 }
  0x9c   : > { %1315 = vmatmul.mubr.bf16.gmra.mxu0 %v504_v29 }
  0x9d   : > { %1324 = vmatprep.mubr.bf16.mxu0 %v507_v31 }
  0xa4   : > { %1325 = vmatmul.mubr.bf16.gmra.mxu0 %v506_v37 }
 0x10c   : > { %v1150_v1 = vpop.f32.mrf.mxu0 }
 0x10d   : > { %v6436_v0 = vpop.f32.mrf.mxu1  ;;  %v1151_v6 = vadd.f32 %v1150_v1, %v6434_v63 }
 0x10e   : > { %v1152_v4 = vpop.f32.mrf.mxu0 }
 0x10f   : > { %v1225_v3 = vpop.f32.mrf.mxu1  ;;  %v1153_v9 = vadd.f32 %v1152_v4, %v613_v2 }
 0x110   : > { %v1226_v5 = vadd.f32 %v1225_v3, %v6430_v62  ;;  %v1154_v8 = vpop.f32.mrf.mxu0 }
 0x111   : > { %v6442_v7 = vpop.f32.mrf.mxu1  ;;  %v1155_v10 = vadd.f32 %v1154_v8, %v6434_v63 }
 0x112   : > { %v1156_v12 = vpop.f32.mrf.mxu0 }
 0x113   : > { %v1229_v11 = vpop.f32.mrf.mxu1  ;;  %v6446_v14 = vpack.c.bf16 %v1155_v10, %v1151_v6  ;;  %v1157_v15 = vadd.f32 %v1156_v12, %v613_v2 }
 0x114   : > { %v1230_v13 = vadd.f32 %v1229_v11, %v6430_v62  ;;  %v6448_v17 = vpop.f32.mrf.mxu0 }
 0x115   : > { %v1233_v16 = vpop.f32.mrf.mxu1  ;;  %v6452_v19 = vpack.c.bf16 %v1157_v15, %v1153_v9  ;;  %5168 = vmatprep.mubr.msk.bf16.mxu1 %vm1359_vm0, %v6446_v14  ;;  %v1228_v15 = vadd.f32 %v6442_v7, %v617_v51 }
 0x116   : > { %v6450_v18 = vpack.c.bf16 %v1230_v13, %v1226_v5  ;;  %v1162_v21 = vpop.f32.mrf.mxu0  ;;  %v1234_v12 = vadd.f32 %v1233_v16, %v617_v51 }
 0x117   : > { %v1235_v20 = vpop.f32.mrf.mxu1  ;;  %v1163_v25 = vadd.f32 %v1162_v21, %v613_v2 }
 0x118   : > { %v1236_v22 = vadd.f32 %v1235_v20, %v6430_v62  ;;  %v1164_v24 = vpop.f32.mrf.mxu0  ;;  %v1224_v20 = vadd.f32 %v6436_v0, %v617_v51  ;;  %v1161_v0 = vadd.f32 %v6448_v17, %v6434_v63 }
 0x119   : > { %v1237_v23 = vpop.f32.mrf.mxu1  ;;  %v1165_v7 = vadd.f32 %v1164_v24, %v6434_v63 }
 0x11a   : > { %v1166_v27 = vpop.f32.mrf.mxu0  ;;  %v1238_v11 = vadd.f32 %v1237_v23, %v617_v51  ;;  %v6494_v21 = vpack.c.bf16 %v1228_v15, %v1224_v20 }
 0x11b   : > { %v1239_v26 = vpop.f32.mrf.mxu1  ;;  %v1167_v29 = vadd.f32 %v1166_v27, %v613_v2 }
 0x11c   : > { %v1240_v28 = vadd.f32 %v1239_v26, %v6430_v62  ;;  %v1170_v31 = vpop.f32.mrf.mxu0  ;;  %v6486_v13 = vpack.c.bf16 %v1238_v11, %v1234_v12  ;;  %v1373_v16 = vsel %vm1359_vm0, %v6494_v21, 0  ;;  %v628_v26 = vsub.s32 5, %v6413_v57 }
 0x11d   : > { %v1243_v30 = vpop.f32.mrf.mxu1  ;;  %v6460_v33 = vpack.c.bf16 %v1167_v29, %v1163_v25  ;;  %v1171_v23 = vadd.f32 %v1170_v31, %v6434_v63 }
 0x11e   : > { %v6458_v32 = vpack.c.bf16 %v1240_v28, %v1236_v22  ;;  %v1172_v35 = vpop.f32.mrf.mxu0  ;;  %v1244_v4 = vadd.f32 %v1243_v30, %v617_v51  ;;  %v1376_v22 = vsel %vm1359_vm0, %v6486_v13, 0  ;;  %v6510_v28 = vpack.c.bf16 %v1165_v7, %v1161_v0 }
 0x11f   : > { %v1245_v34 = vpop.f32.mrf.mxu1  ;;  %v1173_v39 = vadd.f32 %v1172_v35, %v613_v2  ;;  %v6517_v31 = vrot.slane %v6425_v61, %v628_v26 }
 0x120   : > { %v1246_v36 = vadd.f32 %v1245_v34, %v6430_v62  ;;  %v1174_v38 = vpop.f32.mrf.mxu0 }
 0x121   : > { %v1247_v37 = vpop.f32.mrf.mxu1  ;;  %v1175_v25 = vadd.f32 %v1174_v38, %v6434_v63 }
 0x122   : > { %v1176_v41 = vpop.f32.mrf.mxu0  ;;  %v1248_v54 = vadd.f32 %v1247_v37, %v617_v51 }
 0x123   : > { %v1249_v40 = vpop.f32.mrf.mxu1  ;;  %v1177_v44 = vadd.f32 %v1176_v41, %v613_v2  ;;  %v6508_v27 = vpack.c.bf16 %v1175_v25, %v1171_v23 }
 0x124   : > { %v1250_v43 = vadd.f32 %v1249_v40, %v6430_v62  ;;  %v1180_v46 = vpop.f32.mrf.mxu0  ;;  %v6476_v8 = vpack.c.bf16 %v1248_v54, %v1244_v4 }
 0x125   : > { %v1253_v45 = vpop.f32.mrf.mxu1  ;;  %v6467_v48 = vpack.c.bf16 %v1177_v44, %v1173_v39  ;;  %v1181_v30 = vadd.f32 %v1180_v46, %v6434_v63 }
 0x126   : > { %v6465_v47 = vpack.c.bf16 %v1250_v43, %v1246_v36  ;;  %v1182_v50 = vpop.f32.mrf.mxu0  ;;  %v1254_v55 = vadd.f32 %v1253_v45, %v617_v51 }
 0x127   : > { %v6469_v49 = vpop.f32.mrf.mxu1  ;;  %v1183_v1 = vadd.f32 %v1182_v50, %v613_v2 }
 0x128   : > { %v1184_v53 = vpop.f32.mrf.mxu0 }
 0x129   : > { %v1257_v52 = vpop.f32.mrf.mxu1  ;;  %v1185_v34 = vadd.f32 %v1184_v53, %v6434_v63 }
 0x12a   : > { %v1258_v56 = vadd.f32 %v1257_v52, %v617_v51  ;;  %v1186_v3 = vpop.f32.mrf.mxu0  ;;  %v624_v52 = vsub.s32 4, %v6413_v57 }
 0x12b   : > { %v1187_v6 = vadd.f32 %v1186_v3, %v613_v2  ;;  %v1379_v2 = vsel %vm1359_vm0, %v6476_v8, 0  ;;  %v6521_v35 = vpack.c.bf16 %v1185_v34, %v1181_v30  ;;  %v1259_v7 = vpop.f32.mrf.mxu1  ;;  %v1256_v34 = vadd.f32 %v6469_v49, %v6430_v62 }
 0x12c   : > { %v6474_v5 = vpack.c.bf16 %v1258_v56, %v1254_v55  ;;  %v625_v56 = vrot.slane %v6425_v61, %v624_v52  ;;  %v1260_v30 = vadd.f32 %v1259_v7, %v6430_v62 }
 0x12d   : > { %v6482_v10 = vpack.c.bf16 %v1187_v6, %v1183_v1 }
 0x12e   : > { %5288 = vmatprep.subr.msk.bf16.mxu1 %vm1359_vm0, %v6474_v5  ;;  %v1382_v9 = vsel %vm1359_vm0, %v6474_v5, 0 }
 0x12f   : > { %5161 = vmatpush3.bf16.xpose.msra.mxu1 %v1382_v9 }
 0x130   : > { %5289 = vmatprep.subr.msk.bf16.mxu1 %vm1359_vm0, %v6476_v8 }
 0x137   : > { %5163 = vmatpush3.bf16.xpose.msra.mxu1 %v1379_v2 }
 0x138   : > { %5290 = vmatprep.subr.msk.bf16.mxu1 %vm1359_vm0, %v6486_v13 }
 0x13f   : > { %5165 = vmatpush3.bf16.xpose.msra.mxu1 %v1376_v22 }
 0x140   : > { %5291 = vmatprep.subr.msk.bf16.mxu1 %vm1359_vm0, %v6494_v21 }
 0x147   : > { %5167 = vmatpush3.bf16.xpose.msra.mxu1 %v1373_v16 }
 0x14c   : > { %v1296_v29 = vpop.f32.mrf.mxu0 }
 0x14d   : > { %v1297_v61 = vadd.f32 %v1296_v29, %v625_v56  ;;  %v6559_v29 = vpack.c.bf16 %v1260_v30, %v1256_v34 }
 0x14e   : > { %5169 = vmatmul.mubr.msk.bf16.vlgmr.msra.gmra.mxu1 %vm1359_vm0, %v6510_v28  ;;  %v1298_v17 = vpop.f32.mrf.mxu0 }
 0x14f   : > { %5172 = vmatprep.mubr.msk.bf16.mxu1 %vm1359_vm0, %v6508_v27  ;;  %v1299_v36 = vadd.f32 %v1298_v17, %v6517_v31  ;;  %v6571_v17 = vld [vmem:[%s6568_s23] ss:$0 sm:$0xff] }
 0x150   : > { %v1300_v24 = vpop.f32.mrf.mxu0 }
 0x151   : > { %v1301_v25 = vadd.f32 %v1300_v24, %v625_v56 }
 0x152   : > { %v1302_v37 = vpop.f32.mrf.mxu0 }
 0x153   : > { %v1303_v38 = vadd.f32 %v1302_v37, %v6517_v31  ;;  %v6551_v26 = vpack.c.bf16 %v1301_v25, %v1297_v61 }
 0x154   : > { %v1306_v39 = vpop.f32.mrf.mxu0 }
 0x155   : > { %v6525_v63 = vpack.c.bf16 %v1303_v38, %v1299_v36  ;;  %v1307_v20 = vadd.f32 %v1306_v39, %v625_v56 }
 0x156   : > { %5173 = vmatmul.mubr.msk.bf16.gmra.mxu1 %vm1359_vm0, %v6521_v35  ;;  %v1308_v40 = vpop.f32.mrf.mxu0 }
 0x157   : > { %v1309_v43 = vadd.f32 %v1308_v40, %v6517_v31 }
 0x158   : > { %v1310_v41 = vpop.f32.mrf.mxu0 }
 0x159   : > { %v1311_v22 = vadd.f32 %v1310_v41, %v625_v56 }
 0x15a   : > { %v1312_v44 = vpop.f32.mrf.mxu0 }
 0x15b   : > { %v1313_v45 = vadd.f32 %v1312_v44, %v6517_v31  ;;  %v6547_v0 = vpack.c.bf16 %v1311_v22, %v1307_v20 }
 0x15c   : > { %v1316_v46 = vpop.f32.mrf.mxu0 }
 0x15d   : > { %v6531_v50 = vpack.c.bf16 %v1313_v45, %v1309_v43  ;;  %v1317_v9 = vadd.f32 %v1316_v46, %v625_v56 }
 0x15e   : > { %v1318_v51 = vpop.f32.mrf.mxu0 }
 0x15f   : > { %v1319_v54 = vadd.f32 %v1318_v51, %v6517_v31 }
 0x160   : > { %v1320_v53 = vpop.f32.mrf.mxu0 }
 0x161   : > { %v1321_v11 = vadd.f32 %v1320_v53, %v625_v56 }
 0x162   : > { %v1322_v55 = vpop.f32.mrf.mxu0 }
 0x163   : > { %v1323_v1 = vadd.f32 %v1322_v55, %v6517_v31  ;;  %v6541_v16 = vpack.c.bf16 %v1321_v11, %v1317_v9 }
 0x164   : > { %v1326_v3 = vpop.f32.mrf.mxu0 }
 0x165   : > { %v6537_v4 = vpack.c.bf16 %v1323_v1, %v1319_v54  ;;  %v1327_v12 = vadd.f32 %v1326_v3, %v625_v56 }
 0x166   : > { %v6539_v6 = vpop.f32.mrf.mxu0 }
 0x168   : > { %v1330_v2 = vpop.f32.mrf.mxu0 }
 0x169   : > { %v1331_v15 = vadd.f32 %v1330_v2, %v625_v56 }
 0x16b   : > { %v6543_v23 = vpack.c.bf16 %v1331_v15, %v1327_v12 }
 0x16d   : > { %5176 = vmatprep.subr.bf16.mxu1 %v6543_v23 }
 0x16e   : > { %5177 = vmatpush3.bf16.msra.mxu1 %v6543_v23 }
 0x16f   : > { %5178 = vmatprep.subr.bf16.mxu1 %v6541_v16 }
 0x172   : > { %5179 = vmatpush3.bf16.msra.mxu1 %v6541_v16 }
 0x173   : > { %5180 = vmatprep.subr.bf16.mxu1 %v6547_v0 }
 0x176   : > { %5181 = vmatpush3.bf16.msra.mxu1 %v6547_v0 }
 0x177   : > { %5182 = vmatprep.subr.bf16.mxu1 %v6551_v26 }
 0x17a   : > { %5183 = vmatpush3.bf16.msra.mxu1 %v6551_v26 }
 0x17b   : > { %5296 = vmatprep.subr.msk.bf16.mxu1 %vm1359_vm0, %v6559_v29 }
 0x20e   : > { %v5170_v24 = vpop.f32.mrf.mxu1 }
 0x20f   : > { %v1451_v36 = vmul.f32 0.125, %v5170_v24 }
 0x210   : > { %v1418_v62 = vpop.f32.mrf.mxu1 }
 0x211   : > { %v1449_v49 = vmul.f32 0.125, %v1418_v62  ;;  %v1465_v37 = vadd.f32 %v6571_v17, %v1451_v36 }
 0x212   : > { %v5171_v38 = vpop.f32.mrf.mxu1 }
 0x213   : > { %v1452_v39 = vmul.f32 0.125, %v5171_v38  ;;  %v1477_v40 = vsel %vm1359_vm0, %v1465_v37, -inf  ;;  %v1463_v41 = vadd.f32 %v6571_v17, %v1449_v49 }
 0x214   : > { %1478 = vmax.xlane.f32.xlu1 %v1477_v40  ;;  %v1421_v43 = vpop.f32.mrf.mxu1 }
 0x215   : > { %v1450_v44 = vmul.f32 0.125, %v1421_v43  ;;  %v1471_v45 = vsel %vm1359_vm0, %v1463_v41, -inf  ;;  %v1466_v46 = vadd.f32 %v6571_v17, %v1452_v39 }
 0x216   : > { %1472 = vmax.xlane.f32.xlu0 %v1471_v45  ;;  %v5174_v51 = vpop.f32.mrf.mxu1 }
 0x217   : > { %v1480_v52 = vsel %vm1359_vm0, %v1466_v46, -inf  ;;  %v1455_v53 = vmul.f32 0.125, %v5174_v51  ;;  %v1464_v54 = vadd.f32 %v6571_v17, %v1450_v44 }
 0x218   : > { %1481 = vmax.xlane.f32.xlu1 %v1480_v52  ;;  %v1434_v55 = vpop.f32.mrf.mxu1 }
 0x219   : > { %v1474_v56 = vsel %vm1359_vm0, %v1464_v54, -inf  ;;  %v1453_v1 = vmul.f32 0.125, %v1434_v55  ;;  %v6582_v3 = vadd.f32 %v6571_v17, %v1455_v53 }
 0x21a   : > { %1475 = vmax.xlane.f32.xlu0 %v1474_v56  ;;  %v5175_v2 = vpop.f32.mrf.mxu1 }
 0x21b   : > { %v1489_v9 = vsel %vm1359_vm0, %v6582_v3, -inf  ;;  %v6587_v11 = vadd.f32 %v6571_v17, %v1453_v1  ;;  %v1456_v15 = vmul.f32 0.125, %v5175_v2 }
 0x21c   : > { %v1437_v20 = vpop.f32.mrf.mxu1 }
 0x21d   : > { %v1483_v12 = vsel %vm1359_vm0, %v6587_v11, -inf  ;;  %v1454_v22 = vmul.f32 0.125, %v1437_v20  ;;  %v1470_v61 = vadd.f32 %v6571_v17, %v1456_v15 }
 0x21e   : > { %1490 = vmax.xlane.f32.xlu0 %v1489_v9 }
 0x21f   : > { %v1492_v25 = vsel %vm1359_vm0, %v1470_v61, -inf  ;;  %v1468_v7 = vadd.f32 %v6571_v17, %v1454_v22 }
 0x221   : > { %v1486_v30 = vsel %vm1359_vm0, %v1468_v7, -inf }
 0x222   : > { %1484 = vmax.xlane.f32.xlu0 %v1483_v12 }
 0x229   : > { %1660 = vrot.lane.b32.xlu1 %v6476_v8, %s5986_s24 }
 0x238   : > { %1662 = vrot.lane.b32.xlu0 %v6474_v5, %s5986_s24 }
 0x24d   : > { %1493 = vmax.xlane.f32.xlu1 %v1492_v25 }
 0x251   : > { %1487 = vmax.xlane.f32.xlu1 %v1486_v30 }
 0x262   : > { %1656 = vrot.lane.b32.xlu1 %v6494_v21, %s5986_s24 }
 0x266   : > { %1644 = vrot.lane.b32.xlu1 %v6446_v14, %s5986_s24 }
 0x29d   : > { %v1479_v5 = vpop.xlane.xlu1 %1478 }
 0x29e   : > { %v1497_v8 = vsub.f32 %v1465_v37, %v1479_v5 }
 0x29f   : > { %v1473_v34 = vpop.xlane.xlu0 %1472 }
 0x2a0   : > { %v1507_v24 = vmul.f32 1.442695, %v1497_v8  ;;  %v1495_v36 = vsub.f32 %v1463_v41, %v1473_v34 }
 0x2a1   : > { %v1482_v62 = vpop.xlane.xlu1 %1481 }
 0x2a2   : > { %5737 = vpow2.f32 %v1507_v24  ;;  %v1503_v49 = vmul.f32 1.442695, %v1495_v36  ;;  %v1498_v38 = vsub.f32 %v1466_v46, %v1482_v62 }
 0x2a3   : > { %v1476_v39 = vpop.xlane.xlu0 %1475 }
 0x2a4   : > { %5739 = vpow2.f32 %v1503_v49  ;;  %v1509_v40 = vmul.f32 1.442695, %v1498_v38  ;;  %v1496_v43 = vsub.f32 %v1464_v54, %v1476_v39 }
 0x2a5   : > { %v1661_v52 = vpop.permute.xlu1 %1660 }
 0x2a6   : > { %5741 = vpow2.f32 %v1509_v40  ;;  %v1505_v44 = vmul.f32 1.442695, %v1496_v43  ;;  %v1683_v1 = vsel %vm1359_vm0, %v1661_v52, 0 }
 0x2a7   : > { %v1491_v45 = vpop.xlane.xlu0 %1490 }
 0x2a8   : > { %5743 = vpow2.f32 %v1505_v44  ;;  %v1501_v12 = vsub.f32 %v6582_v3, %v1491_v45 }
 0x2aa   : > { %v1515_v2 = vmul.f32 1.442695, %v1501_v12 }
 0x2ab   : > { %v1485_v21 = vpop.xlane.xlu0 %1484 }
 0x2ac   : > { %v1499_v15 = vsub.f32 %v6587_v11, %v1485_v21  ;;  %5745 = vpow2.f32 %v1515_v2  ;;  %v1976_v2 = vsel %vm1359_vm0, %v6559_v29, 0 }
 0x2ae   : > { %v1511_v22 = vmul.f32 1.442695, %v1499_v15 }
 0x2af   : > { %v6603_v51 = vpop.eup %5737  ;;  %v1663_v14 = vpop.permute.xlu0 %1662 }
 0x2b0   : > { %5292 = vmatprep.subr.msk.bf16.mxu0 %vm1359_vm0, %v1663_v14  ;;  %v1525_v37 = vsel %vm1359_vm0, %v6603_v51, 0.0  ;;  %v1686_v41 = vsel %vm1359_vm0, %v1663_v14, 0  ;;  %5747 = vpow2.f32 %v1511_v22 }
 0x2b1   : > { %v6609_v46 = vpop.eup %5739  ;;  %1526 = vadd.xlane.f32.xlu0 %v1525_v37  ;;  %5193 = vmatpush3.bf16.xpose.msra.mxu0 %v1686_v41 }
 0x2b2   : > { %5293 = vmatprep.subr.msk.bf16.mxu0 %vm1359_vm0, %v1661_v52  ;;  %v1519_v54 = vsel %vm1359_vm0, %v6609_v46, 0.0 }
 0x2b3   : > { %v5742_v53 = vpop.eup %5741 }
 0x2b4   : > { %v1528_v55 = vsel %vm1359_vm0, %v5742_v53, 0.0 }
 0x2b5   : > { %v5744_v56 = vpop.eup %5743  ;;  %1520 = vadd.xlane.f32.xlu0 %v1519_v54  ;;  %1529 = vadd.xlane.f32.xlu1 %v1528_v55 }
 0x2b6   : > { %v1522_v9 = vsel %vm1359_vm0, %v5744_v56, 0.0 }
 0x2b9   : > { %5195 = vmatpush3.bf16.xpose.msra.mxu0 %v1683_v1  ;;  %1523 = vadd.xlane.f32.xlu1 %v1522_v9 }
 0x2ca   : > { %1646 = vrot.lane.b32.xlu1 %v6510_v28, %s5986_s24 }
 0x2cb   : > { %1658 = vrot.lane.b32.xlu0 %v6486_v13, %s5986_s24  ;;  %v6624_v13 = vpop.eup %5745 }
 0x2cc   : > { %v1537_v3 = vsel %vm1359_vm0, %v6624_v13, 0.0  ;;  %v6628_v11 = vpop.eup %5747 }
 0x2d6   : > { %v1494_v20 = vpop.xlane.xlu1 %1493 }
 0x2d7   : > { %v1502_v25 = vsub.f32 %v1470_v61, %v1494_v20 }
 0x2d9   : > { %v1517_v8 = vmul.f32 1.442695, %v1502_v25 }
 0x2da   : > { %v1488_v30 = vpop.xlane.xlu1 %1487 }
 0x2db   : > { %v1500_v5 = vsub.f32 %v1468_v7, %v1488_v30  ;;  %v1531_v7 = vsel %vm1359_vm0, %v6628_v11, 0.0 }
 0x2dd   : > { %v1513_v34 = vmul.f32 1.442695, %v1500_v5 }
 0x2de   : > { %v1657_v24 = vpop.permute.xlu1 %1656 }
 0x2df   : > { %5749 = vpow2.f32 %v1513_v34 }
 0x2e0   : > { %5751 = vpow2.f32 %v1517_v8 }
 0x2e2   : > { %v1645_v28 = vpop.permute.xlu1 %1644 }
 0x2e3   : > { %5200 = vmatprep.mubr.msk.bf16.mxu0 %vm1359_vm0, %v1645_v28 }
 0x2ea   : > { %1538 = vadd.xlane.f32.xlu0 %v1537_v3 }
 0x2ec   : > { %v6630_v61 = vpop.eup %5749 }
 0x2ed   : > { %v1534_v36 = vsel %vm1359_vm0, %v6630_v61, 0.0  ;;  %v6636_v62 = vpop.eup %5751 }
 0x2ee   : > { %1532 = vadd.xlane.f32.xlu1 %v1531_v7  ;;  %1535 = vadd.xlane.f32.xlu0 %v1534_v36  ;;  %v1540_v49 = vsel %vm1359_vm0, %v6636_v62, 0.0 }
 0x2f2   : > { %1541 = vadd.xlane.f32.xlu1 %v1540_v49 }
 0x303   : > { %1650 = vrot.lane.b32.xlu1 %v6521_v35, %s5986_s24  ;;  %v1677_v35 = vsel %vm1359_vm0, %v1657_v24, 0 }
 0x304   : > { %1648 = vrot.lane.b32.xlu0 %v6508_v27, %s5986_s24 }
 0x33a   : > { %v1527_v38 = vpop.xlane.xlu0 %1526 }
 0x33e   : > { %v1521_v39 = vpop.xlane.xlu0 %1520  ;;  %v1530_v40 = vpop.xlane.xlu1 %1529 }
 0x33f   : > { %5753 = vrcp.f32 %v1530_v40 }
 0x340   : > { %5755 = vrcp.f32 %v1521_v39 }
 0x341   : > { %5757 = vrcp.f32 %v1527_v38 }
 0x342   : > { %v1659_v43 = vpop.permute.xlu0 %1658  ;;  %v1524_v44 = vpop.xlane.xlu1 %1523 }
 0x343   : > { %5759 = vrcp.f32 %v1524_v44  ;;  %5294 = vmatprep.subr.msk.bf16.mxu0 %vm1359_vm0, %v1659_v43  ;;  %v1680_v45 = vsel %vm1359_vm0, %v1659_v43, 0 }
 0x344   : > { %5197 = vmatpush3.bf16.xpose.msra.mxu0 %v1680_v45 }
 0x345   : > { %5295 = vmatprep.subr.msk.bf16.mxu0 %vm1359_vm0, %v1657_v24 }
 0x346   : > { %v1647_v1 = vpop.permute.xlu1 %1646 }
 0x34c   : > { %5199 = vmatpush3.bf16.xpose.msra.mxu0 %v1677_v35  ;;  %v5754_v27 = vpop.eup %5753 }
 0x34d   : > { %v5756_v21 = vpop.eup %5755  ;;  %v1554_v41 = vmul.f32 %v5754_v27, %v5742_v53  ;;  %v1967_v53 = vsel %vm1359_vm0, %v6450_v18, 0 }
 0x34e   : > { %v5758_v14 = vpop.eup %5757  ;;  %v1551_v52 = vmul.f32 %v5756_v21, %v6609_v46  ;;  %v1973_v46 = vsel %vm1359_vm0, %v6465_v47, 0 }
 0x34f   : > { %v1553_v55 = vmul.f32 %v5758_v14, %v6603_v51  ;;  %v1970_v51 = vsel %vm1359_vm0, %v6458_v32, 0 }
 0x350   : > { %v5760_v37 = vpop.eup %5759 }
 0x351   : > { %v1552_v54 = vmul.f32 %v5760_v37, %v5744_v56  ;;  %v1560_v12 = vpack.c.bf16 %v1554_v41, %v1553_v55 }
 0x353   : > { %5201 = vmatmul.mubr.msk.bf16.vlgmr.msra.gmra.mxu0 %vm1359_vm0, %v1647_v1  ;;  %v1559_v9 = vpack.c.bf16 %v1552_v54, %v1551_v52 }
 0x355   : > { %5184 = vmatprep.mubr.msk.bf16.mxu1 %vm1359_vm0, %v1559_v9 }
 0x356   : > { %5185 = vmatmul.mubr.msk.bf16.vlgmr.msra.gmra.mxu1 %vm1359_vm0, %v1560_v12 }
 0x357   : > { %5225 = vmatpush3.bf16.xpose.msra.mxu1 %v1976_v2 }
 0x358   : > { %5297 = vmatprep.subr.msk.bf16.mxu1 %vm1359_vm0, %v6465_v47 }
 0x35f   : > { %5227 = vmatpush3.bf16.xpose.msra.mxu1 %v1973_v46 }
 0x360   : > { %5298 = vmatprep.subr.msk.bf16.mxu1 %vm1359_vm0, %v6458_v32 }
 0x367   : > { %5229 = vmatpush3.bf16.xpose.msra.mxu1 %v1970_v51 }
 0x368   : > { %5299 = vmatprep.subr.msk.bf16.mxu1 %vm1359_vm0, %v6450_v18 }
 0x36f   : > { %5231 = vmatpush3.bf16.xpose.msra.mxu1 %v1967_v53 }
 0x373   : > { %v1539_v56 = vpop.xlane.xlu0 %1538 }
 0x377   : > { %v1536_v15 = vpop.xlane.xlu0 %1535  ;;  %v1533_v20 = vpop.xlane.xlu1 %1532 }
 0x378   : > { %5761 = vrcp.f32 %v1536_v15 }
 0x379   : > { %5763 = vrcp.f32 %v1533_v20 }
 0x37a   : > { %5765 = vrcp.f32 %v1539_v56 }
 0x37b   : > { %v1649_v22 = vpop.permute.xlu0 %1648  ;;  %v1542_v25 = vpop.xlane.xlu1 %1541 }
 0x37c   : > { %5767 = vrcp.f32 %v1542_v25  ;;  %5204 = vmatprep.mubr.msk.bf16.mxu0 %vm1359_vm0, %v1649_v22 }
 0x37f   : > { %v1651_v30 = vpop.permute.xlu1 %1650 }
 0x380   : > { %5205 = vmatmul.mubr.msk.bf16.gmra.mxu0 %vm1359_vm0, %v1651_v30 }
 0x385   : > { %v5762_v5 = vpop.eup %5761 }
 0x386   : > { %v5764_v8 = vpop.eup %5763  ;;  %v1556_v34 = vmul.f32 %v5762_v5, %v6630_v61 }
 0x387   : > { %v5766_v24 = vpop.eup %5765  ;;  %v1555_v28 = vmul.f32 %v5764_v8, %v6628_v11 }
 0x388   : > { %v1557_v36 = vmul.f32 %v5766_v24, %v6624_v13  ;;  %v6683_v13 = vpop.f32.mrf.mxu0 }
 0x389   : > { %v5768_v3 = vpop.eup %5767  ;;  %v1561_v7 = vpack.c.bf16 %v1556_v34, %v1555_v28 }
 0x38a   : > { %v1558_v49 = vmul.f32 %v5768_v3, %v6636_v62 }
 0x38b   : > { %5188 = vmatprep.mubr.msk.bf16.mxu1 %vm1359_vm0, %v1561_v7 }
 0x38c   : > { %v1562_v38 = vpack.c.bf16 %v1558_v49, %v1557_v36 }
 0x38e   : > { %5189 = vmatmul.mubr.msk.bf16.gmra.mxu1 %vm1359_vm0, %v1562_v38 }
 0x38f   : > { %5232 = vmatprep.mubr.msk.bf16.mxu1 %vm1359_vm0, %v6452_v19 }
 0x396   : > { %5233 = vmatmul.mubr.msk.bf16.vlgmr.msra.gmra.mxu1 %vm1359_vm0, %v6460_v33 }
 0x397   : > { %5236 = vmatprep.mubr.msk.bf16.mxu1 %vm1359_vm0, %v6467_v48 }
 0x39e   : > { %5237 = vmatmul.mubr.msk.bf16.gmra.mxu1 %vm1359_vm0, %v6482_v10 }
 0x413   : > { %v5202_v11 = vpop.f32.mrf.mxu0 }
 0x414   : > { %v1755_v62 = vmul.f32 0.125, %v5202_v11 }
 0x415   : > { %v1722_v61 = vpop.f32.mrf.mxu0 }
 0x416   : > { %v1753_v39 = vmul.f32 0.125, %v1722_v61  ;;  %v1763_v21 = vadd.f32 %v6571_v17, %v1755_v62 }
 0x417   : > { %v5203_v40 = vpop.f32.mrf.mxu0 }
 0x418   : > { %v1761_v43 = vadd.f32 %v6571_v17, %v1753_v39  ;;  %v1756_v45 = vmul.f32 0.125, %v5203_v40  ;;  %v1775_v37 = vsel %vm1359_vm0, %v1763_v21, -inf }
 0x419   : > { %v1725_v44 = vpop.f32.mrf.mxu0 }
 0x41a   : > { %v1754_v35 = vmul.f32 0.125, %v1725_v44  ;;  %v1769_v27 = vsel %vm1359_vm0, %v1761_v43, -inf  ;;  %v1764_v52 = vadd.f32 %v6571_v17, %v1756_v45  ;;  %v6703_v44 = vpop.f32.mrf.mxu1 }
 0x41b   : > { %1770 = vmax.xlane.f32.xlu0 %v1769_v27 }
 0x41c   : > { %v1762_v14 = vadd.f32 %v6571_v17, %v1754_v35  ;;  %v1778_v54 = vsel %vm1359_vm0, %v1764_v52, -inf  ;;  %v6711_v27 = vpop.f32.mrf.mxu1 }
 0x41e   : > { %v1772_v41 = vsel %vm1359_vm0, %v1762_v14, -inf }
 0x41f   : > { %1776 = vmax.xlane.f32.xlu0 %v1775_v37  ;;  %1773 = vmax.xlane.f32.xlu1 %v1772_v41  ;;  %v6719_v41 = vpop.f32.mrf.mxu1 }
 0x423   : > { %1779 = vmax.xlane.f32.xlu0 %v1778_v54  ;;  %v6723_v54 = vpop.f32.mrf.mxu1 }
 0x440   : > { %v5206_v55 = vpop.f32.mrf.mxu0 }
 0x441   : > { %v1759_v9 = vmul.f32 0.125, %v5206_v55 }
 0x442   : > { %v1738_v1 = vpop.f32.mrf.mxu0 }
 0x443   : > { %v1757_v12 = vmul.f32 0.125, %v1738_v1  ;;  %v1767_v20 = vadd.f32 %v6571_v17, %v1759_v9 }
 0x444   : > { %v5207_v2 = vpop.f32.mrf.mxu0 }
 0x445   : > { %v1765_v46 = vadd.f32 %v6571_v17, %v1757_v12  ;;  %v1760_v53 = vmul.f32 0.125, %v5207_v2  ;;  %v1787_v25 = vsel %vm1359_vm0, %v1767_v20, -inf }
 0x446   : > { %v1741_v51 = vpop.f32.mrf.mxu0 }
 0x447   : > { %v1758_v56 = vmul.f32 0.125, %v1741_v51  ;;  %v1781_v15 = vsel %vm1359_vm0, %v1765_v46, -inf  ;;  %v1768_v5 = vadd.f32 %v6571_v17, %v1760_v53 }
 0x448   : > { %1782 = vmax.xlane.f32.xlu0 %v1781_v15 }
 0x449   : > { %v1766_v22 = vadd.f32 %v6571_v17, %v1758_v56  ;;  %v1790_v8 = vsel %vm1359_vm0, %v1768_v5, -inf }
 0x44b   : > { %v1784_v30 = vsel %vm1359_vm0, %v1766_v22, -inf }
 0x44c   : > { %1788 = vmax.xlane.f32.xlu0 %v1787_v25  ;;  %1785 = vmax.xlane.f32.xlu1 %v1784_v30 }
 0x44e   : > { %v6725_v55 = vpop.f32.mrf.mxu1 }
 0x450   : > { %1791 = vmax.xlane.f32.xlu1 %v1790_v8  ;;  %v6727_v1 = vpop.f32.mrf.mxu1 }
 0x452   : > { %v6729_v9 = vpop.f32.mrf.mxu1 }
 0x454   : > { %v6731_v2 = vpop.f32.mrf.mxu1 }
 0x4a4   : > { %v1771_v34 = vpop.xlane.xlu0 %1770 }
 0x4a5   : > { %v1793_v24 = vsub.f32 %v1761_v43, %v1771_v34  ;;  %v5234_v34 = vpop.f32.mrf.mxu1 }
 0x4a7   : > { %v1801_v36 = vmul.f32 1.442695, %v1793_v24 }
 0x4a8   : > { %v1777_v28 = vpop.xlane.xlu0 %1776  ;;  %v1774_v3 = vpop.xlane.xlu1 %1773 }
 0x4a9   : > { %v1795_v7 = vsub.f32 %v1763_v21, %v1777_v28  ;;  %v1794_v38 = vsub.f32 %v1762_v14, %v1774_v3 }
 0x4ab   : > { %v1805_v49 = vmul.f32 1.442695, %v1795_v7  ;;  %v1803_v62 = vmul.f32 1.442695, %v1794_v38 }
 0x4ac   : > { %v1780_v11 = vpop.xlane.xlu0 %1779 }
 0x4ad   : > { %5769 = vpow2.f32 %v1805_v49  ;;  %v1796_v61 = vsub.f32 %v1764_v52, %v1780_v11 }
 0x4ae   : > { %5771 = vpow2.f32 %v1801_v36  ;;  %v2012_v36 = vpop.f32.mrf.mxu1 }
 0x4af   : > { %v1807_v39 = vmul.f32 1.442695, %v1796_v61 }
 0x4b0   : > { %v5235_v49 = vpop.f32.mrf.mxu1 }
 0x4b1   : > { %5773 = vpow2.f32 %v1807_v39  ;;  %v2043_v39 = vmul.f32 0.125, %v2012_v36 }
 0x4b2   : > { %5775 = vpow2.f32 %v1803_v62  ;;  %v2015_v38 = vpop.f32.mrf.mxu1 }
 0x4ba   : > { %v6701_v40 = vpop.eup %5769 }
 0x4bb   : > { %v1823_v43 = vsel %vm1359_vm0, %v6701_v40, 0.0  ;;  %v6707_v45 = vpop.eup %5771 }
 0x4bc   : > { %1824 = vadd.xlane.f32.xlu0 %v1823_v43  ;;  %v1817_v21 = vsel %vm1359_vm0, %v6707_v45, 0.0  ;;  %v2046_v43 = vmul.f32 0.125, %v5235_v49 }
 0x4be   : > { %v6709_v35 = vpop.eup %5773 }
 0x4bf   : > { %v1826_v14 = vsel %vm1359_vm0, %v6709_v35, 0.0  ;;  %v6717_v37 = vpop.eup %5775 }
 0x4c0   : > { %1818 = vadd.xlane.f32.xlu0 %v1817_v21  ;;  %1827 = vadd.xlane.f32.xlu1 %v1826_v14  ;;  %v1820_v52 = vsel %vm1359_vm0, %v6717_v37, 0.0 }
 0x4c4   : > { %1821 = vadd.xlane.f32.xlu1 %v1820_v52 }
 0x4d1   : > { %v1783_v12 = vpop.xlane.xlu0 %1782 }
 0x4d2   : > { %v1797_v51 = vsub.f32 %v1765_v46, %v1783_v12  ;;  %v2045_v46 = vmul.f32 0.125, %v5234_v34 }
 0x4d4   : > { %v1809_v25 = vmul.f32 1.442695, %v1797_v51 }
 0x4d5   : > { %v1789_v53 = vpop.xlane.xlu0 %1788  ;;  %v1786_v56 = vpop.xlane.xlu1 %1785 }
 0x4d6   : > { %v1799_v15 = vsub.f32 %v1767_v20, %v1789_v53  ;;  %v1798_v8 = vsub.f32 %v1766_v22, %v1786_v56  ;;  %v5238_v22 = vpop.f32.mrf.mxu1  ;;  %v2044_v53 = vmul.f32 0.125, %v2015_v38 }
 0x4d8   : > { %v1813_v30 = vmul.f32 1.442695, %v1799_v15  ;;  %v1811_v3 = vmul.f32 1.442695, %v1798_v8  ;;  %v2028_v12 = vpop.f32.mrf.mxu1  ;;  %v6755_v15 = vadd.f32 %v6571_v17, %v2043_v39  ;;  %v2049_v39 = vmul.f32 0.125, %v5238_v22 }
 0x4d9   : > { %v1792_v24 = vpop.xlane.xlu1 %1791 }
 0x4da   : > { %5777 = vpow2.f32 %v1813_v30  ;;  %v1800_v28 = vsub.f32 %v1768_v5, %v1792_v24  ;;  %v6742_v5 = vadd.f32 %v6571_v17, %v2045_v46  ;;  %v5239_v30 = vpop.f32.mrf.mxu1  ;;  %v2059_v34 = vsel %vm1359_vm0, %v6755_v15, -inf }
 0x4db   : > { %5779 = vpow2.f32 %v1809_v25  ;;  %v6758_v25 = vadd.f32 %v6571_v17, %v2046_v43  ;;  %v2050_v8 = vmul.f32 0.125, %v5239_v30  ;;  %v2047_v43 = vmul.f32 0.125, %v2028_v12 }
 0x4dc   : > { %v1815_v7 = vmul.f32 1.442695, %v1800_v28  ;;  %v2065_v51 = vsel %vm1359_vm0, %v6742_v5, -inf  ;;  %v6765_v28 = vadd.f32 %v6571_v17, %v2044_v53 }
 0x4dd   : > { %v2068_v24 = vsel %vm1359_vm0, %v6758_v25, -inf  ;;  %v6770_v49 = vadd.f32 %v6571_v17, %v2050_v8 }
 0x4de   : > { %5781 = vpow2.f32 %v1815_v7  ;;  %v2062_v36 = vsel %vm1359_vm0, %v6765_v28, -inf }
 0x4df   : > { %5783 = vpow2.f32 %v1811_v3  ;;  %v2031_v3 = vpop.f32.mrf.mxu1  ;;  %v2080_v38 = vsel %vm1359_vm0, %v6770_v49, -inf }
 0x4e0   : > { %v2048_v7 = vmul.f32 0.125, %v2031_v3 }
 0x4e2   : > { %v6775_v46 = vadd.f32 %v6571_v17, %v2048_v7 }
 0x4e7   : > { %v6733_v11 = vpop.eup %5777 }
 0x4e8   : > { %v1835_v20 = vsel %vm1359_vm0, %v6733_v11, 0.0  ;;  %v6737_v61 = vpop.eup %5779 }
 0x4e9   : > { %1836 = vadd.xlane.f32.xlu0 %v1835_v20  ;;  %v1829_v21 = vsel %vm1359_vm0, %v6737_v61, 0.0  ;;  %v2074_v20 = vsel %vm1359_vm0, %v6775_v46, -inf }
 0x4eb   : > { %v6739_v62 = vpop.eup %5781 }
 0x4ec   : > { %v1838_v14 = vsel %vm1359_vm0, %v6739_v62, 0.0  ;;  %v6748_v52 = vpop.eup %5783 }
 0x4ed   : > { %1830 = vadd.xlane.f32.xlu0 %v1829_v21  ;;  %1839 = vadd.xlane.f32.xlu1 %v1838_v14  ;;  %v1832_v56 = vsel %vm1359_vm0, %v6748_v52, 0.0  ;;  %v6784_v21 = vadd.f32 %v6571_v17, %v2049_v39 }
 0x4ef   : > { %v2077_v14 = vsel %vm1359_vm0, %v6784_v21, -inf }
 0x4f1   : > { %2066 = vmax.xlane.f32.xlu0 %v2065_v51  ;;  %1833 = vadd.xlane.f32.xlu1 %v1832_v56  ;;  %v6789_v51 = vadd.f32 %v6571_v17, %v2047_v43 }
 0x4f3   : > { %v2071_v53 = vsel %vm1359_vm0, %v6789_v51, -inf }
 0x4f5   : > { %2060 = vmax.xlane.f32.xlu0 %v2059_v34  ;;  %2069 = vmax.xlane.f32.xlu1 %v2068_v24 }
 0x4f9   : > { %2063 = vmax.xlane.f32.xlu1 %v2062_v36 }
 0x4fd   : > { %2081 = vmax.xlane.f32.xlu1 %v2080_v38 }
 0x501   : > { %2075 = vmax.xlane.f32.xlu1 %v2074_v20 }
 0x50b   : > { %1871 = vrot.lane.b32.xlu0 %v6543_v23, %s5986_s24 }
 0x512   : > { %1869 = vrot.lane.b32.xlu1 %v6541_v16, %s5986_s24 }
 0x52a   : > { %2078 = vmax.xlane.f32.xlu0 %v2077_v14 }
 0x52e   : > { %2072 = vmax.xlane.f32.xlu0 %v2071_v53 }
 0x544   : > { %1867 = vrot.lane.b32.xlu0 %v6547_v0, %s5986_s24 }
 0x545   : > { %v1825_v16 = vpop.xlane.xlu0 %1824 }
 0x546   : > { %5785 = vrcp.f32 %v1825_v16 }
 0x548   : > { %1865 = vrot.lane.b32.xlu0 %v6551_v26, %s5986_s24 }
 0x549   : > { %v1819_v23 = vpop.xlane.xlu0 %1818  ;;  %v1828_v22 = vpop.xlane.xlu1 %1827 }
 0x54a   : > { %5787 = vrcp.f32 %v1828_v22 }
 0x54b   : > { %5789 = vrcp.f32 %v1819_v23 }
 0x54d   : > { %v1822_v12 = vpop.xlane.xlu1 %1821 }
 0x54e   : > { %5791 = vrcp.f32 %v1822_v12 }
 0x553   : > { %v5786_v17 = vpop.eup %5785 }
 0x554   : > { %v6798_v8 = vmul.f32 %v5786_v17, %v6701_v40 }
 0x557   : > { %v5788_v56 = vpop.eup %5787 }
 0x558   : > { %v5790_v30 = vpop.eup %5789  ;;  %v6801_v34 = vmul.f32 %v5788_v56, %v6709_v35 }
 0x559   : > { %v1849_v24 = vmul.f32 %v5790_v30, %v6707_v45 }
 0x55a   : > { %v1858_v26 = vpack.c.bf16 %v6801_v34, %v6798_v8 }
 0x55b   : > { %v5792_v0 = vpop.eup %5791 }
 0x55c   : > { %v1850_v3 = vmul.f32 %v5792_v0, %v6717_v37 }
 0x55e   : > { %v1857_v7 = vpack.c.bf16 %v1850_v3, %v1849_v24 }
 0x560   : > { %5216 = vmatprep.mubr.msk.bf16.mxu0 %vm1359_vm0, %v1857_v7 }
 0x572   : > { %v1837_v36 = vpop.xlane.xlu0 %1836 }
 0x573   : > { %5793 = vrcp.f32 %v1837_v36 }
 0x576   : > { %v1831_v38 = vpop.xlane.xlu0 %1830  ;;  %v1840_v20 = vpop.xlane.xlu1 %1839 }
 0x577   : > { %5795 = vrcp.f32 %v1840_v20 }
 0x57a   : > { %v2067_v40 = vpop.xlane.xlu0 %2066  ;;  %v1834_v39 = vpop.xlane.xlu1 %1833 }
 0x57b   : > { %v2085_v35 = vsub.f32 %v6742_v5, %v2067_v40 }
 0x57d   : > { %v2095_v43 = vmul.f32 1.442695, %v2085_v35 }
 0x57e   : > { %v2061_v14 = vpop.xlane.xlu0 %2060  ;;  %v2070_v53 = vpop.xlane.xlu1 %2069 }
 0x57f   : > { %5797 = vpow2.f32 %v2095_v43  ;;  %v2083_v45 = vsub.f32 %v6755_v15, %v2061_v14  ;;  %v2086_v37 = vsub.f32 %v6758_v25, %v2070_v53 }
 0x580   : > { %v5794_v17 = vpop.eup %5793 }
 0x581   : > { %v2091_v16 = vmul.f32 1.442695, %v2083_v45  ;;  %v2097_v23 = vmul.f32 1.442695, %v2086_v37  ;;  %v6813_v24 = vmul.f32 %v5794_v17, %v6733_v11 }
 0x582   : > { %v1872_v22 = vpop.permute.xlu0 %1871  ;;  %v2064_v12 = vpop.xlane.xlu1 %2063 }
 0x583   : > { %5799 = vpow2.f32 %v2091_v16  ;;  %v2084_v56 = vsub.f32 %v6765_v28, %v2064_v12  ;;  %5208 = vmatprep.subr.bf16.mxu0 %v1872_v22 }
 0x584   : > { %5209 = vmatpush3.bf16.msra.mxu0 %v1872_v22  ;;  %v5796_v30 = vpop.eup %5795  ;;  %5801 = vpow2.f32 %v2097_v23 }
 0x585   : > { %v2093_v5 = vmul.f32 1.442695, %v2084_v56  ;;  %v6816_v15 = vmul.f32 %v5796_v30, %v6739_v62 }
 0x586   : > { %v2082_v0 = vpop.xlane.xlu1 %2081 }
 0x587   : > { %v1860_v25 = vpack.c.bf16 %v6816_v15, %v6813_v24  ;;  %5803 = vpow2.f32 %v2093_v5  ;;  %v2090_v45 = vsub.f32 %v6770_v49, %v2082_v0 }
 0x588   : > { %5805 = vrcp.f32 %v1834_v39 }
 0x589   : > { %5807 = vrcp.f32 %v1831_v38  ;;  %v2105_v22 = vmul.f32 1.442695, %v2090_v45  ;;  %v1333_v38 = vadd.f32 %v6683_v13, %v6517_v31 }
 0x58a   : > { %v2076_v3 = vpop.xlane.xlu1 %2075 }
 0x58b   : > { %v2088_v12 = vsub.f32 %v6775_v46, %v2076_v3 }
 0x58c   : > { %v6820_v7 = vpop.eup %5797 }
 0x58d   : > { %v2113_v28 = vsel %vm1359_vm0, %v6820_v7, 0.0 }
 0x58e   : > { %2114 = vadd.xlane.f32.xlu1 %v2113_v28  ;;  %v1870_v36 = vpop.permute.xlu1 %1869 }
 0x58f   : > { %5210 = vmatprep.subr.bf16.mxu0 %v1870_v36 }
 0x590   : > { %v6824_v20 = vpop.eup %5799  ;;  %5211 = vmatpush3.bf16.msra.mxu0 %v1870_v36 }
 0x591   : > { %v2107_v11 = vsel %vm1359_vm0, %v6824_v20, 0.0  ;;  %v6828_v62 = vpop.eup %5801 }
 0x592   : > { %2108 = vadd.xlane.f32.xlu1 %v2107_v11  ;;  %v2116_v40 = vsel %vm1359_vm0, %v6828_v62, 0.0 }
 0x594   : > { %v6832_v35 = vpop.eup %5803 }
 0x595   : > { %v2110_v43 = vsel %vm1359_vm0, %v6832_v35, 0.0  ;;  %v5806_v39 = vpop.eup %5805 }
 0x596   : > { %2117 = vadd.xlane.f32.xlu1 %v2116_v40  ;;  %v5808_v49 = vpop.eup %5807 }
 0x597   : > { %v1853_v46 = vmul.f32 %v5808_v49, %v6737_v61 }
 0x59a   : > { %2111 = vadd.xlane.f32.xlu1 %v2110_v43 }
 0x5ab   : > { %2248 = vrot.lane.b32.xlu1 %v6465_v47, %s5986_s24 }
 0x5af   : > { %2246 = vrot.lane.b32.xlu1 %v6458_v32, %s5986_s24  ;;  %v1329_v32 = vadd.f32 %v6539_v6, %v6517_v31 }
 0x5b1   : > { %v6849_v30 = vpack.c.bf16 %v1333_v38, %v1329_v32 }
 0x5b3   : > { %v2079_v14 = vpop.xlane.xlu0 %2078 }
 0x5b4   : > { %v2089_v53 = vsub.f32 %v6784_v21, %v2079_v14  ;;  %v2101_v21 = vmul.f32 1.442695, %v2088_v12 }
 0x5b6   : > { %v2103_v37 = vmul.f32 1.442695, %v2089_v53 }
 0x5b7   : > { %v2073_v16 = vpop.xlane.xlu0 %2072 }
 0x5b8   : > { %5809 = vpow2.f32 %v2103_v37  ;;  %v2087_v23 = vsub.f32 %v6789_v51, %v2073_v16  ;;  %v1854_v51 = vmul.f32 %v5806_v39, %v6748_v52 }
 0x5ba   : > { %v2099_v17 = vmul.f32 1.442695, %v2087_v23  ;;  %v1859_v6 = vpack.c.bf16 %v1854_v51, %v1853_v46 }
 0x5bb   : > { %v1868_v47 = vpop.permute.xlu0 %1867 }
 0x5bc   : > { %5811 = vpow2.f32 %v2099_v17  ;;  %5212 = vmatprep.subr.bf16.mxu0 %v1868_v47 }
 0x5bd   : > { %5213 = vmatpush3.bf16.msra.mxu0 %v1868_v47  ;;  %5813 = vpow2.f32 %v2105_v22 }
 0x5be   : > { %5815 = vpow2.f32 %v2101_v21 }
 0x5bf   : > { %v1866_v56 = vpop.permute.xlu0 %1865 }
 0x5c0   : > { %5214 = vmatprep.subr.bf16.mxu0 %v1866_v56 }
 0x5c1   : > { %5215 = vmatpush3.bf16.msra.mxu0 %v1866_v56 }
 0x5c2   : > { %5240 = vmatprep.subr.bf16.mxu0 %v6849_v30 }
 0x5c4   : > { %5217 = vmatmul.mubr.msk.bf16.vlgmr.msra.gmra.mxu0 %vm1359_vm0, %v1858_v26 }
 0x5c5   : > { %v6857_v31 = vpop.eup %5809  ;;  %5220 = vmatprep.mubr.msk.bf16.mxu0 %vm1359_vm0, %v1859_v6  ;;  %5241 = vmatpush3.bf16.msra.mxu0 %v6849_v30 }
 0x5c6   : > { %5242 = vmatprep.subr.bf16.mxu0 %v6537_v4  ;;  %v2125_v13 = vsel %vm1359_vm0, %v6857_v31, 0.0 }
 0x5c7   : > { %2126 = vadd.xlane.f32.xlu0 %v2125_v13 }
 0x5c9   : > { %v6864_v61 = vpop.eup %5811  ;;  %5243 = vmatpush3.bf16.msra.mxu0 %v6537_v4 }
 0x5ca   : > { %5244 = vmatprep.subr.bf16.mxu0 %v6531_v50  ;;  %v2119_v52 = vsel %vm1359_vm0, %v6864_v61, 0.0  ;;  %v5814_v8 = vpop.eup %5813 }
 0x5cb   : > { %2120 = vadd.xlane.f32.xlu0 %v2119_v52  ;;  %v2128_v34 = vsel %vm1359_vm0, %v5814_v8, 0.0  ;;  %v5816_v26 = vpop.eup %5815 }
 0x5cc   : > { %5221 = vmatmul.mubr.msk.bf16.gmra.mxu0 %vm1359_vm0, %v1860_v25  ;;  %v2122_v5 = vsel %vm1359_vm0, %v5816_v26, 0.0 }
 0x5cd   : > { %5245 = vmatpush3.bf16.msra.mxu0 %v6531_v50 }
 0x5ce   : > { %5246 = vmatprep.subr.bf16.mxu0 %v6525_v63 }
 0x5cf   : > { %2129 = vadd.xlane.f32.xlu0 %v2128_v34 }
 0x5d1   : > { %5247 = vmatpush3.bf16.msra.mxu0 %v6525_v63 }
 0x5d3   : > { %2123 = vadd.xlane.f32.xlu1 %v2122_v5 }
 0x5e4   : > { %2244 = vrot.lane.b32.xlu1 %v6450_v18, %s5986_s24 }
 0x5e5   : > { %2250 = vrot.lane.b32.xlu0 %v6559_v29, %s5986_s24 }
 0x5e8   : > { %2234 = vrot.lane.b32.xlu1 %v6460_v33, %s5986_s24 }
 0x5e9   : > { %2232 = vrot.lane.b32.xlu0 %v6452_v19, %s5986_s24 }
 0x5ec   : > { %2238 = vrot.lane.b32.xlu1 %v6482_v10, %s5986_s24 }
 0x5ed   : > { %2236 = vrot.lane.b32.xlu0 %v6467_v48, %s5986_s24 }
 0x617   : > { %v2115_v0 = vpop.xlane.xlu1 %2114 }
 0x61b   : > { %v2109_v24 = vpop.xlane.xlu1 %2108 }
 0x61f   : > { %v2118_v15 = vpop.xlane.xlu1 %2117 }
 0x620   : > { %5817 = vrcp.f32 %v2118_v15 }
 0x621   : > { %5819 = vrcp.f32 %v2109_v24 }
 0x622   : > { %5821 = vrcp.f32 %v2115_v0 }
 0x623   : > { %v2112_v18 = vpop.xlane.xlu1 %2111 }
 0x624   : > { %5823 = vrcp.f32 %v2112_v18 }
 0x627   : > { %v2249_v43 = vpop.permute.xlu1 %2248 }
 0x62b   : > { %v2247_v53 = vpop.permute.xlu1 %2246 }
 0x62c   : > { %v2268_v32 = vsel %vm1359_vm0, %v2247_v53, 0 }
 0x62d   : > { %v5818_v29 = vpop.eup %5817 }
 0x62e   : > { %v5820_v25 = vpop.eup %5819  ;;  %v2142_v19 = vmul.f32 %v5818_v29, %v6828_v62 }
 0x62f   : > { %v5822_v33 = vpop.eup %5821  ;;  %v2139_v28 = vmul.f32 %v5820_v25, %v6824_v20 }
 0x630   : > { %v2141_v48 = vmul.f32 %v5822_v33, %v6820_v7  ;;  %v2271_v7 = vsel %vm1359_vm0, %v2249_v43, 0 }
 0x631   : > { %v5824_v3 = vpop.eup %5823 }
 0x632   : > { %v2140_v10 = vmul.f32 %v5824_v3, %v6832_v35  ;;  %v2148_v11 = vpack.c.bf16 %v2142_v19, %v2141_v48 }
 0x634   : > { %v2147_v36 = vpack.c.bf16 %v2140_v10, %v2139_v28 }
 0x636   : > { %5248 = vmatprep.mubr.msk.bf16.mxu0 %vm1359_vm0, %v2147_v36 }
 0x637   : > { %5249 = vmatmul.mubr.msk.bf16.vlgmr.msra.gmra.mxu0 %vm1359_vm0, %v2148_v11 }
 0x650   : > { %v2127_v40 = vpop.xlane.xlu0 %2126 }
 0x654   : > { %v2121_v14 = vpop.xlane.xlu0 %2120 }
 0x658   : > { %v2130_v45 = vpop.xlane.xlu0 %2129 }
 0x659   : > { %5825 = vrcp.f32 %v2130_v45 }
 0x65a   : > { %5827 = vrcp.f32 %v2121_v14 }
 0x65b   : > { %5829 = vrcp.f32 %v2127_v40 }
 0x65c   : > { %v2251_v62 = vpop.permute.xlu0 %2250  ;;  %v2124_v20 = vpop.xlane.xlu1 %2123 }
 0x65d   : > { %v2274_v35 = vsel %vm1359_vm0, %v2251_v62, 0  ;;  %5831 = vrcp.f32 %v2124_v20  ;;  %5300 = vmatprep.subr.msk.bf16.mxu0 %vm1359_vm0, %v2251_v62 }
 0x65e   : > { %5257 = vmatpush3.bf16.xpose.msra.mxu0 %v2274_v35 }
 0x65f   : > { %5301 = vmatprep.subr.msk.bf16.mxu0 %vm1359_vm0, %v2249_v43 }
 0x660   : > { %v2245_v49 = vpop.permute.xlu1 %2244  ;;  %v2233_v56 = vpop.permute.xlu0 %2232 }
 0x661   : > { %v2265_v51 = vsel %vm1359_vm0, %v2245_v49, 0 }
 0x664   : > { %v2235_v46 = vpop.permute.xlu1 %2234  ;;  %v2237_v6 = vpop.permute.xlu0 %2236 }
 0x666   : > { %5259 = vmatpush3.bf16.xpose.msra.mxu0 %v2271_v7  ;;  %v5826_v37 = vpop.eup %5825 }
 0x667   : > { %5302 = vmatprep.subr.msk.bf16.mxu0 %vm1359_vm0, %v2247_v53  ;;  %v5828_v16 = vpop.eup %5827  ;;  %v2146_v12 = vmul.f32 %v5826_v37, %v5814_v8  ;;  %v5961_v53 = vld [vmem:[%s6568_s23] ss:$0 sm:$0xff] }
 0x668   : > { %v5830_v23 = vpop.eup %5829  ;;  %v2143_v17 = vmul.f32 %v5828_v16, %v6864_v61 }
 0x669   : > { %v2145_v39 = vmul.f32 %v5830_v23, %v6857_v31  ;;  %v2239_v31 = vpop.permute.xlu1 %2238 }
 0x66a   : > { %v5832_v22 = vpop.eup %5831 }
 0x66b   : > { %v2144_v47 = vmul.f32 %v5832_v22, %v5816_v26  ;;  %v2150_v21 = vpack.c.bf16 %v2146_v12, %v2145_v39 }
 0x66d   : > { %v2149_v38 = vpack.c.bf16 %v2144_v47, %v2143_v17 }
 0x66e   : > { %5261 = vmatpush3.bf16.xpose.msra.mxu0 %v2268_v32 }
 0x66f   : > { %5252 = vmatprep.mubr.msk.bf16.mxu0 %vm1359_vm0, %v2149_v38  ;;  %5303 = vmatprep.subr.msk.bf16.mxu0 %vm1359_vm0, %v2245_v49 }
 0x670   : > { %5253 = vmatmul.mubr.msk.bf16.gmra.mxu0 %vm1359_vm0, %v2150_v21 }
 0x671   : > { %5264 = vmatprep.mubr.msk.bf16.mxu0 %vm1359_vm0, %v2233_v56 }
 0x676   : > { %5263 = vmatpush3.bf16.xpose.msra.mxu0 %v2265_v51 }
 0x67d   : > { %5265 = vmatmul.mubr.msk.bf16.vlgmr.msra.gmra.mxu0 %vm1359_vm0, %v2235_v46 }
 0x67e   : > { %5268 = vmatprep.mubr.msk.bf16.mxu0 %vm1359_vm0, %v2237_v6 }
 0x684   : > { %v6912_v13 = vpop.f32.mrf.mxu0 }
 0x685   : > { %5269 = vmatmul.mubr.msk.bf16.gmra.mxu0 %vm1359_vm0, %v2239_v31 }
 0x686   : > { %v6915_v61 = vpop.f32.mrf.mxu0 }
 0x688   : > { %v6917_v52 = vpop.f32.mrf.mxu0 }
 0x689   : > { %v5328_v8 = vpack.i.bf16 %v6917_v52, %v6912_v13 }
 0x68a   : > { %v6921_v34 = vpop.f32.mrf.mxu0 }
 0x68b   : > { %v5318_v26 = vpack.i.bf16 %v6921_v34, %v6915_v61 }
 0x68c   : > { %v6925_v5 = vpop.f32.mrf.mxu0 }
 0x68e   : > { %v6927_v0 = vpop.f32.mrf.mxu0 }
 0x690   : > { %v6929_v24 = vpop.f32.mrf.mxu0 }
 0x691   : > { %v5348_v15 = vpack.i.bf16 %v6929_v24, %v6925_v5 }
 0x692   : > { %v6933_v18 = vpop.f32.mrf.mxu0 }
 0x6f7   : > { %v6935_v29 = vpop.f32.mrf.mxu0 }
 0x6f9   : > { %v6937_v25 = vpop.f32.mrf.mxu0 }
 0x6fb   : > { %v6939_v33 = vpop.f32.mrf.mxu0 }
 0x6fd   : > { %v6941_v3 = vpop.f32.mrf.mxu0 }
 0x730   : > { %v6943_v19 = vpop.f32.mrf.mxu0 }
 0x732   : > { %v6945_v28 = vpop.f32.mrf.mxu0 }
 0x734   : > { %v6947_v10 = vpop.f32.mrf.mxu0 }
 0x736   : > { %v6949_v48 = vpop.f32.mrf.mxu0 }
 0x73d   : > { %v5266_v36 = vpop.f32.mrf.mxu0 }
 0x73e   : > { %v2343_v40 = vmul.f32 0.125, %v5266_v36 }
 0x73f   : > { %v2310_v11 = vpop.f32.mrf.mxu0 }
 0x740   : > { %v2341_v43 = vmul.f32 0.125, %v2310_v11  ;;  %v2351_v37 = vadd.f32 %v5961_v53, %v2343_v40 }
 0x741   : > { %v5267_v14 = vpop.f32.mrf.mxu0 }
 0x742   : > { %v2349_v45 = vadd.f32 %v5961_v53, %v2341_v43  ;;  %v2344_v20 = vmul.f32 0.125, %v5267_v14  ;;  %v2363_v17 = vsel %vm1359_vm0, %v2351_v37, -inf }
 0x743   : > { %v2313_v62 = vpop.f32.mrf.mxu0 }
 0x744   : > { %v2342_v35 = vmul.f32 0.125, %v2313_v62  ;;  %v2357_v7 = vsel %vm1359_vm0, %v2349_v45, -inf  ;;  %v2352_v39 = vadd.f32 %v5961_v53, %v2344_v20 }
 0x745   : > { %2358 = vmax.xlane.f32.xlu0 %v2357_v7  ;;  %v5270_v16 = vpop.f32.mrf.mxu0 }
 0x746   : > { %v2350_v23 = vadd.f32 %v5961_v53, %v2342_v35  ;;  %v2347_v38 = vmul.f32 0.125, %v5270_v16  ;;  %v2366_v51 = vsel %vm1359_vm0, %v2352_v39, -inf }
 0x747   : > { %v2326_v22 = vpop.f32.mrf.mxu0 }
 0x748   : > { %v2345_v12 = vmul.f32 0.125, %v2326_v22  ;;  %v2360_v47 = vsel %vm1359_vm0, %v2350_v23, -inf  ;;  %v2355_v11 = vadd.f32 %v5961_v53, %v2347_v38 }
 0x749   : > { %2364 = vmax.xlane.f32.xlu0 %v2363_v17  ;;  %2361 = vmax.xlane.f32.xlu1 %v2360_v47  ;;  %v5271_v32 = vpop.f32.mrf.mxu0 }
 0x74a   : > { %v2348_v21 = vmul.f32 0.125, %v5271_v32  ;;  %v2353_v46 = vadd.f32 %v5961_v53, %v2345_v12  ;;  %v2375_v43 = vsel %vm1359_vm0, %v2355_v11, -inf }
 0x74b   : > { %v2329_v49 = vpop.f32.mrf.mxu0 }
 0x74c   : > { %v2346_v56 = vmul.f32 0.125, %v2329_v49  ;;  %v2369_v31 = vsel %vm1359_vm0, %v2353_v46, -inf  ;;  %v2356_v40 = vadd.f32 %v5961_v53, %v2348_v21 }
 0x74d   : > { %2367 = vmax.xlane.f32.xlu0 %v2366_v51 }
 0x74e   : > { %v2354_v6 = vadd.f32 %v5961_v53, %v2346_v56  ;;  %v2378_v14 = vsel %vm1359_vm0, %v2356_v40, -inf }
 0x750   : > { %v2372_v36 = vsel %vm1359_vm0, %v2354_v6, -inf }
 0x751   : > { %2370 = vmax.xlane.f32.xlu0 %v2369_v31  ;;  %2373 = vmax.xlane.f32.xlu1 %v2372_v36 }
 0x755   : > { %2376 = vmax.xlane.f32.xlu0 %v2375_v43  ;;  %2379 = vmax.xlane.f32.xlu1 %v2378_v14 }
 0x76b   : > { %2459 = vrot.lane.b32.xlu0 %v6849_v30, %s5986_s24 }
 0x7ce   : > { %v2359_v62 = vpop.xlane.xlu0 %2358 }
 0x7cf   : > { %v2381_v20 = vsub.f32 %v2349_v45, %v2359_v62 }
 0x7d1   : > { %v2389_v22 = vmul.f32 1.442695, %v2381_v20 }
 0x7d2   : > { %v2365_v35 = vpop.xlane.xlu0 %2364  ;;  %v2362_v7 = vpop.xlane.xlu1 %2361 }
 0x7d3   : > { %v2383_v16 = vsub.f32 %v2351_v37, %v2365_v35  ;;  %v2382_v17 = vsub.f32 %v2350_v23, %v2362_v7 }
 0x7d5   : > { %v2393_v12 = vmul.f32 1.442695, %v2383_v16  ;;  %v2391_v32 = vmul.f32 1.442695, %v2382_v17 }
 0x7d6   : > { %v2368_v53 = vpop.xlane.xlu0 %2367 }
 0x7d7   : > { %5833 = vpow2.f32 %v2393_v12  ;;  %v2384_v47 = vsub.f32 %v2352_v39, %v2368_v53 }
 0x7d8   : > { %5835 = vpow2.f32 %v2389_v22 }
 0x7d9   : > { %v2395_v38 = vmul.f32 1.442695, %v2384_v47 }
 0x7da   : > { %v2371_v49 = vpop.xlane.xlu0 %2370  ;;  %v2374_v21 = vpop.xlane.xlu1 %2373 }
 0x7db   : > { %5837 = vpow2.f32 %v2395_v38  ;;  %v2385_v56 = vsub.f32 %v2353_v46, %v2371_v49  ;;  %v2386_v39 = vsub.f32 %v2354_v6, %v2374_v21  ;;  %v5338_v49 = vpack.i.bf16 %v6933_v18, %v6927_v0 }
 0x7dc   : > { %5839 = vpow2.f32 %v2391_v32 }
 0x7dd   : > { %v2397_v31 = vmul.f32 1.442695, %v2385_v56  ;;  %v2399_v35 = vmul.f32 1.442695, %v2386_v39 }
 0x7de   : > { %v2377_v30 = vpop.xlane.xlu0 %2376  ;;  %v2380_v51 = vpop.xlane.xlu1 %2379 }
 0x7df   : > { %v2387_v45 = vsub.f32 %v2355_v11, %v2377_v30  ;;  %v2388_v37 = vsub.f32 %v2356_v40, %v2380_v51 }
 0x7e1   : > { %v2401_v36 = vmul.f32 1.442695, %v2387_v45  ;;  %v2403_v14 = vmul.f32 1.442695, %v2388_v37 }
 0x7e2   : > { %v2460_v43 = vpop.permute.xlu0 %2459 }
 0x7e3   : > { %5841 = vpow2.f32 %v2401_v36  ;;  %5272 = vmatprep.subr.bf16.mxu1 %v2460_v43 }
 0x7e4   : > { %v6962_v23 = vpop.eup %5833  ;;  %5273 = vmatpush3.bf16.msra.mxu1 %v2460_v43  ;;  %5843 = vpow2.f32 %v2397_v31 }
 0x7e5   : > { %v2411_v62 = vsel %vm1359_vm0, %v6962_v23, 0.0  ;;  %v5836_v20 = vpop.eup %5835  ;;  %5845 = vpow2.f32 %v2403_v14 }
 0x7e6   : > { %2412 = vadd.xlane.f32.xlu0 %v2411_v62  ;;  %v2405_v11 = vsel %vm1359_vm0, %v5836_v20, 0.0  ;;  %5847 = vpow2.f32 %v2399_v35 }
 0x7e8   : > { %v5838_v46 = vpop.eup %5837 }
 0x7e9   : > { %v2414_v40 = vsel %vm1359_vm0, %v5838_v46, 0.0  ;;  %v5840_v7 = vpop.eup %5839 }
 0x7ea   : > { %2406 = vadd.xlane.f32.xlu0 %v2405_v11  ;;  %2415 = vadd.xlane.f32.xlu1 %v2414_v40  ;;  %v2408_v16 = vsel %vm1359_vm0, %v5840_v7, 0.0 }
 0x7ee   : > { %2409 = vadd.xlane.f32.xlu1 %v2408_v16  ;;  %v5502_v16 = vld [vmem:[%s8425_s4 + $0x64] ss:$8 sps:$4 sm:$0xff]  }
 0x7f0   : > { %v6969_v6 = vpop.eup %5841 }
 0x7f1   : > { %v2423_v22 = vsel %vm1359_vm0, %v6969_v6, 0.0  ;;  %v5844_v12 = vpop.eup %5843 }
 0x7f2   : > { %2424 = vadd.xlane.f32.xlu1 %v2423_v22  ;;  %v2417_v17 = vsel %vm1359_vm0, %v5844_v12, 0.0  ;;  %v5846_v53 = vpop.eup %5845  ;;  %v5505_v22 = vld [vmem:[%s8425_s4 + $0x54] ss:$8 sps:$4 sm:$0xff]  }
 0x7f3   : > { %v2426_v47 = vsel %vm1359_vm0, %v5846_v53, 0.0  ;;  %v5848_v32 = vpop.eup %5847 }
 0x7f4   : > { %v2420_v38 = vsel %vm1359_vm0, %v5848_v32, 0.0 }
 0x7f6   : > { %2418 = vadd.xlane.f32.xlu1 %v2417_v17  ;;  %v5508_v17 = vld [vmem:[%s8425_s4 + $0x44] ss:$8 sps:$4 sm:$0xff]  }
 0x7fa   : > { %2427 = vadd.xlane.f32.xlu1 %v2426_v47  ;;  %v5511_v47 = vld [vmem:[%s8425_s4 + $0x34] ss:$8 sps:$4 sm:$0xff]  }
 0x7fe   : > { %2421 = vadd.xlane.f32.xlu1 %v2420_v38  ;;  %v5514_v38 = vld [vmem:[%s8425_s4 + $0x24] ss:$8 sps:$4 sm:$0xff]  }
 0x800   : > { %2455 = vrot.lane.b32.xlu0 %v6531_v50, %s5986_s24 }
 0x804   : > { %2453 = vrot.lane.b32.xlu0 %v6525_v63, %s5986_s24 }
 0x80f   : > { %2457 = vrot.lane.b32.xlu1 %v6537_v4, %s5986_s24 }
 0x813   : > { %5319 = vrot.lane.b32.xlu1 %v5318_v26, %s5986_s24 }
 0x817   : > { %5329 = vrot.lane.b32.xlu1 %v5328_v8, %s5986_s24 }
 0x81b   : > { %5339 = vrot.lane.b32.xlu1 %v5338_v49, %s5986_s24  ;;  %v5512_v49 = vld [vmem:[%s8425_s4 + $0x20] ss:$8 sps:$4 sm:$0xff]  }
 0x81f   : > { %5349 = vrot.lane.b32.xlu1 %v5348_v15, %s5986_s24 }
 0x86f   : > { %v2413_v63 = vpop.xlane.xlu0 %2412 }
 0x873   : > { %v2407_v50 = vpop.xlane.xlu0 %2406  ;;  %v2416_v4 = vpop.xlane.xlu1 %2415 }
 0x874   : > { %5849 = vrcp.f32 %v2407_v50  ;;  %v5515_v50 = vld [vmem:[%s8425_s4 + $0x10] ss:$8 sps:$4 sm:$0xff]  }
 0x877   : > { %v2410_v61 = vpop.xlane.xlu1 %2409  ;;  %v2456_v24 = vpop.permute.xlu0 %2455 }
 0x878   : > { %5851 = vrcp.f32 %v2410_v61  ;;  %v5518_v61 = vld [vmem:[%s8425_s4] ss:$8 sps:$4 sm:$0xff]  }
 0x879   : > { %5853 = vrcp.f32 %v2416_v4  ;;  %v5520_v4 = vld [vmem:[%s8425_s4 + $0x4] ss:$8 sps:$4 sm:$0xff]  }
 0x87a   : > { %5855 = vrcp.f32 %v2413_v63  ;;  %v5517_v63 = vld [vmem:[%s8425_s4 + $0x14] ss:$8 sps:$4 sm:$0xff]  }
 0x87b   : > { %v2425_v34 = vpop.xlane.xlu1 %2424  ;;  %v2454_v51 = vpop.permute.xlu0 %2453 }
 0x87f   : > { %v2419_v26 = vpop.xlane.xlu1 %2418 }
 0x880   : > { %5857 = vrcp.f32 %v2419_v26  ;;  %v5521_v26 = vld [vmem:[%s8425_s4 + $0xf0] ss:$8 sps:$4 sm:$0xff]  }
 0x881   : > { %v5850_v13 = vpop.eup %5849 }
 0x882   : > { %v2437_v0 = vmul.f32 %v5850_v13, %v5836_v20  ;;  %v5526_v13 = vld [vmem:[%s8425_s4 + $0xe4] ss:$8 sps:$4 sm:$0xff]  }
 0x883   : > { %v2428_v52 = vpop.xlane.xlu1 %2427 }
 0x885   : > { %v5852_v8 = vpop.eup %5851 }
 0x886   : > { %v2438_v18 = vmul.f32 %v5852_v8, %v5840_v7  ;;  %v5854_v56 = vpop.eup %5853  ;;  %v5499_v7 = vld [vmem:[%s8425_s4 + $0x74] ss:$8 sps:$4 sm:$0xff]  }
 0x887   : > { %v2422_v21 = vpop.xlane.xlu1 %2421  ;;  %v5856_v30 = vpop.eup %5855  ;;  %v2440_v45 = vmul.f32 %v5854_v56, %v5838_v46  ;;  %v5529_v8 = vld [vmem:[%s8425_s4 + $0xd4] ss:$8 sps:$4 sm:$0xff]   ;;  %v5536_v56 = vld [vmem:[%s8425_s4 + $0xa0] ss:$8 sps:$4 sm:$0xff]  }
 0x888   : > { %5859 = vrcp.f32 %v2422_v21  ;;  %v2445_v5 = vpack.c.bf16 %v2438_v18, %v2437_v0  ;;  %v2439_v36 = vmul.f32 %v5856_v30, %v6962_v23  ;;  %v5497_v23 = vld [vmem:[%s8425_s4 + $0x70] ss:$8 sps:$4 sm:$0xff]   ;;  %v5532_v18 = vld [vmem:[%s8425_s4 + $0xc4] ss:$8 sps:$4 sm:$0xff]   ;;  %v5530_v21 = vld [vmem:[%s8425_s4 + $0xc0] ss:$8 sps:$4 sm:$0xff]  }
 0x889   : > { %5861 = vrcp.f32 %v2428_v52  ;;  %v5524_v52 = vld [vmem:[%s8425_s4 + $0xe0] ss:$8 sps:$4 sm:$0xff]   ;;  %v5527_v0 = vld [vmem:[%s8425_s4 + $0xd0] ss:$8 sps:$4 sm:$0xff]   ;;  %v5541_v30 = vld [vmem:[%s8425_s4 + $0x94] ss:$8 sps:$4 sm:$0xff]  }
 0x88a   : > { %5280 = vmatprep.mubr.msk.bf16.mxu1 %vm1359_vm0, %v2445_v5  ;;  %5863 = vrcp.f32 %v2425_v34  ;;  %v2446_v43 = vpack.c.bf16 %v2440_v45, %v2439_v36  ;;  %v5523_v34 = vld [vmem:[%s8425_s4 + $0xf4] ss:$8 sps:$4 sm:$0xff]   ;;  %v5542_v45 = vld [vmem:[%s8425_s4 + $0x80] ss:$8 sps:$4 sm:$0xff]  }
 0x88b   : > { %v2458_v15 = vpop.permute.xlu1 %2457  ;;  %v5535_v5 = vld [vmem:[%s8425_s4 + $0xb4] ss:$8 sps:$4 sm:$0xff]  }
 0x88c   : > { %5274 = vmatprep.subr.bf16.mxu1 %v2458_v15 }
 0x88d   : > { %5275 = vmatpush3.bf16.msra.mxu1 %v2458_v15  ;;  %v5858_v31 = vpop.eup %5857  ;;  %v5538_v15 = vld [vmem:[%s8425_s4 + $0xa4] ss:$8 sps:$4 sm:$0xff]  }
 0x88e   : > { %5276 = vmatprep.subr.bf16.mxu1 %v2456_v24  ;;  %v2441_v39 = vmul.f32 %v5858_v31, %v5844_v12  ;;  %v5503_v12 = vld [vmem:[%s8425_s4 + $0x50] ss:$8 sps:$4 sm:$0xff]   ;;  %v5544_v31 = vld [vmem:[%s8425_s4 + $0x84] ss:$8 sps:$4 sm:$0xff]  }
 0x891   : > { %5277 = vmatpush3.bf16.msra.mxu1 %v2456_v24  ;;  %v5533_v24 = vld [vmem:[%s8425_s4 + $0xb0] ss:$8 sps:$4 sm:$0xff]  }
 0x892   : > { %5278 = vmatprep.subr.bf16.mxu1 %v2454_v51 }
 0x895   : > { %v5860_v37 = vpop.eup %5859  ;;  %5279 = vmatpush3.bf16.msra.mxu1 %v2454_v51  ;;  %v5539_v51 = vld [vmem:[%s8425_s4 + $0x90] ss:$8 sps:$4 sm:$0xff]  }
 0x896   : > { %v2442_v14 = vmul.f32 %v5860_v37, %v5848_v32  ;;  %v5862_v62 = vpop.eup %5861  ;;  %2834 = vmatprep.subr.bf16.mxu1 %v5499_v7  ;;  %v5509_v32 = vld [vmem:[%s8425_s4 + $0x30] ss:$8 sps:$4 sm:$0xff]   ;;  %v5320_v7 = vpop.permute.xlu1 %5319 }
 0x897   : > { %v5864_v35 = vpop.eup %5863  ;;  %v2444_v11 = vmul.f32 %v5862_v62, %v5846_v53  ;;  %v5506_v53 = vld [vmem:[%s8425_s4 + $0x40] ss:$8 sps:$4 sm:$0xff]  }
 0x898   : > { %5281 = vmatmul.mubr.msk.bf16.vlgmr.msra.gmra.mxu1 %vm1359_vm0, %v2446_v43  ;;  %v2447_v20 = vpack.c.bf16 %v2442_v14, %v2441_v39  ;;  %v2443_v40 = vmul.f32 %v5864_v35, %v6969_v6  ;;  %v5500_v6 = vld [vmem:[%s8425_s4 + $0x60] ss:$8 sps:$4 sm:$0xff]  }
 0x899   : > { %2835 = vmatpush1.bf16.msra.mxu1 %v5497_v23 }
 0x89a   : > { %5284 = vmatprep.mubr.msk.bf16.mxu1 %vm1359_vm0, %v2447_v20  ;;  %v2448_v46 = vpack.c.bf16 %v2444_v11, %v2443_v40  ;;  %2836 = vmatprep.subr.bf16.mxu1 %v5502_v16  ;;  %v5322_v16 = vunpack.i.h.bf16 %v5320_v7 }
 0x89d   : > { %2837 = vmatpush1.bf16.msra.mxu1 %v5500_v6  ;;  %v5321_v6 = vunpack.i.l.bf16 %v5320_v7 }
 0x89e   : > { %2838 = vmatprep.subr.bf16.mxu1 %v5505_v22 }
 0x8a0   : > { %5285 = vmatmul.mubr.msk.bf16.gmra.mxu1 %vm1359_vm0, %v2448_v46 }
 0x8a1   : > { %2839 = vmatpush1.bf16.msra.mxu1 %v5503_v12 }
 0x8a2   : > { %2840 = vmatprep.subr.bf16.mxu1 %v5508_v17 }
 0x8a5   : > { %2841 = vmatpush1.bf16.msra.mxu1 %v5506_v53  ;;  %v2607_v53 = vsel %vm1359_vm0, %v6723_v54, %v5322_v16 }
 0x8a6   : > { %2842 = vmatprep.subr.bf16.mxu1 %v5511_v47  ;;  %v2606_v47 = vsel %vm1359_vm0, %v6711_v27, %v5321_v6 }
 0x8a9   : > { %2843 = vmatpush1.bf16.msra.mxu1 %v5509_v32  ;;  %v5330_v32 = vpop.permute.xlu1 %5329 }
 0x8aa   : > { %2844 = vmatprep.subr.bf16.mxu1 %v5514_v38 }
 0x8ad   : > { %2845 = vmatpush1.bf16.msra.mxu1 %v5512_v49 }
 0x8ae   : > { %2846 = vmatprep.subr.bf16.mxu1 %v5517_v63 }
 0x8b1   : > { %2847 = vmatpush1.bf16.msra.mxu1 %v5515_v50 }
 0x8b2   : > { %2848 = vmatprep.subr.bf16.mxu1 %v5520_v4  ;;  %v2622_v4 = vpack.c.bf16 %v2607_v53, %v2606_v47  ;;  %v5964_v53 = vld [vmem:[%s6214_s22 + $0x10] sm:$0xff] }
 0x8b5   : > { %2849 = vmatpush1.bf16.msra.mxu1 %v5518_v61 }
 0x8b6   : > { %2850 = vmatprep.subr.bf16.mxu1 %v5523_v34 }
 0x8b9   : > { %2851 = vmatpush2.bf16.msra.mxu1 %v5521_v26  ;;  %v5332_v26 = vunpack.i.h.bf16 %v5330_v32 }
 0x8ba   : > { %2852 = vmatprep.subr.bf16.mxu1 %v5526_v13  ;;  %v5331_v13 = vunpack.i.l.bf16 %v5330_v32  ;;  %v5965_v32 = vld [vmem:[%s6214_s22 + $0x18] sm:$0xff] }
 0x8bd   : > { %2853 = vmatpush2.bf16.msra.mxu1 %v5524_v52 }
 0x8be   : > { %2854 = vmatprep.subr.bf16.mxu1 %v5529_v8 }
 0x8c1   : > { %2855 = vmatpush2.bf16.msra.mxu1 %v5527_v0 }
 0x8c2   : > { %2856 = vmatprep.subr.bf16.mxu1 %v5532_v18  ;;  %v2609_v18 = vsel %vm1359_vm0, %v6719_v41, %v5332_v26 }
 0x8c5   : > { %2857 = vmatpush2.bf16.msra.mxu1 %v5530_v21  ;;  %v5340_v21 = vpop.permute.xlu1 %5339 }
 0x8c6   : > { %2858 = vmatprep.subr.bf16.mxu1 %v5535_v5 }
 0x8c9   : > { %2859 = vmatpush2.bf16.msra.mxu1 %v5533_v24 }
 0x8ca   : > { %2860 = vmatprep.subr.bf16.mxu1 %v5538_v15  ;;  %v5342_v15 = vunpack.i.h.bf16 %v5340_v21 }
 0x8cc   : > { %v2611_v41 = vsel %vm1359_vm0, %v6731_v2, %v5342_v15 }
 0x8cd   : > { %2861 = vmatpush2.bf16.msra.mxu1 %v5536_v56  ;;  %v5341_v56 = vunpack.i.l.bf16 %v5340_v21  ;;  %v5969_v21 = vld [vmem:[%s6214_s22 + $0x38] sm:$0xff] }
 0x8ce   : > { %2862 = vmatprep.subr.bf16.mxu1 %v5541_v30 }
 0x8d1   : > { %2863 = vmatpush2.bf16.msra.mxu1 %v5539_v51 }
 0x8d2   : > { %2864 = vmatprep.subr.bf16.mxu1 %v5544_v31  ;;  %v5350_v31 = vpop.permute.xlu1 %5349 }
 0x8d5   : > { %2865 = vmatpush2.bf16.msra.mxu1 %v5542_v45 }
 0x958   : > { %v5282_v36 = vpop.f32.mrf.mxu1 }
 0x95a   : > { %v2511_v37 = vpop.f32.mrf.mxu1 }
 0x95c   : > { %v5283_v43 = vpop.f32.mrf.mxu1 }
 0x95d   : > { %v5323_v35 = vpack.i.bf16 %v5283_v43, %v5282_v36  ;;  %v5351_v43 = vunpack.i.l.bf16 %v5350_v31 }
 0x95e   : > { %v2514_v39 = vpop.f32.mrf.mxu1 }
 0x95f   : > { %v5313_v14 = vpack.i.bf16 %v2514_v39, %v2511_v37  ;;  %v5352_v37 = vunpack.i.h.bf16 %v5350_v31 }
 0x960   : > { %v5286_v62 = vpop.f32.mrf.mxu1 }
 0x961   : > { %5314 = vrot.lane.b32.xlu0 %v5313_v14, %s5986_s24  ;;  %v2613_v2 = vsel %vm1359_vm0, %v6729_v9, %v5352_v37  ;;  %v5972_v37 = vld [vmem:[%s6214_s22 + $0x50] sm:$0xff] }
 0x962   : > { %v2527_v20 = vpop.f32.mrf.mxu1 }
 0x964   : > { %v5287_v11 = vpop.f32.mrf.mxu1 }
 0x965   : > { %5324 = vrot.lane.b32.xlu0 %v5323_v35, %s5986_s24  ;;  %v5343_v23 = vpack.i.bf16 %v5287_v11, %v5286_v62 }
 0x966   : > { %v2530_v40 = vpop.f32.mrf.mxu1 }
 0x967   : > { %v5333_v46 = vpack.i.bf16 %v2530_v40, %v2527_v20  ;;  %v5962_v40 = vld [vmem:[%s6214_s22] sm:$0xff] }
 0x969   : > { %5334 = vrot.lane.b32.xlu0 %v5333_v46, %s5986_s24 }
 0x96d   : > { %5344 = vrot.lane.b32.xlu0 %v5343_v23, %s5986_s24  ;;  %v5963_v23 = vld [vmem:[%s6214_s22 + $0x8] sm:$0xff] }
 0x9d3   : > { %v5315_v22 = vpop.permute.xlu0 %5314 }
 0x9d4   : > { %v5317_v12 = vunpack.i.h.bf16 %v5315_v22  ;;  %v5316_v17 = vunpack.i.l.bf16 %v5315_v22 }
 0x9d6   : > { %v2614_v38 = vsel %vm1359_vm0, %v6937_v25, %v5316_v17  ;;  %v2615_v49 = vsel %vm1359_vm0, %v6941_v3, %v5317_v12  ;;  %v2608_v3 = vsel %vm1359_vm0, %v6703_v44, %v5331_v13  ;;  %v2610_v44 = vsel %vm1359_vm0, %v6727_v1, %v5341_v56  ;;  %v5967_v13 = vld [vmem:[%s6214_s22 + $0x28] sm:$0xff] }
 0x9d7   : > { %v5325_v63 = vpop.permute.xlu0 %5324  ;;  %v2623_v50 = vpack.c.bf16 %v2615_v49, %v2614_v38  ;;  %v2626_v36 = vpack.c.bf16 %v2611_v41, %v2610_v44  ;;  %v2612_v1 = vsel %vm1359_vm0, %v6725_v55, %v5351_v43 }
 0x9d8   : > { %v5327_v61 = vunpack.i.h.bf16 %v5325_v63  ;;  %v5326_v34 = vunpack.i.l.bf16 %v5325_v63  ;;  %v2628_v14 = vpack.c.bf16 %v2613_v2, %v2612_v1 }
 0x9d9   : > { %2866 = vmatprep.mubr.bf16.mxu1 %v2623_v50 }
 0x9da   : > { %2867 = vmatmul.mubr.bf16.vlgmr.msra.gmra.mxu1 %v2622_v4  ;;  %v2616_v54 = vsel %vm1359_vm0, %v6935_v29, %v5326_v34  ;;  %v2617_v27 = vsel %vm1359_vm0, %v6939_v33, %v5327_v61  ;;  %v2624_v33 = vpack.c.bf16 %v2609_v18, %v2608_v3  ;;  %v5966_v34 = vld [vmem:[%s6214_s22 + $0x20] sm:$0xff]  ;;  %v5968_v3 = vld [vmem:[%s6214_s22 + $0x30] sm:$0xff] }
 0x9db   : > { %v5335_v52 = vpop.permute.xlu0 %5334  ;;  %v2625_v25 = vpack.c.bf16 %v2617_v27, %v2616_v54 }
 0x9dc   : > { %v5337_v8 = vunpack.i.h.bf16 %v5335_v52  ;;  %v5336_v0 = vunpack.i.l.bf16 %v5335_v52 }
 0x9dd   : > { %2876 = vmatprep.mubr.bf16.mxu1 %v2625_v25 }
 0x9de   : > { %v2618_v5 = vsel %vm1359_vm0, %v6945_v28, %v5336_v0  ;;  %v2619_v29 = vsel %vm1359_vm0, %v6949_v48, %v5337_v8 }
 0x9df   : > { %v5345_v24 = vpop.permute.xlu0 %5344  ;;  %v2627_v30 = vpack.c.bf16 %v2619_v29, %v2618_v5 }
 0x9e0   : > { %v5347_v51 = vunpack.i.h.bf16 %v5345_v24  ;;  %v5346_v45 = vunpack.i.l.bf16 %v5345_v24 }
 0x9e2   : > { %2877 = vmatmul.mubr.bf16.gmra.mxu1 %v2624_v33  ;;  %v2620_v28 = vsel %vm1359_vm0, %v6943_v19, %v5346_v45  ;;  %v2621_v48 = vsel %vm1359_vm0, %v6947_v10, %v5347_v51  ;;  %v2662_v19 = vld [vmem:[%s8426_s5] sm:$0x3]  ;;  %v5971_v45 = vld [vmem:[%s6214_s22 + $0x48] sm:$0xff] }
 0x9e3   : > { %2886 = vmatprep.mubr.bf16.mxu1 %v2627_v30  ;;  %v2629_v39 = vpack.c.bf16 %v2621_v48, %v2620_v28  ;;  %v7139_v10 = vrot.slane %v2662_v19, %v6417_v59  ;;  %v7142_v62 = vrot.slane %v2662_v19, %v6420_v60  ;;  %v5970_v30 = vld [vmem:[%s6214_s22 + $0x40] sm:$0xff] }
 0x9ea   : > { %2887 = vmatmul.mubr.bf16.gmra.mxu1 %v2626_v36 }
 0x9eb   : > { %2896 = vmatprep.mubr.bf16.mxu1 %v2629_v39  ;;  %v5973_v39 = vld [vmem:[%s6214_s22 + $0x58] sm:$0xff] }
 0x9f2   : > { %2897 = vmatmul.mubr.bf16.gmra.mxu1 %v2628_v14 }
 0xa9a   : > { %v2868_v20 = vpop.f32.mrf.mxu1 }
 0xa9b   : > { %v2869_v55 = vadd.f32 %v2868_v20, %v7139_v10 }
 0xa9c   : > { %v2870_v35 = vpop.f32.mrf.mxu1 }
 0xa9d   : > { %v2871_v9 = vadd.f32 %v2870_v35, %v7142_v62  ;;  %v7147_v46 = vadd.f32 %v5962_v40, %v2869_v55  ;;  %v5974_v35 = vld [vmem:[%s6214_s22 + $0x60] sm:$0xff] }
 0xa9e   : > { %v2872_v11 = vpop.f32.mrf.mxu1 }
 0xa9f   : > { %v7150_v7 = vadd.f32 %v5963_v23, %v2871_v9  ;;  %v2873_v16 = vadd.f32 %v2872_v11, %v7139_v10  ;;  %v5975_v11 = vld [vmem:[%s6214_s22 + $0x68] sm:$0xff] }
 0xaa0   : > { %v2874_v6 = vpop.f32.mrf.mxu1 }
 0xaa1   : > { %v2875_v22 = vadd.f32 %v2874_v6, %v7142_v62  ;;  %v2925_v12 = vadd.f32 %v7150_v7, %v7147_v46  ;;  %v7157_v47 = vadd.f32 %v5964_v53, %v2873_v16  ;;  %v5977_v53 = vld [vmem:[%s6214_s22 + $0x78] sm:$0xff] }
 0xaa2   : > { %v2878_v17 = vpop.f32.mrf.mxu1 }
 0xaa3   : > { %v7160_v38 = vadd.f32 %v5965_v32, %v2875_v22  ;;  %v2879_v49 = vadd.f32 %v2878_v17, %v7139_v10  ;;  %2926 = vadd.xlane.f32.xlu0 %v2925_v12  ;;  %v5976_v12 = vld [vmem:[%s6214_s22 + $0x70] sm:$0xff] }
 0xaa4   : > { %v2880_v63 = vpop.f32.mrf.mxu1 }
 0xaa5   : > { %v2881_v50 = vadd.f32 %v2880_v63, %v7142_v62  ;;  %v2928_v4 = vadd.f32 %v7160_v38, %v7157_v47  ;;  %v7167_v26 = vadd.f32 %v5966_v34, %v2879_v49  ;;  %v5548_v63 = vld [vmem:[%s8429_s8 + $0xe8] ss:$16 sps:$4 sm:$0xff]   ;;  %v5551_v34 = vld [vmem:[%s8429_s8 + $0xc0] ss:$16 sps:$4 sm:$0xff]  }
 0xaa6   : > { %v2882_v61 = vpop.f32.mrf.mxu1 }
 0xaa7   : > { %v7170_v54 = vadd.f32 %v5967_v13, %v2881_v50  ;;  %v2883_v27 = vadd.f32 %v2882_v61, %v7139_v10  ;;  %2929 = vadd.xlane.f32.xlu1 %v2928_v4  ;;  %v5550_v50 = vld [vmem:[%s8429_s8 + $0xec] ss:$16 sps:$4 sm:$0xff]   ;;  %v5553_v4 = vld [vmem:[%s8429_s8 + $0xc4] ss:$16 sps:$4 sm:$0xff]   ;;  %v5554_v13 = vld [vmem:[%s8429_s8 + $0xc8] ss:$16 sps:$4 sm:$0xff]  }
 0xaa8   : > { %v2884_v52 = vpop.f32.mrf.mxu1  ;;  %v5556_v61 = vld [vmem:[%s8429_s8 + $0xcc] ss:$16 sps:$4 sm:$0xff]   ;;  %3595 = vmatprep.subr.bf16.mxu1 %v5550_v50 }
 0xaa9   : > { %v2885_v25 = vadd.f32 %v2884_v52, %v7142_v62  ;;  %v2931_v8 = vadd.f32 %v7170_v54, %v7167_v26  ;;  %v7177_v18 = vadd.f32 %v5968_v3, %v2883_v27  ;;  %3596 = vmatpush1.bf16.msra.mxu1 %v5548_v63  ;;  %v5559_v27 = vld [vmem:[%s8429_s8 + $0xa4] ss:$16 sps:$4 sm:$0xff]   ;;  %v5562_v52 = vld [vmem:[%s8429_s8 + $0xac] ss:$16 sps:$4 sm:$0xff]  }
 0xaaa   : > { %v2888_v0 = vpop.f32.mrf.mxu1  ;;  %3597 = vmatprep.subr.bf16.mxu1 %v5556_v61  ;;  %v5568_v3 = vld [vmem:[%s8429_s8 + $0x8c] ss:$16 sps:$4 sm:$0xff]  }
 0xaab   : > { %v7180_v5 = vadd.f32 %v5969_v21, %v2885_v25  ;;  %v2889_v29 = vadd.f32 %v2888_v0, %v7139_v10  ;;  %2932 = vadd.xlane.f32.xlu0 %v2931_v8  ;;  %v5557_v25 = vld [vmem:[%s8429_s8 + $0xa0] ss:$16 sps:$4 sm:$0xff]   ;;  %v5560_v8 = vld [vmem:[%s8429_s8 + $0xa8] ss:$16 sps:$4 sm:$0xff]   ;;  %v5565_v0 = vld [vmem:[%s8429_s8 + $0x84] ss:$16 sps:$4 sm:$0xff]  }
 0xaac   : > { %v2890_v24 = vpop.f32.mrf.mxu1  ;;  %v5563_v21 = vld [vmem:[%s8429_s8 + $0x80] ss:$16 sps:$4 sm:$0xff]  }
 0xaad   : > { %v2891_v33 = vadd.f32 %v2890_v24, %v7142_v62  ;;  %v2934_v15 = vadd.f32 %v7180_v5, %v7177_v18  ;;  %v7187_v51 = vadd.f32 %v5970_v30, %v2889_v29  ;;  %3598 = vmatpush1.bf16.msra.mxu1 %v5554_v13  ;;  %v5566_v29 = vld [vmem:[%s8429_s8 + $0x88] ss:$16 sps:$4 sm:$0xff]   ;;  %v5571_v24 = vld [vmem:[%s8429_s8 + $0x64] ss:$16 sps:$4 sm:$0xff]  }
 0xaae   : > { %v2892_v56 = vpop.f32.mrf.mxu1  ;;  %3599 = vmatprep.subr.bf16.mxu1 %v5562_v52  ;;  %v5577_v30 = vld [vmem:[%s8429_s8 + $0x44] ss:$16 sps:$4 sm:$0xff]  }
 0xaaf   : > { %v7190_v44 = vadd.f32 %v5971_v45, %v2891_v33  ;;  %v2893_v41 = vadd.f32 %v2892_v56, %v7139_v10  ;;  %2935 = vadd.xlane.f32.xlu0 %v2934_v15  ;;  %v5574_v33 = vld [vmem:[%s8429_s8 + $0x6c] ss:$16 sps:$4 sm:$0xff]   ;;  %v5569_v15 = vld [vmem:[%s8429_s8 + $0x60] ss:$16 sps:$4 sm:$0xff]   ;;  %v5572_v56 = vld [vmem:[%s8429_s8 + $0x68] ss:$16 sps:$4 sm:$0xff]  }
 0xab0   : > { %v2894_v31 = vpop.f32.mrf.mxu1  ;;  %v5580_v45 = vld [vmem:[%s8429_s8 + $0x4c] ss:$16 sps:$4 sm:$0xff]  }
 0xab1   : > { %v2895_v28 = vadd.f32 %v2894_v31, %v7142_v62  ;;  %v2937_v48 = vadd.f32 %v7190_v44, %v7187_v51  ;;  %v7197_v43 = vadd.f32 %v5972_v37, %v2893_v41  ;;  %3600 = vmatpush1.bf16.msra.mxu1 %v5560_v8  ;;  %v5575_v41 = vld [vmem:[%s8429_s8 + $0x40] ss:$16 sps:$4 sm:$0xff]   ;;  %v5578_v31 = vld [vmem:[%s8429_s8 + $0x48] ss:$16 sps:$4 sm:$0xff]  }
 0xab2   : > { %v2898_v36 = vpop.f32.mrf.mxu1  ;;  %3601 = vmatprep.subr.bf16.mxu1 %v5568_v3  ;;  %v5584_v37 = vld [vmem:[%s8429_s8 + $0x28] ss:$16 sps:$4 sm:$0xff]  }
 0xab3   : > { %v7200_v1 = vadd.f32 %v5973_v39, %v2895_v28  ;;  %v2899_v2 = vadd.f32 %v2898_v36, %v7139_v10  ;;  %2938 = vadd.xlane.f32.xlu0 %v2937_v48  ;;  %v5583_v28 = vld [vmem:[%s8429_s8 + $0x24] ss:$16 sps:$4 sm:$0xff]   ;;  %v5586_v48 = vld [vmem:[%s8429_s8 + $0x2c] ss:$16 sps:$4 sm:$0xff]   ;;  %v5581_v36 = vld [vmem:[%s8429_s8 + $0x20] ss:$16 sps:$4 sm:$0xff]  }
 0xab4   : > { %v2900_v14 = vpop.f32.mrf.mxu1  ;;  %v5589_v39 = vld [vmem:[%s8429_s8 + $0x4] ss:$16 sps:$4 sm:$0xff]  }
 0xab5   : > { %v2901_v19 = vadd.f32 %v2900_v14, %v7142_v62  ;;  %v2940_v20 = vadd.f32 %v7200_v1, %v7197_v43  ;;  %v7207_v9 = vadd.f32 %v5974_v35, %v2899_v2  ;;  %3602 = vmatpush1.bf16.msra.mxu1 %v5566_v29  ;;  %v5592_v2 = vld [vmem:[%s8429_s8 + $0xc] ss:$16 sps:$4 sm:$0xff]   ;;  %v5587_v14 = vld [vmem:[%s8429_s8] ss:$16 sps:$4 sm:$0xff]  }
 0xab6   : > { %v2902_v55 = vpop.f32.mrf.mxu1  ;;  %3603 = vmatprep.subr.bf16.mxu1 %v5574_v33  ;;  %v5593_v35 = vld [vmem:[%s8429_s8 + $0x1e0] ss:$16 sps:$4 sm:$0xff]  }
 0xab7   : > { %v7210_v40 = vadd.f32 %v5975_v11, %v2901_v19  ;;  %v2903_v23 = vadd.f32 %v2902_v55, %v7139_v10  ;;  %2941 = vadd.xlane.f32.xlu1 %v2940_v20  ;;  %v5545_v10 = vld [vmem:[%s8429_s8 + $0xe0] ss:$16 sps:$4 sm:$0xff]   ;;  %v5590_v19 = vld [vmem:[%s8429_s8 + $0x8] ss:$16 sps:$4 sm:$0xff]   ;;  %v5595_v20 = vld [vmem:[%s8429_s8 + $0x1e4] ss:$16 sps:$4 sm:$0xff]  }
 0xab8   : > { %v2904_v16 = vpop.f32.mrf.mxu1  ;;  %v5598_v55 = vld [vmem:[%s8429_s8 + $0x1ec] ss:$16 sps:$4 sm:$0xff]   ;;  %v5596_v11 = vld [vmem:[%s8429_s8 + $0x1e8] ss:$16 sps:$4 sm:$0xff]  }
 0xab9   : > { %v2905_v6 = vadd.f32 %v2904_v16, %v7142_v62  ;;  %v2943_v22 = vadd.f32 %v7210_v40, %v7207_v9  ;;  %v7217_v17 = vadd.f32 %v5976_v12, %v2903_v23  ;;  %v5547_v62 = vld [vmem:[%s8429_s8 + $0xe4] ss:$16 sps:$4 sm:$0xff]   ;;  %3604 = vmatpush1.bf16.msra.mxu1 %v5572_v56 }
 0xaba   : > { %3522 = vmatprep.subr.bf16.mxu0 %v5547_v62  ;;  %3605 = vmatprep.subr.bf16.mxu1 %v5580_v45  ;;  %v5601_v45 = vld [vmem:[%s8429_s8 + $0x1c4] ss:$16 sps:$4 sm:$0xff]  }
 0xabb   : > { %v7220_v32 = vadd.f32 %v5977_v53, %v2905_v6  ;;  %2944 = vadd.xlane.f32.xlu0 %v2943_v22  ;;  %3523 = vmatpush1.bf16.msra.mxu0 %v5545_v10 }
 0xabc   : > { %3524 = vmatprep.subr.bf16.mxu0 %v5553_v4 }
 0xabd   : > { %v2946_v49 = vadd.f32 %v7220_v32, %v7217_v17  ;;  %3606 = vmatpush1.bf16.msra.mxu1 %v5578_v31 }
 0xabe   : > { %3607 = vmatprep.subr.bf16.mxu1 %v5586_v48 }
 0xabf   : > { %2947 = vadd.xlane.f32.xlu1 %v2946_v49  ;;  %3525 = vmatpush1.bf16.msra.mxu0 %v5551_v34 }
 0xac0   : > { %3526 = vmatprep.subr.bf16.mxu0 %v5559_v27 }
 0xac1   : > { %3608 = vmatpush1.bf16.msra.mxu1 %v5584_v37 }
 0xac2   : > { %3609 = vmatprep.subr.bf16.mxu1 %v5592_v2 }
 0xac3   : > { %3527 = vmatpush1.bf16.msra.mxu0 %v5557_v25 }
 0xac4   : > { %3528 = vmatprep.subr.bf16.mxu0 %v5565_v0 }
 0xac5   : > { %3610 = vmatpush1.bf16.msra.mxu1 %v5590_v19  ;;  %v5608_v19 = vld [vmem:[%s8429_s8 + $0x1a8] ss:$16 sps:$4 sm:$0xff]  }
 0xac6   : > { %3611 = vmatprep.subr.bf16.mxu1 %v5598_v55 }
 0xac7   : > { %3529 = vmatpush1.bf16.msra.mxu0 %v5563_v21 }
 0xac8   : > { %3530 = vmatprep.subr.bf16.mxu0 %v5571_v24 }
 0xac9   : > { %3612 = vmatpush2.bf16.msra.mxu1 %v5596_v11 }
 0xacb   : > { %3531 = vmatpush1.bf16.msra.mxu0 %v5569_v15 }
 0xacc   : > { %3532 = vmatprep.subr.bf16.mxu0 %v5577_v30 }
 0xacf   : > { %3533 = vmatpush1.bf16.msra.mxu0 %v5575_v41  ;;  %v5602_v41 = vld [vmem:[%s8429_s8 + $0x1c8] ss:$16 sps:$4 sm:$0xff]  }
 0xad0   : > { %3534 = vmatprep.subr.bf16.mxu0 %v5583_v28 }
 0xad3   : > { %3535 = vmatpush1.bf16.msra.mxu0 %v5581_v36 }
 0xad4   : > { %3536 = vmatprep.subr.bf16.mxu0 %v5589_v39 }
 0xad7   : > { %3537 = vmatpush1.bf16.msra.mxu0 %v5587_v14  ;;  %v5605_v14 = vld [vmem:[%s8429_s8 + $0x1a0] ss:$16 sps:$4 sm:$0xff]  }
 0xad8   : > { %3538 = vmatprep.subr.bf16.mxu0 %v5595_v20 }
 0xadb   : > { %3539 = vmatpush2.bf16.msra.mxu0 %v5593_v35 }
 0xadc   : > { %3540 = vmatprep.subr.bf16.mxu0 %v5601_v45  ;;  %v5646_v45 = vld [vmem:[%s8431_s10 + $0x174] ss:$8 sps:$4 sm:$0xff]  }
 0xb2c   : > { %v2927_v23 = vpop.xlane.xlu0 %2926 }
 0xb2d   : > { %v2950_v16 = vmul.f32 0.00390625, %v2927_v23 }
 0xb2f   : > { %v7333_v6 = vsub.f32 %v7147_v46, %v2950_v16  ;;  %v7336_v22 = vsub.f32 %v7150_v7, %v2950_v16 }
 0xb30   : > { %v2930_v12 = vpop.xlane.xlu1 %2929 }
 0xb31   : > { %v2974_v53 = vmul.f32 %v7333_v6, %v7333_v6  ;;  %v2975_v49 = vmul.f32 %v7336_v22, %v7336_v22  ;;  %v2951_v10 = vmul.f32 0.00390625, %v2930_v12 }
 0xb33   : > { %v7343_v62 = vsub.f32 %v7157_v47, %v2951_v10  ;;  %v7346_v63 = vsub.f32 %v7160_v38, %v2951_v10  ;;  %v2990_v50 = vadd.f32 %v2975_v49, %v2974_v53  ;;  %v5611_v53 = vld [vmem:[%s8429_s8 + $0x180] ss:$16 sps:$4 sm:$0xff]   ;;  %v5614_v49 = vld [vmem:[%s8429_s8 + $0x188] ss:$16 sps:$4 sm:$0xff]  }
 0xb34   : > { %v2933_v46 = vpop.xlane.xlu0 %2932 }
 0xb35   : > { %v2976_v7 = vmul.f32 %v7343_v62, %v7343_v62  ;;  %v2977_v4 = vmul.f32 %v7346_v63, %v7346_v63  ;;  %v2952_v61 = vmul.f32 0.00390625, %v2933_v46  ;;  %2991 = vadd.xlane.f32.xlu0 %v2990_v50 }
 0xb37   : > { %v7353_v34 = vsub.f32 %v7167_v26, %v2952_v61  ;;  %v7356_v13 = vsub.f32 %v7170_v54, %v2952_v61  ;;  %v2993_v47 = vadd.f32 %v2977_v4, %v2976_v7  ;;  %v5617_v61 = vld [vmem:[%s8429_s8 + $0x160] ss:$16 sps:$4 sm:$0xff]  }
 0xb38   : > { %v2936_v27 = vpop.xlane.xlu0 %2935 }
 0xb39   : > { %v2978_v38 = vmul.f32 %v7353_v34, %v7353_v34  ;;  %v2979_v52 = vmul.f32 %v7356_v13, %v7356_v13  ;;  %v2953_v25 = vmul.f32 0.00390625, %v2936_v27  ;;  %2994 = vadd.xlane.f32.xlu1 %v2993_v47  ;;  %v5620_v47 = vld [vmem:[%s8429_s8 + $0x168] ss:$16 sps:$4 sm:$0xff]  }
 0xb3b   : > { %v7363_v8 = vsub.f32 %v7177_v18, %v2953_v25  ;;  %v7366_v0 = vsub.f32 %v7180_v5, %v2953_v25  ;;  %v2996_v26 = vadd.f32 %v2979_v52, %v2978_v38  ;;  %v5625_v38 = vld [vmem:[%s8429_s8 + $0x144] ss:$16 sps:$4 sm:$0xff]   ;;  %v5628_v52 = vld [vmem:[%s8429_s8 + $0x14c] ss:$16 sps:$4 sm:$0xff]   ;;  %v5623_v25 = vld [vmem:[%s8429_s8 + $0x140] ss:$16 sps:$4 sm:$0xff]  }
 0xb3c   : > { %v2939_v3 = vpop.xlane.xlu0 %2938 }
 0xb3d   : > { %v2980_v54 = vmul.f32 %v7363_v8, %v7363_v8  ;;  %v2981_v21 = vmul.f32 %v7366_v0, %v7366_v0  ;;  %v2954_v29 = vmul.f32 0.00390625, %v2939_v3  ;;  %2997 = vadd.xlane.f32.xlu0 %v2996_v26  ;;  %v5626_v26 = vld [vmem:[%s8429_s8 + $0x148] ss:$16 sps:$4 sm:$0xff]   ;;  %v5631_v3 = vld [vmem:[%s8429_s8 + $0x124] ss:$16 sps:$4 sm:$0xff]  }
 0xb3f   : > { %v7373_v24 = vsub.f32 %v7187_v51, %v2954_v29  ;;  %v7376_v33 = vsub.f32 %v7190_v44, %v2954_v29  ;;  %v2999_v18 = vadd.f32 %v2981_v21, %v2980_v54  ;;  %v5604_v51 = vld [vmem:[%s8429_s8 + $0x1cc] ss:$16 sps:$4 sm:$0xff]   ;;  %v5599_v44 = vld [vmem:[%s8429_s8 + $0x1c0] ss:$16 sps:$4 sm:$0xff]   ;;  %v5632_v29 = vld [vmem:[%s8429_s8 + $0x128] ss:$16 sps:$4 sm:$0xff]  }
 0xb40   : > { %v2942_v15 = vpop.xlane.xlu1 %2941  ;;  %3613 = vmatprep.subr.bf16.mxu1 %v5604_v51  ;;  %3541 = vmatpush2.bf16.msra.mxu0 %v5599_v44  ;;  %v5634_v54 = vld [vmem:[%s8429_s8 + $0x12c] ss:$16 sps:$4 sm:$0xff]   ;;  %v5629_v21 = vld [vmem:[%s8429_s8 + $0x120] ss:$16 sps:$4 sm:$0xff]  }
 0xb41   : > { %v2982_v5 = vmul.f32 %v7373_v24, %v7373_v24  ;;  %v2983_v56 = vmul.f32 %v7376_v33, %v7376_v33  ;;  %v2955_v30 = vmul.f32 0.00390625, %v2942_v15  ;;  %3000 = vadd.xlane.f32.xlu1 %v2999_v18  ;;  %3614 = vmatpush2.bf16.msra.mxu1 %v5602_v41  ;;  %v5637_v18 = vld [vmem:[%s8429_s8 + $0x104] ss:$16 sps:$4 sm:$0xff]   ;;  %v5640_v15 = vld [vmem:[%s8429_s8 + $0x10c] ss:$16 sps:$4 sm:$0xff]  }
 0xb43   : > { %v7395_v31 = vsub.f32 %v7197_v43, %v2955_v30  ;;  %v7398_v28 = vsub.f32 %v7200_v1, %v2955_v30  ;;  %v3002_v48 = vadd.f32 %v2983_v56, %v2982_v5  ;;  %v5607_v43 = vld [vmem:[%s8429_s8 + $0x1a4] ss:$16 sps:$4 sm:$0xff]   ;;  %v5610_v1 = vld [vmem:[%s8429_s8 + $0x1ac] ss:$16 sps:$4 sm:$0xff]   ;;  %v5635_v5 = vld [vmem:[%s8429_s8 + $0x100] ss:$16 sps:$4 sm:$0xff]  }
 0xb44   : > { %v2945_v36 = vpop.xlane.xlu0 %2944  ;;  %3542 = vmatprep.subr.bf16.mxu0 %v5607_v43  ;;  %3615 = vmatprep.subr.bf16.mxu1 %v5610_v1  ;;  %v5638_v56 = vld [vmem:[%s8429_s8 + $0x108] ss:$16 sps:$4 sm:$0xff]   ;;  %v5643_v30 = vld [vmem:[%s8431_s10 + $0x74] ss:$8 sps:$4 sm:$0xff]  }
 0xb45   : > { %v2984_v37 = vmul.f32 %v7395_v31, %v7395_v31  ;;  %v2985_v39 = vmul.f32 %v7398_v28, %v7398_v28  ;;  %v2956_v2 = vmul.f32 0.00390625, %v2945_v36  ;;  %3003 = vadd.xlane.f32.xlu0 %v3002_v48  ;;  %3543 = vmatpush2.bf16.msra.mxu0 %v5605_v14 }
 0xb46   : > { %3616 = vmatpush2.bf16.msra.mxu1 %v5608_v19 }
 0xb47   : > { %v7417_v20 = vsub.f32 %v7207_v9, %v2956_v2  ;;  %v7420_v55 = vsub.f32 %v7210_v40, %v2956_v2  ;;  %v3005_v35 = vadd.f32 %v2985_v39, %v2984_v37  ;;  %v5613_v9 = vld [vmem:[%s8429_s8 + $0x184] ss:$16 sps:$4 sm:$0xff]   ;;  %v5616_v40 = vld [vmem:[%s8429_s8 + $0x18c] ss:$16 sps:$4 sm:$0xff]  }
 0xb48   : > { %v2948_v11 = vpop.xlane.xlu1 %2947  ;;  %3544 = vmatprep.subr.bf16.mxu0 %v5613_v9  ;;  %3617 = vmatprep.subr.bf16.mxu1 %v5616_v40 }
 0xb49   : > { %v2986_v23 = vmul.f32 %v7417_v20, %v7417_v20  ;;  %v2987_v16 = vmul.f32 %v7420_v55, %v7420_v55  ;;  %v2957_v12 = vmul.f32 0.00390625, %v2948_v11  ;;  %3006 = vadd.xlane.f32.xlu1 %v3005_v35  ;;  %3545 = vmatpush2.bf16.msra.mxu0 %v5611_v53  ;;  %v2923_v35 = vld [vmem:[%s8427_s6] sm:$0x3] }
 0xb4a   : > { %3618 = vmatpush2.bf16.msra.mxu1 %v5614_v49  ;;  %v7509_v9 = vrot.slane %v2923_v35, %v6420_v60  ;;  %v2924_v49 = vld [vmem:[%s8428_s7] sm:$0x3] }
 0xb4b   : > { %v7439_v10 = vsub.f32 %v7217_v17, %v2957_v12  ;;  %v7442_v50 = vsub.f32 %v7220_v32, %v2957_v12  ;;  %v3008_v46 = vadd.f32 %v2987_v16, %v2986_v23  ;;  %v5619_v17 = vld [vmem:[%s8429_s8 + $0x164] ss:$16 sps:$4 sm:$0xff]   ;;  %v5622_v32 = vld [vmem:[%s8429_s8 + $0x16c] ss:$16 sps:$4 sm:$0xff]   ;;  %v7506_v12 = vrot.slane %v2923_v35, %v6417_v59 }
 0xb4c   : > { %3546 = vmatprep.subr.bf16.mxu0 %v5619_v17  ;;  %3619 = vmatprep.subr.bf16.mxu1 %v5622_v32 }
 0xb4d   : > { %v2988_v7 = vmul.f32 %v7439_v10, %v7439_v10  ;;  %v2989_v4 = vmul.f32 %v7442_v50, %v7442_v50  ;;  %3009 = vadd.xlane.f32.xlu0 %v3008_v46  ;;  %3547 = vmatpush2.bf16.msra.mxu0 %v5617_v61  ;;  %v7518_v61 = vrot.slane %v2924_v49, %v6417_v59 }
 0xb4e   : > { %3620 = vmatpush2.bf16.msra.mxu1 %v5620_v47  ;;  %3548 = vmatprep.subr.bf16.mxu0 %v5625_v38  ;;  %v7521_v47 = vrot.slane %v2924_v49, %v6420_v60 }
 0xb4f   : > { %v3011_v27 = vadd.f32 %v2989_v4, %v2988_v7  ;;  %3621 = vmatprep.subr.bf16.mxu1 %v5628_v52 }
 0xb51   : > { %3012 = vadd.xlane.f32.xlu1 %v3011_v27  ;;  %3549 = vmatpush2.bf16.msra.mxu0 %v5623_v25 }
 0xb52   : > { %3622 = vmatpush2.bf16.msra.mxu1 %v5626_v26  ;;  %3550 = vmatprep.subr.bf16.mxu0 %v5631_v3 }
 0xb53   : > { %3623 = vmatprep.subr.bf16.mxu1 %v5634_v54 }
 0xb55   : > { %3551 = vmatpush2.bf16.msra.mxu0 %v5629_v21 }
 0xb56   : > { %3624 = vmatpush2.bf16.msra.mxu1 %v5632_v29  ;;  %3552 = vmatprep.subr.bf16.mxu0 %v5637_v18 }
 0xb57   : > { %3625 = vmatprep.subr.bf16.mxu1 %v5640_v15 }
 0xb59   : > { %3553 = vmatpush2.bf16.msra.mxu0 %v5635_v5 }
 0xb5a   : > { %3626 = vmatpush2.bf16.msra.mxu1 %v5638_v56  ;;  %4368 = vmatprep.subr.bf16.mxu0 %v5643_v30 }
 0xb5b   : > { %4441 = vmatprep.subr.bf16.mxu1 %v5646_v45 }
 0xbbe   : > { %v2992_v51 = vpop.xlane.xlu0 %2991 }
 0xbbf   : > { %v3014_v44 = vmul.f32 0.00390625, %v2992_v51 }
 0xbc1   : > { %v3022_v41 = vadd.f32 1e-12, %v3014_v44  ;;  %v5641_v44 = vld [vmem:[%s8431_s10 + $0x70] ss:$8 sps:$4 sm:$0xff]  }
 0xbc2   : > { %v2995_v48 = vpop.xlane.xlu1 %2994 }
 0xbc3   : > { %5865 = vrsqrt.f32 %v3022_v41  ;;  %v3015_v36 = vmul.f32 0.00390625, %v2995_v48  ;;  %v5644_v41 = vld [vmem:[%s8431_s10 + $0x170] ss:$8 sps:$4 sm:$0xff]  }
 0xbc5   : > { %v3023_v37 = vadd.f32 1e-12, %v3015_v36  ;;  %v5649_v36 = vld [vmem:[%s8431_s10 + $0x64] ss:$8 sps:$4 sm:$0xff]  }
 0xbc6   : > { %v2998_v39 = vpop.xlane.xlu0 %2997 }
 0xbc7   : > { %5867 = vrsqrt.f32 %v3023_v37  ;;  %v3016_v2 = vmul.f32 0.00390625, %v2998_v39  ;;  %v5652_v37 = vld [vmem:[%s8431_s10 + $0x164] ss:$8 sps:$4 sm:$0xff]  }
 0xbc9   : > { %v3024_v43 = vadd.f32 1e-12, %v3016_v2 }
 0xbca   : > { %v3001_v1 = vpop.xlane.xlu1 %3000 }
 0xbcb   : > { %5869 = vrsqrt.f32 %v3024_v43  ;;  %v3017_v14 = vmul.f32 0.00390625, %v3001_v1 }
 0xbcd   : > { %v3025_v19 = vadd.f32 1e-12, %v3017_v14 }
 0xbce   : > { %v3004_v11 = vpop.xlane.xlu0 %3003 }
 0xbcf   : > { %5871 = vrsqrt.f32 %v3025_v19  ;;  %v3018_v23 = vmul.f32 0.00390625, %v3004_v11  ;;  %v5647_v19 = vld [vmem:[%s8431_s10 + $0x60] ss:$8 sps:$4 sm:$0xff]  }
 0xbd0   : > { %v5866_v16 = vpop.eup %5865 }
 0xbd1   : > { %v3038_v40 = vmul.f32 %v5866_v16, %v7333_v6  ;;  %v3026_v53 = vadd.f32 1e-12, %v3018_v23  ;;  %v3039_v46 = vmul.f32 %v5866_v16, %v7336_v22  ;;  %v5655_v23 = vld [vmem:[%s8431_s10 + $0x54] ss:$8 sps:$4 sm:$0xff]  }
 0xbd2   : > { %v3007_v7 = vpop.xlane.xlu1 %3006 }
 0xbd3   : > { %5873 = vrsqrt.f32 %v3026_v53  ;;  %v3019_v4 = vmul.f32 0.00390625, %v3007_v7  ;;  %v3066_v32 = vmul.f32 %v7509_v9, %v3039_v46  ;;  %v3065_v6 = vmul.f32 %v7506_v12, %v3038_v40 }
 0xbd4   : > { %v5868_v17 = vpop.eup %5867 }
 0xbd5   : > { %v3040_v27 = vmul.f32 %v5868_v17, %v7343_v62  ;;  %v3027_v38 = vadd.f32 1e-12, %v3019_v4  ;;  %v3041_v52 = vmul.f32 %v5868_v17, %v7346_v63  ;;  %v7529_v21 = vadd.f32 %v7521_v47, %v3066_v32  ;;  %v5653_v4 = vld [vmem:[%s8431_s10 + $0x50] ss:$8 sps:$4 sm:$0xff]   ;;  %v5658_v17 = vld [vmem:[%s8431_s10 + $0x154] ss:$8 sps:$4 sm:$0xff]  }
 0xbd6   : > { %v3010_v22 = vpop.xlane.xlu0 %3009  ;;  %v7532_v29 = vadd.f32 %v7518_v61, %v3065_v6  ;;  %v5656_v6 = vld [vmem:[%s8431_s10 + $0x150] ss:$8 sps:$4 sm:$0xff]  }
 0xbd7   : > { %5875 = vrsqrt.f32 %v3027_v38  ;;  %v3020_v25 = vmul.f32 0.00390625, %v3010_v22  ;;  %v3068_v26 = vmul.f32 %v7509_v9, %v3041_v52  ;;  %v3067_v3 = vmul.f32 %v7506_v12, %v3040_v27  ;;  %8466 = vst [vmem:[#allocation4_spill] sm:$0xff] %v7529_v21  ;;  %v5661_v27 = vld [vmem:[%s8431_s10 + $0x44] ss:$8 sps:$4 sm:$0xff]  }
 0xbd8   : > { %v5870_v54 = vpop.eup %5869  ;;  %8467 = vst [vmem:[#allocation5_spill] sm:$0xff] %v7532_v29  ;;  %v5664_v22 = vld [vmem:[%s8431_s10 + $0x144] ss:$8 sps:$4 sm:$0xff]  }
 0xbd9   : > { %v3028_v18 = vadd.f32 1e-12, %v3020_v25  ;;  %v7535_v62 = vadd.f32 %v7521_v47, %v3068_v26  ;;  %v7538_v63 = vadd.f32 %v7518_v61, %v3067_v3  ;;  %v3043_v15 = vmul.f32 %v5870_v54, %v7356_v13  ;;  %v5659_v3 = vld [vmem:[%s8431_s10 + $0x40] ss:$8 sps:$4 sm:$0xff]  }
 0xbda   : > { %v3013_v5 = vpop.xlane.xlu1 %3012  ;;  %v3042_v56 = vmul.f32 %v5870_v54, %v7353_v34 }
 0xbdb   : > { %8468 = vst [vmem:[#allocation6_spill] sm:$0xff] %v7535_v62  ;;  %8469 = vst [vmem:[#allocation7_spill] sm:$0xff] %v7538_v63  ;;  %5877 = vrsqrt.f32 %v3028_v18  ;;  %v3021_v30 = vmul.f32 0.00390625, %v3013_v5  ;;  %v3109_v45 = vpack.c.bf16 %v7535_v62, %v7529_v21  ;;  %v3108_v51 = vpack.c.bf16 %v7538_v63, %v7532_v29  ;;  %v5662_v18 = vld [vmem:[%s8431_s10 + $0x140] ss:$8 sps:$4 sm:$0xff]  }
 0xbdc   : > { %v5872_v13 = vpop.eup %5871  ;;  %v3070_v48 = vmul.f32 %v7509_v9, %v3043_v15  ;;  %v3069_v34 = vmul.f32 %v7506_v12, %v3042_v56  ;;  %v5667_v15 = vld [vmem:[%s8431_s10 + $0x34] ss:$8 sps:$4 sm:$0xff]  }
 0xbdd   : > { %v3029_v39 = vadd.f32 1e-12, %v3021_v30  ;;  %3554 = vmatprep.mubr.bf16.mxu0 %v3109_v45  ;;  %3627 = vmatprep.mubr.bf16.mxu1 %v3109_v45  ;;  %v3045_v2 = vmul.f32 %v5872_v13, %v7366_v0  ;;  %v3044_v43 = vmul.f32 %v5872_v13, %v7363_v8  ;;  %v5650_v8 = vld [vmem:[%s8431_s10 + $0x160] ss:$8 sps:$4 sm:$0xff]   ;;  %v5670_v13 = vld [vmem:[%s8431_s10 + $0x134] ss:$8 sps:$4 sm:$0xff]  }
 0xbde   : > { %3555 = vmatmul.mubr.bf16.vlgmr.msra.gmra.mxu0 %v3108_v51  ;;  %3628 = vmatmul.mubr.bf16.vlgmr.msra.gmra.mxu1 %v3108_v51  ;;  %v7568_v11 = vadd.f32 %v7521_v47, %v3070_v48  ;;  %v7571_v0 = vadd.f32 %v7518_v61, %v3069_v34  ;;  %v5673_v34 = vld [vmem:[%s8431_s10 + $0x24] ss:$8 sps:$4 sm:$0xff]  }
 0xbdf   : > { %5879 = vrsqrt.f32 %v3029_v39  ;;  %v3072_v1 = vmul.f32 %v7509_v9, %v3045_v2  ;;  %v3071_v14 = vmul.f32 %v7506_v12, %v3044_v43  ;;  %4369 = vmatpush1.bf16.msra.mxu0 %v5641_v44  ;;  %4442 = vmatpush1.bf16.msra.mxu1 %v5644_v41  ;;  %v5665_v41 = vld [vmem:[%s8431_s10 + $0x30] ss:$8 sps:$4 sm:$0xff]   ;;  %v5676_v2 = vld [vmem:[%s8431_s10 + $0x124] ss:$8 sps:$4 sm:$0xff]  }
 0xbe0   : > { %v5874_v35 = vpop.eup %5873  ;;  %8470 = vst [vmem:[#allocation8_spill] sm:$0xff] %v7568_v11  ;;  %8471 = vst [vmem:[#allocation9_spill] sm:$0xff] %v7571_v0  ;;  %4370 = vmatprep.subr.bf16.mxu0 %v5649_v36  ;;  %4443 = vmatprep.subr.bf16.mxu1 %v5652_v37 }
 0xbe1   : > { %v7580_v16 = vadd.f32 %v7521_v47, %v3072_v1  ;;  %v7583_v40 = vadd.f32 %v7518_v61, %v3071_v14  ;;  %v3047_v53 = vmul.f32 %v5874_v35, %v7376_v33  ;;  %v3046_v49 = vmul.f32 %v5874_v35, %v7373_v24 }
 0xbe3   : > { %8472 = vst [vmem:[#allocation10_spill] sm:$0xff] %v7580_v16  ;;  %8473 = vst [vmem:[#allocation11_spill] sm:$0xff] %v7583_v40  ;;  %v3111_v46 = vpack.c.bf16 %v7580_v16, %v7568_v11  ;;  %v3110_v7 = vpack.c.bf16 %v7583_v40, %v7571_v0  ;;  %4371 = vmatpush1.bf16.msra.mxu0 %v5647_v19  ;;  %v3074_v33 = vmul.f32 %v7509_v9, %v3047_v53  ;;  %v5680_v53 = vld [vmem:[%s8431_s10 + $0x110] ss:$8 sps:$4 sm:$0xff]  }
 0xbe4   : > { %v5876_v32 = vpop.eup %5875  ;;  %v3073_v24 = vmul.f32 %v7506_v12, %v3046_v49  ;;  %4444 = vmatpush1.bf16.msra.mxu1 %v5650_v8  ;;  %4372 = vmatprep.subr.bf16.mxu0 %v5655_v23  ;;  %v5677_v23 = vld [vmem:[%s8431_s10 + $0x10] ss:$8 sps:$4 sm:$0xff]   ;;  %v5685_v49 = vld [vmem:[%s8431_s10 + $0x4] ss:$8 sps:$4 sm:$0xff]  }
 0xbe5   : > { %3564 = vmatprep.mubr.bf16.mxu0 %v3111_v46  ;;  %3637 = vmatprep.mubr.bf16.mxu1 %v3111_v46  ;;  %v3049_v38 = vmul.f32 %v5876_v32, %v7398_v28  ;;  %v3048_v52 = vmul.f32 %v5876_v32, %v7395_v31  ;;  %v7616_v28 = vadd.f32 %v7521_v47, %v3074_v33  ;;  %v5688_v46 = vld [vmem:[%s8431_s10 + $0x104] ss:$8 sps:$4 sm:$0xff]   ;;  %v5694_v32 = vld [vmem:[%s8431_s10 + $0x1f4] ss:$8 sps:$4 sm:$0xff]   ;;  %v5689_v33 = vld [vmem:[%s8431_s10 + $0xf0] ss:$8 sps:$4 sm:$0xff]  }
 0xbe6   : > { %3565 = vmatmul.mubr.bf16.gmra.mxu0 %v3110_v7  ;;  %3638 = vmatmul.mubr.bf16.gmra.mxu1 %v3110_v7  ;;  %v7619_v31 = vadd.f32 %v7518_v61, %v3073_v24  ;;  %v5683_v7 = vld [vmem:[%s8431_s10] ss:$8 sps:$4 sm:$0xff]   ;;  %v5692_v24 = vld [vmem:[%s8431_s10 + $0x1f0] ss:$8 sps:$4 sm:$0xff]  }
 0xbe7   : > { %v3076_v25 = vmul.f32 %v7509_v9, %v3049_v38  ;;  %v3075_v26 = vmul.f32 %v7506_v12, %v3048_v52  ;;  %4445 = vmatprep.subr.bf16.mxu1 %v5658_v17  ;;  %4373 = vmatpush1.bf16.msra.mxu0 %v5653_v4  ;;  %8474 = vst [vmem:[#allocation12_spill] sm:$0xff] %v7616_v28  ;;  %v5686_v4 = vld [vmem:[%s8431_s10 + $0x100] ss:$8 sps:$4 sm:$0xff]   ;;  %v5691_v17 = vld [vmem:[%s8431_s10 + $0xf4] ss:$8 sps:$4 sm:$0xff]  }
 0xbe8   : > { %v5878_v54 = vpop.eup %5877  ;;  %8475 = vst [vmem:[#allocation13_spill] sm:$0xff] %v7619_v31  ;;  %4446 = vmatpush1.bf16.msra.mxu1 %v5656_v6  ;;  %4374 = vmatprep.subr.bf16.mxu0 %v5661_v27  ;;  %v5697_v6 = vld [vmem:[%s8431_s10 + $0xe4] ss:$8 sps:$4 sm:$0xff]   ;;  %v5695_v38 = vld [vmem:[%s8431_s10 + $0xe0] ss:$8 sps:$4 sm:$0xff]  }
 0xbe9   : > { %v7628_v5 = vadd.f32 %v7521_v47, %v3076_v25  ;;  %v7631_v56 = vadd.f32 %v7518_v61, %v3075_v26  ;;  %v3051_v30 = vmul.f32 %v5878_v54, %v7420_v55  ;;  %v3050_v45 = vmul.f32 %v5878_v54, %v7417_v20  ;;  %4447 = vmatprep.subr.bf16.mxu1 %v5664_v22  ;;  %v5668_v20 = vld [vmem:[%s8431_s10 + $0x130] ss:$8 sps:$4 sm:$0xff]   ;;  %v5700_v27 = vld [vmem:[%s8431_s10 + $0x1e4] ss:$8 sps:$4 sm:$0xff]   ;;  %v5698_v52 = vld [vmem:[%s8431_s10 + $0x1e0] ss:$8 sps:$4 sm:$0xff]  }
 0xbea   : > { %v5703_v22 = vld [vmem:[%s8431_s10 + $0xd4] ss:$8 sps:$4 sm:$0xff]   ;;  %v5701_v26 = vld [vmem:[%s8431_s10 + $0xd0] ss:$8 sps:$4 sm:$0xff]   ;;  %v5709_v54 = vld [vmem:[%s8431_s10 + $0xc4] ss:$8 sps:$4 sm:$0xff]  }
 0xbeb   : > { %8476 = vst [vmem:[#allocation14_spill] sm:$0xff] %v7628_v5  ;;  %8477 = vst [vmem:[#allocation15_spill] sm:$0xff] %v7631_v56  ;;  %v3113_v51 = vpack.c.bf16 %v7628_v5, %v7616_v28  ;;  %v3112_v44 = vpack.c.bf16 %v7631_v56, %v7619_v31  ;;  %4375 = vmatpush1.bf16.msra.mxu0 %v5659_v3  ;;  %v3078_v55 = vmul.f32 %v7509_v9, %v3051_v30  ;;  %v5706_v25 = vld [vmem:[%s8431_s10 + $0x1d4] ss:$8 sps:$4 sm:$0xff]   ;;  %v5704_v3 = vld [vmem:[%s8431_s10 + $0x1d0] ss:$8 sps:$4 sm:$0xff]  }
 0xbec   : > { %v5880_v48 = vpop.eup %5879  ;;  %4448 = vmatpush1.bf16.msra.mxu1 %v5662_v18  ;;  %4376 = vmatprep.subr.bf16.mxu0 %v5667_v15  ;;  %v3077_v39 = vmul.f32 %v7506_v12, %v3050_v45  ;;  %v5712_v18 = vld [vmem:[%s8431_s10 + $0x1c4] ss:$8 sps:$4 sm:$0xff]   ;;  %v5707_v15 = vld [vmem:[%s8431_s10 + $0xc0] ss:$8 sps:$4 sm:$0xff]   ;;  %v5715_v45 = vld [vmem:[%s8431_s10 + $0xb4] ss:$8 sps:$4 sm:$0xff]  }
 0xbed   : > { %3574 = vmatprep.mubr.bf16.mxu0 %v3113_v51  ;;  %3647 = vmatprep.mubr.bf16.mxu1 %v3113_v51  ;;  %v3053_v36 = vmul.f32 %v5880_v48, %v7442_v50  ;;  %v3052_v37 = vmul.f32 %v5880_v48, %v7439_v10  ;;  %v5671_v50 = vld [vmem:[%s8431_s10 + $0x20] ss:$8 sps:$4 sm:$0xff]   ;;  %v7667_v14 = vadd.f32 %v7521_v47, %v3078_v55  ;;  %v5718_v51 = vld [vmem:[%s8431_s10 + $0x1b4] ss:$8 sps:$4 sm:$0xff]   ;;  %v5724_v48 = vld [vmem:[%s8431_s10 + $0x1a4] ss:$8 sps:$4 sm:$0xff]  }
 0xbee   : > { %3575 = vmatmul.mubr.bf16.gmra.mxu0 %v3112_v44  ;;  %3648 = vmatmul.mubr.bf16.gmra.mxu1 %v3112_v44  ;;  %v5674_v10 = vld [vmem:[%s8431_s10 + $0x120] ss:$8 sps:$4 sm:$0xff]   ;;  %v5713_v44 = vld [vmem:[%s8431_s10 + $0xb0] ss:$8 sps:$4 sm:$0xff]  }
 0xbef   : > { %v3080_v43 = vmul.f32 %v7509_v9, %v3053_v36  ;;  %v3079_v1 = vmul.f32 %v7506_v12, %v3052_v37  ;;  %4449 = vmatprep.subr.bf16.mxu1 %v5670_v13  ;;  %4377 = vmatpush1.bf16.msra.mxu0 %v5665_v41  ;;  %8478 = vst [vmem:[#allocation16_spill] sm:$0xff] %v7667_v14  ;;  %v5710_v30 = vld [vmem:[%s8431_s10 + $0x1c0] ss:$8 sps:$4 sm:$0xff]   ;;  %v5716_v41 = vld [vmem:[%s8431_s10 + $0x1b0] ss:$8 sps:$4 sm:$0xff]  }
 0xbf0   : > { %4450 = vmatpush1.bf16.msra.mxu1 %v5668_v20  ;;  %4378 = vmatprep.subr.bf16.mxu0 %v5673_v34  ;;  %v7673_v12 = vadd.f32 %v7518_v61, %v3077_v39  ;;  %v5721_v13 = vld [vmem:[%s8431_s10 + $0xa4] ss:$8 sps:$4 sm:$0xff]   ;;  %v5719_v55 = vld [vmem:[%s8431_s10 + $0xa0] ss:$8 sps:$4 sm:$0xff]   ;;  %v5727_v34 = vld [vmem:[%s8431_s10 + $0x94] ss:$8 sps:$4 sm:$0xff]  }
 0xbf1   : > { %v7670_v19 = vadd.f32 %v7521_v47, %v3080_v43  ;;  %v7676_v9 = vadd.f32 %v7518_v61, %v3079_v1  ;;  %4451 = vmatprep.subr.bf16.mxu1 %v5676_v2  ;;  %v5679_v47 = vld [vmem:[%s8431_s10 + $0x14] ss:$8 sps:$4 sm:$0xff]   ;;  %v5722_v20 = vld [vmem:[%s8431_s10 + $0x1a0] ss:$8 sps:$4 sm:$0xff]   ;;  %v5725_v37 = vld [vmem:[%s8431_s10 + $0x90] ss:$8 sps:$4 sm:$0xff]  }
 0xbf2   : > { %8480 = vst [vmem:[#allocation18_spill] sm:$0xff] %v7673_v12  ;;  %v5682_v61 = vld [vmem:[%s8431_s10 + $0x114] ss:$8 sps:$4 sm:$0xff]   ;;  %v5728_v39 = vld [vmem:[%s8431_s10 + $0x190] ss:$8 sps:$4 sm:$0xff]  }
 0xbf3   : > { %8479 = vst [vmem:[#allocation17_spill] sm:$0xff] %v7670_v19  ;;  %8481 = vst [vmem:[#allocation19_spill] sm:$0xff] %v7676_v9  ;;  %v3115_v35 = vpack.c.bf16 %v7670_v19, %v7667_v14  ;;  %v3114_v8 = vpack.c.bf16 %v7676_v9, %v7673_v12  ;;  %4379 = vmatpush1.bf16.msra.mxu0 %v5671_v50  ;;  %v5730_v36 = vld [vmem:[%s8431_s10 + $0x194] ss:$8 sps:$4 sm:$0xff]   ;;  %v5733_v2 = vld [vmem:[%s8431_s10 + $0x84] ss:$8 sps:$4 sm:$0xff]  }
 0xbf4   : > { %4452 = vmatpush1.bf16.msra.mxu1 %v5674_v10  ;;  %4380 = vmatprep.subr.bf16.mxu0 %v5679_v47  ;;  %v5736_v43 = vld [vmem:[%s8431_s10 + $0x184] ss:$8 sps:$4 sm:$0xff]   ;;  %v5731_v1 = vld [vmem:[%s8431_s10 + $0x80] ss:$8 sps:$4 sm:$0xff]  }
 0xbf5   : > { %3584 = vmatprep.mubr.bf16.mxu0 %v3115_v35  ;;  %3657 = vmatprep.mubr.bf16.mxu1 %v3115_v35  ;;  %v5734_v50 = vld [vmem:[%s8431_s10 + $0x180] ss:$8 sps:$4 sm:$0xff]  }
 0xbf6   : > { %3585 = vmatmul.mubr.bf16.gmra.mxu0 %v3114_v8  ;;  %3658 = vmatmul.mubr.bf16.gmra.mxu1 %v3114_v8  ;;  %v3180_v10 = vld [vmem:[%s8430_s9] sm:$0xf] }
 0xbf7   : > { %4453 = vmatprep.subr.bf16.mxu1 %v5682_v61  ;;  %4381 = vmatpush1.bf16.msra.mxu0 %v5677_v23  ;;  %v7806_v35 = vrot.slane %v3180_v10, %v6417_v59  ;;  %v7810_v8 = vrot.slane %v3180_v10, %v616_v42  ;;  %v7813_v23 = vrot.slane %v3180_v10, %v6420_v60 }
 0xbf8   : > { %4454 = vmatpush1.bf16.msra.mxu1 %v5680_v53  ;;  %4382 = vmatprep.subr.bf16.mxu0 %v5685_v49  ;;  %v7817_v53 = vrot.slane %v3180_v10, %v620_v58 }
 0xbf9   : > { %4455 = vmatprep.subr.bf16.mxu1 %v5688_v46 }
 0xbfb   : > { %4383 = vmatpush1.bf16.msra.mxu0 %v5683_v7 }
 0xbfc   : > { %4456 = vmatpush1.bf16.msra.mxu1 %v5686_v4  ;;  %4384 = vmatprep.subr.bf16.mxu0 %v5691_v17 }
 0xbfd   : > { %4457 = vmatprep.subr.bf16.mxu1 %v5694_v32 }
 0xbff   : > { %4385 = vmatpush2.bf16.msra.mxu0 %v5689_v33 }
 0xc00   : > { %4458 = vmatpush2.bf16.msra.mxu1 %v5692_v24  ;;  %4386 = vmatprep.subr.bf16.mxu0 %v5697_v6 }
 0xc01   : > { %4459 = vmatprep.subr.bf16.mxu1 %v5700_v27 }
 0xc03   : > { %4387 = vmatpush2.bf16.msra.mxu0 %v5695_v38 }
 0xc04   : > { %4460 = vmatpush2.bf16.msra.mxu1 %v5698_v52  ;;  %4388 = vmatprep.subr.bf16.mxu0 %v5703_v22 }
 0xc05   : > { %4461 = vmatprep.subr.bf16.mxu1 %v5706_v25 }
 0xc07   : > { %4389 = vmatpush2.bf16.msra.mxu0 %v5701_v26 }
 0xc08   : > { %4462 = vmatpush2.bf16.msra.mxu1 %v5704_v3  ;;  %4390 = vmatprep.subr.bf16.mxu0 %v5709_v54 }
 0xc09   : > { %4463 = vmatprep.subr.bf16.mxu1 %v5712_v18 }
 0xc0b   : > { %4391 = vmatpush2.bf16.msra.mxu0 %v5707_v15 }
 0xc0c   : > { %4464 = vmatpush2.bf16.msra.mxu1 %v5710_v30  ;;  %4392 = vmatprep.subr.bf16.mxu0 %v5715_v45 }
 0xc0d   : > { %4465 = vmatprep.subr.bf16.mxu1 %v5718_v51 }
 0xc0f   : > { %4393 = vmatpush2.bf16.msra.mxu0 %v5713_v44 }
 0xc10   : > { %4466 = vmatpush2.bf16.msra.mxu1 %v5716_v41  ;;  %4394 = vmatprep.subr.bf16.mxu0 %v5721_v13 }
 0xc11   : > { %4467 = vmatprep.subr.bf16.mxu1 %v5724_v48 }
 0xc13   : > { %4395 = vmatpush2.bf16.msra.mxu0 %v5719_v55 }
 0xc14   : > { %4468 = vmatpush2.bf16.msra.mxu1 %v5722_v20  ;;  %4396 = vmatprep.subr.bf16.mxu0 %v5727_v34 }
 0xc15   : > { %4469 = vmatprep.subr.bf16.mxu1 %v5730_v36 }
 0xc17   : > { %4397 = vmatpush2.bf16.msra.mxu0 %v5725_v37 }
 0xc18   : > { %4470 = vmatpush2.bf16.msra.mxu1 %v5728_v39  ;;  %4398 = vmatprep.subr.bf16.mxu0 %v5733_v2 }
 0xc19   : > { %4471 = vmatprep.subr.bf16.mxu1 %v5736_v43 }
 0xc1b   : > { %4399 = vmatpush2.bf16.msra.mxu0 %v5731_v1 }
 0xc1c   : > { %4472 = vmatpush2.bf16.msra.mxu1 %v5734_v50 }
 0xc9e   : > { %v3556_v47 = vpop.f32.mrf.mxu0  ;;  %v3629_v61 = vpop.f32.mrf.mxu1 }
 0xc9f   : > { %v3557_v49 = vadd.f32 %v3556_v47, %v7806_v35  ;;  %v3630_v46 = vadd.f32 %v3629_v61, %v7810_v8 }
 0xca0   : > { %v3558_v7 = vpop.f32.mrf.mxu0  ;;  %v3631_v4 = vpop.f32.mrf.mxu1 }
 0xca1   : > { %v3700_v17 = vmul.f32 0.044715, %v3557_v49  ;;  %v3702_v32 = vmul.f32 0.044715, %v3630_v46  ;;  %v7822_v42 = vadd.f32 %v3558_v7, %v7813_v23  ;;  %v7825_v33 = vadd.f32 %v3631_v4, %v7817_v53 }
 0xca2   : > { %v3560_v24 = vpop.f32.mrf.mxu0  ;;  %v3633_v6 = vpop.f32.mrf.mxu1  ;;  %v7834_v13 = vmul.f32 0.5, %v3557_v49  ;;  %v7839_v36 = vmul.f32 0.5, %v3630_v46 }
 0xca3   : > { %v3732_v27 = vmul.f32 %v3700_v17, %v3557_v49  ;;  %v3734_v57 = vmul.f32 %v3702_v32, %v3630_v46  ;;  %v3561_v58 = vadd.f32 %v3560_v24, %v7806_v35  ;;  %v3634_v38 = vadd.f32 %v3633_v6, %v7810_v8 }
 0xca4   : > { %v3562_v52 = vpop.f32.mrf.mxu0  ;;  %v3635_v22 = vpop.f32.mrf.mxu1  ;;  %v3701_v54 = vmul.f32 0.044715, %v7822_v42  ;;  %v3703_v51 = vmul.f32 0.044715, %v7825_v33  ;;  %v7842_v2 = vmul.f32 0.5, %v7822_v42 }
 0xca5   : > { %v3764_v25 = vmul.f32 %v3732_v27, %v3557_v49  ;;  %v3766_v26 = vmul.f32 %v3734_v57, %v3630_v46  ;;  %v3704_v3 = vmul.f32 0.044715, %v3561_v58  ;;  %v3706_v18 = vmul.f32 0.044715, %v3634_v38 }
 0xca6   : > { %v3566_v15 = vpop.f32.mrf.mxu0  ;;  %v3639_v30 = vpop.f32.mrf.mxu1  ;;  %v7832_v41 = vadd.f32 %v3562_v52, %v7813_v23  ;;  %v7837_v55 = vadd.f32 %v3635_v22, %v7817_v53  ;;  %8482 = vst [vmem:[#allocation20_spill] sm:$0xff] %v7842_v2  ;;  %v3733_v43 = vmul.f32 %v3701_v54, %v7822_v42  ;;  %v3735_v7 = vmul.f32 %v3703_v51, %v7825_v33 }
 0xca7   : > { %v3796_v45 = vadd.f32 %v3764_v25, %v3557_v49  ;;  %v3736_v44 = vmul.f32 %v3704_v3, %v3561_v58  ;;  %v3738_v48 = vmul.f32 %v3706_v18, %v3634_v38  ;;  %v3798_v37 = vadd.f32 %v3766_v26, %v3630_v46 }
 0xca8   : > { %v3568_v20 = vpop.f32.mrf.mxu0  ;;  %v3641_v34 = vpop.f32.mrf.mxu1  ;;  %v7846_v50 = vadd.f32 %v3566_v15, %v7806_v35  ;;  %v7849_v10 = vadd.f32 %v3639_v30, %v7810_v8  ;;  %v3705_v46 = vmul.f32 0.044715, %v7832_v41  ;;  %v7856_v17 = vmul.f32 0.5, %v3561_v58 }
 0xca9   : > { %v3768_v39 = vmul.f32 %v3736_v44, %v3561_v58  ;;  %v3770_v1 = vmul.f32 %v3738_v48, %v3634_v38  ;;  %v3828_v49 = vmul.f32 0.7978846, %v3796_v45  ;;  %v7854_v4 = vadd.f32 %v3568_v20, %v7813_v23 }
 0xcaa   : > { %v3570_v47 = vpop.f32.mrf.mxu0  ;;  %v3643_v61 = vpop.f32.mrf.mxu1  ;;  %v3707_v24 = vmul.f32 0.044715, %v7837_v55  ;;  %v7860_v57 = vmul.f32 0.5, %v7825_v33  ;;  %v3830_v52 = vmul.f32 0.7978846, %v3798_v37  ;;  %v7862_v22 = vmul.f32 0.5, %v3634_v38 }
 0xcab   : > { %v3800_v32 = vadd.f32 %v3768_v39, %v3561_v58  ;;  %v3802_v25 = vadd.f32 %v3770_v1, %v3634_v38  ;;  %v3708_v26 = vmul.f32 0.044715, %v7846_v50  ;;  %v7866_v3 = vmul.f32 %v3733_v43, %v7822_v42 }
 0xcac   : > { %v3572_v6 = vpop.f32.mrf.mxu0  ;;  %v3645_v27 = vpop.f32.mrf.mxu1  ;;  %8483 = vst [vmem:[#allocation21_spill] sm:$0xff] %v7860_v57  ;;  %8484 = vst [vmem:[#allocation22_spill] sm:$0xff] %v7862_v22  ;;  %v3710_v54 = vmul.f32 0.044715, %v7849_v10  ;;  %v3709_v58 = vmul.f32 0.044715, %v7854_v4  ;;  %v7871_v18 = vadd.f32 %v3641_v34, %v7817_v53  ;;  %5881 = vtanh.f32 %v3828_v49 }
 0xcad   : > { %v7874_v45 = vmul.f32 %v3735_v7, %v7825_v33  ;;  %v3737_v38 = vmul.f32 %v3705_v46, %v7832_v41  ;;  %v7878_v51 = vadd.f32 %v3570_v47, %v7806_v35  ;;  %v3832_v44 = vmul.f32 0.7978846, %v3800_v32 }
 0xcae   : > { %v3576_v15 = vpop.f32.mrf.mxu0  ;;  %v3649_v30 = vpop.f32.mrf.mxu1  ;;  %v3739_v48 = vmul.f32 %v3707_v24, %v7837_v55  ;;  %v3711_v20 = vmul.f32 0.044715, %v7871_v18  ;;  %v7883_v37 = vadd.f32 %v3643_v61, %v7810_v8  ;;  %5883 = vtanh.f32 %v3830_v52 }
 0xcaf   : > { %v3834_v43 = vmul.f32 0.7978846, %v3802_v25  ;;  %v3740_v1 = vmul.f32 %v3708_v26, %v7846_v50  ;;  %v7887_v49 = vadd.f32 %v3572_v6, %v7813_v23  ;;  %v3742_v47 = vmul.f32 %v3710_v54, %v7849_v10 }
 0xcb0   : > { %v3578_v34 = vpop.f32.mrf.mxu0  ;;  %v3651_v39 = vpop.f32.mrf.mxu1  ;;  %v3741_v7 = vmul.f32 %v3709_v58, %v7854_v4  ;;  %v7892_v46 = vadd.f32 %v3645_v27, %v7817_v53  ;;  %v7895_v32 = vadd.f32 %v3576_v15, %v7806_v35  ;;  %v7898_v52 = vmul.f32 %v3737_v38, %v7832_v41 }
 0xcb1   : > { %v3712_v25 = vmul.f32 0.044715, %v7878_v51  ;;  %v7902_v6 = vadd.f32 %v3649_v30, %v7810_v8  ;;  %v7905_v26 = vadd.f32 %v3578_v34, %v7813_v23  ;;  %5885 = vtanh.f32 %v3832_v44 }
 0xcb2   : > { %8485 = vst [vmem:[#allocation23_spill] sm:$0xff] %v7895_v32  ;;  %v3580_v61 = vpop.f32.mrf.mxu0  ;;  %v3653_v24 = vpop.f32.mrf.mxu1  ;;  %v7908_v27 = vmul.f32 %v3739_v48, %v7837_v55  ;;  %v3743_v54 = vmul.f32 %v3711_v20, %v7871_v18  ;;  %v3714_v58 = vmul.f32 0.044715, %v7883_v37  ;;  %5887 = vtanh.f32 %v3834_v43 }
 0xcb3   : > { %8486 = vst [vmem:[#allocation24_spill] sm:$0xff] %v7902_v6  ;;  %v7913_v38 = vmul.f32 %v3740_v1, %v7846_v50  ;;  %v3713_v30 = vmul.f32 0.044715, %v7887_v49  ;;  %v3715_v9 = vmul.f32 0.044715, %v7892_v46  ;;  %v7918_v34 = vmul.f32 %v3742_v47, %v7849_v10 }
 0xcb4   : > { %v3582_v15 = vpop.f32.mrf.mxu0  ;;  %v3655_v19 = vpop.f32.mrf.mxu1  ;;  %v7921_v44 = vmul.f32 %v3741_v7, %v7854_v4  ;;  %v3716_v48 = vmul.f32 0.044715, %v7895_v32  ;;  %v7925_v20 = vadd.f32 %v3651_v39, %v7817_v53  ;;  %v3744_v1 = vmul.f32 %v3712_v25, %v7878_v51 }
 0xcb5   : > { %v3718_v12 = vmul.f32 0.044715, %v7902_v6  ;;  %v3717_v5 = vmul.f32 0.044715, %v7905_v26  ;;  %v7931_v56 = vadd.f32 %v3580_v61, %v7806_v35  ;;  %v7934_v47 = vmul.f32 %v3743_v54, %v7871_v18 }
 0xcb6   : > { %v3586_v14 = vpop.f32.mrf.mxu0  ;;  %v3659_v43 = vpop.f32.mrf.mxu1  ;;  %v3746_v7 = vmul.f32 %v3714_v58, %v7883_v37  ;;  %v3719_v28 = vmul.f32 0.044715, %v7925_v20  ;;  %v7939_v39 = vadd.f32 %v3653_v24, %v7810_v8  ;;  %v3745_v25 = vmul.f32 %v3713_v30, %v7887_v49 }
 0xcb7   : > { %8487 = vst [vmem:[#allocation25_spill] sm:$0xff] %v7931_v56  ;;  %v3747_v40 = vmul.f32 %v3715_v9, %v7892_v46  ;;  %v3720_v11 = vmul.f32 0.044715, %v7931_v56  ;;  %v7945_v61 = vadd.f32 %v3582_v15, %v7813_v23  ;;  %v3748_v54 = vmul.f32 %v3716_v48, %v7895_v32 }
 0xcb8   : > { %8488 = vst [vmem:[#allocation26_spill] sm:$0xff] %v7939_v39  ;;  %v3588_v31 = vpop.f32.mrf.mxu0  ;;  %v3661_v16 = vpop.f32.mrf.mxu1  ;;  %v3722_v58 = vmul.f32 0.044715, %v7939_v39  ;;  %v7950_v0 = vadd.f32 %v3655_v19, %v7817_v53  ;;  %v7953_v24 = vadd.f32 %v3586_v14, %v7806_v35  ;;  %v7956_v30 = vmul.f32 %v3744_v1, %v7878_v51 }
 0xcb9   : > { %v3750_v9 = vmul.f32 %v3718_v12, %v7902_v6  ;;  %v3749_v63 = vmul.f32 %v3717_v5, %v7905_v26  ;;  %v3751_v15 = vmul.f32 %v3719_v28, %v7925_v20  ;;  %v5882_v48 = vpop.eup %5881  ;;  %v7962_v29 = vmul.f32 %v3746_v7, %v7883_v37 }
 0xcba   : > { %v3590_v62 = vpop.f32.mrf.mxu0  ;;  %v3663_v21 = vpop.f32.mrf.mxu1  ;;  %v3721_v19 = vmul.f32 0.044715, %v7945_v61  ;;  %v7966_v14 = vadd.f32 %v3659_v43, %v7810_v8  ;;  %v7969_v60 = vadd.f32 %v3588_v31, %v7813_v23  ;;  %v7972_v1 = vmul.f32 %v3745_v25, %v7887_v49 }
 0xcbb   : > { %v3752_v5 = vmul.f32 %v3720_v11, %v7931_v56  ;;  %v3723_v28 = vmul.f32 0.044715, %v7950_v0  ;;  %v3724_v12 = vmul.f32 0.044715, %v7953_v24  ;;  %v7977_v59 = vpop.eup %5883  ;;  %v7980_v7 = vmul.f32 %v3747_v40, %v7892_v46 }
 0xcbc   : > { %v7983_v43 = vmul.f32 %v3748_v54, %v7895_v32  ;;  %v3754_v31 = vmul.f32 %v3722_v58, %v7939_v39  ;;  %v7987_v57 = vadd.f32 %v3661_v16, %v7817_v53  ;;  %v3592_v25 = vpop.f32.mrf.mxu0  ;;  %v7990_v11 = vmul.f32 %v3750_v9, %v7902_v6  ;;  %v3665_v54 = vpop.f32.mrf.mxu1 }
 0xcbd   : > { %v7993_v2 = vmul.f32 %v3749_v63, %v7905_v26  ;;  %v7996_v22 = vmul.f32 %v3751_v15, %v7925_v20  ;;  %v7999_v40 = vadd.f32 %v3590_v62, %v7806_v35  ;;  %v3726_v58 = vmul.f32 0.044715, %v7966_v14 }
 0xcbe   : > { %8489 = vst [vmem:[#allocation27_spill] sm:$0xff] %v7983_v43  ;;  %8490 = vst [vmem:[#allocation28_spill] sm:$0xff] %v7990_v11  ;;  %v3753_v43 = vmul.f32 %v3721_v19, %v7945_v61  ;;  %v3725_v16 = vmul.f32 0.044715, %v7969_v60  ;;  %v8005_v32 = vadd.f32 %v3663_v21, %v7810_v8  ;;  %v5886_v9 = vpop.eup %5885  ;;  %v8008_v63 = vmul.f32 %v3752_v5, %v7931_v56 }
 0xcbf   : > { %v3755_v15 = vmul.f32 %v3723_v28, %v7950_v0  ;;  %v3756_v11 = vmul.f32 %v3724_v12, %v7953_v24  ;;  %v8013_v62 = vadd.f32 %v3592_v25, %v7813_v23  ;;  %v5888_v35 = vpop.eup %5887  ;;  %v8016_v19 = vmul.f32 %v3754_v31, %v7939_v39 }
 0xcc0   : > { %8491 = vst [vmem:[#allocation29_spill] sm:$0xff] %v8008_v63  ;;  %v3727_v6 = vmul.f32 0.044715, %v7987_v57  ;;  %v3728_v21 = vmul.f32 0.044715, %v7999_v40  ;;  %v8021_v8 = vadd.f32 %v3665_v54, %v7817_v53  ;;  %v3797_v12 = vadd.f32 %v7866_v3, %v7822_v42 }
 0xcc1   : > { %8492 = vst [vmem:[#allocation30_spill] sm:$0xff] %v8016_v19  ;;  %v3730_v5 = vmul.f32 0.044715, %v8005_v32  ;;  %v3729_v28 = vmul.f32 0.044715, %v8013_v62  ;;  %v3801_v23 = vadd.f32 %v7898_v52, %v7832_v41  ;;  %v8030_v31 = vmul.f32 %v3753_v43, %v7945_v61 }
 0xcc2   : > { %v3758_v25 = vmul.f32 %v3726_v58, %v7966_v14  ;;  %v3757_v19 = vmul.f32 %v3725_v16, %v7969_v60  ;;  %v3731_v53 = vmul.f32 0.044715, %v8021_v8  ;;  %v8036_v54 = vmul.f32 %v3755_v15, %v7950_v0 }
 0xcc3   : > { %v8039_v39 = vmul.f32 %v3756_v11, %v7953_v24  ;;  %v3829_v63 = vmul.f32 0.7978846, %v3797_v12  ;;  %v3833_v42 = vmul.f32 0.7978846, %v3801_v23  ;;  %v3759_v3 = vmul.f32 %v3727_v6, %v7987_v57 }
 0xcc4   : > { %v3760_v52 = vmul.f32 %v3728_v21, %v7999_v40  ;;  %v3799_v43 = vadd.f32 %v7874_v45, %v7825_v33  ;;  %v3803_v58 = vadd.f32 %v7908_v27, %v7837_v55  ;;  %v3762_v16 = vmul.f32 %v3730_v5, %v8005_v32 }
 0xcc5   : > { %v3761_v15 = vmul.f32 %v3729_v28, %v8013_v62  ;;  %v3763_v56 = vmul.f32 %v3731_v53, %v8021_v8  ;;  %5889 = vtanh.f32 %v3829_v63  ;;  %v3892_v23 = vadd.f32 1.0, %v5882_v48 }
 0xcc6   : > { %5891 = vtanh.f32 %v3833_v42  ;;  %v3831_v11 = vmul.f32 0.7978846, %v3799_v43  ;;  %v3835_v12 = vmul.f32 0.7978846, %v3803_v58  ;;  %v8051_v6 = vmul.f32 %v3758_v25, %v7966_v14 }
 0xcc7   : > { %v8054_v21 = vmul.f32 %v3757_v19, %v7969_v60  ;;  %v3673_v33 = vmul.f32 0.5, %v7832_v41  ;;  %v3896_v45 = vadd.f32 1.0, %v5886_v9  ;;  %v8058_v27 = vmul.f32 %v3759_v3, %v7987_v57 }
 0xcc8   : > { %v8061_v5 = vmul.f32 0.5, %v7837_v55  ;;  %5893 = vtanh.f32 %v3831_v11  ;;  %v3805_v63 = vadd.f32 %v7921_v44, %v7854_v4  ;;  %v8066_v48 = vmul.f32 %v3760_v52, %v7999_v40 }
 0xcc9   : > { %v8069_v28 = vmul.f32 %v3762_v16, %v8005_v32  ;;  %v8072_v19 = vmul.f32 %v3761_v15, %v8013_v62  ;;  %5895 = vtanh.f32 %v3835_v12  ;;  %v8075_v41 = vmul.f32 %v3763_v56, %v8021_v8  ;;  %v8493_v15 = vld [vmem:[#allocation22_spill] sm:$0xff] }
 0xcca   : > { %v8078_v55 = vmul.f32 %v3892_v23, %v7834_v13  ;;  %v3809_v9 = vadd.f32 %v7972_v1, %v7887_v49  ;;  %v3837_v44 = vmul.f32 0.7978846, %v3805_v63  ;;  %v8083_v25 = vmul.f32 %v3896_v45, %v7856_v17 }
 0xccb   : > { %v3894_v53 = vadd.f32 1.0, %v7977_v59  ;;  %v3807_v42 = vadd.f32 %v7934_v47, %v7871_v18  ;;  %v3811_v3 = vadd.f32 %v7980_v7, %v7892_v46  ;;  %v3898_v56 = vadd.f32 1.0, %v5888_v35 }
 0xccc   : > { %v3841_v52 = vmul.f32 0.7978846, %v3809_v9  ;;  %5897 = vtanh.f32 %v3837_v44  ;;  %v3804_v13 = vadd.f32 %v7913_v38, %v7846_v50  ;;  %v8093_v1 = vmul.f32 0.5, %v7854_v4 }
 0xccd   : > { %v3839_v43 = vmul.f32 0.7978846, %v3807_v42  ;;  %v3843_v17 = vmul.f32 0.7978846, %v3811_v3  ;;  %v3808_v59 = vadd.f32 %v7956_v30, %v7878_v51  ;;  %v8098_v58 = vmul.f32 0.5, %v7887_v49 }
 0xcce   : > { %5899 = vtanh.f32 %v3841_v52  ;;  %v3836_v47 = vmul.f32 0.7978846, %v3804_v13  ;;  %v3806_v7 = vadd.f32 %v7918_v34, %v7849_v10  ;;  %v3956_v35 = vpack.c.bf16 %v8083_v25, %v8078_v55 }
 0xccf   : > { %5901 = vtanh.f32 %v3839_v43  ;;  %v3840_v38 = vmul.f32 0.7978846, %v3808_v59  ;;  %v3810_v4 = vadd.f32 %v7962_v29, %v7883_v37  ;;  %v8107_v16 = vmul.f32 %v3894_v53, %v7839_v36  ;;  %v8495_v43 = vld [vmem:[#allocation23_spill] sm:$0xff] }
 0xcd0   : > { %5903 = vtanh.f32 %v3843_v17  ;;  %v3838_v30 = vmul.f32 0.7978846, %v3806_v7  ;;  %v3813_v49 = vadd.f32 %v7993_v2, %v7905_v26  ;;  %v8112_v11 = vmul.f32 %v3898_v56, %v8493_v15  ;;  %v8496_v17 = vld [vmem:[#allocation27_spill] sm:$0xff]  ;;  %v8498_v7 = vld [vmem:[#allocation29_spill] sm:$0xff] }
 0xcd1   : > { %5905 = vtanh.f32 %v3836_v47  ;;  %v3842_v34 = vmul.f32 0.7978846, %v3810_v4  ;;  %v3817_v12 = vadd.f32 %v8030_v31, %v7945_v61  ;;  %v8117_v45 = vmul.f32 0.5, %v7871_v18  ;;  %v8494_v18 = vld [vmem:[#allocation20_spill] sm:$0xff]  ;;  %v8497_v47 = vld [vmem:[#allocation25_spill] sm:$0xff] }
 0xcd2   : > { %v5890_v23 = vpop.eup %5889  ;;  %5907 = vtanh.f32 %v3840_v38  ;;  %v3845_v29 = vmul.f32 0.7978846, %v3813_v49  ;;  %v3815_v36 = vadd.f32 %v7996_v22, %v7925_v20  ;;  %v3819_v9 = vadd.f32 %v8036_v54, %v7950_v0  ;;  %v8499_v15 = vld [vmem:[#allocation21_spill] sm:$0xff] }
 0xcd3   : > { %v5892_v63 = vpop.eup %5891  ;;  %v3893_v55 = vadd.f32 1.0, %v5890_v23  ;;  %5909 = vtanh.f32 %v3838_v30  ;;  %v3849_v2 = vmul.f32 0.7978846, %v3817_v12  ;;  %v3683_v25 = vmul.f32 0.5, %v7892_v46  ;;  %v8500_v12 = vld [vmem:[#allocation24_spill] sm:$0xff] }
 0xcd4   : > { %v3897_v44 = vadd.f32 1.0, %v5892_v63  ;;  %5911 = vtanh.f32 %v3842_v34  ;;  %v3847_v31 = vmul.f32 0.7978846, %v3815_v36  ;;  %v3958_v3 = vpack.c.bf16 %v8112_v11, %v8107_v16  ;;  %v8501_v23 = vld [vmem:[#allocation28_spill] sm:$0xff]  ;;  %v8502_v63 = vld [vmem:[#allocation26_spill] sm:$0xff] }
 0xcd5   : > { %v5894_v53 = vpop.eup %5893  ;;  %v3925_v42 = vmul.f32 %v3893_v55, %v8494_v18  ;;  %5913 = vtanh.f32 %v3845_v29  ;;  %v3851_v22 = vmul.f32 0.7978846, %v3819_v9  ;;  %v3812_v54 = vadd.f32 %v8496_v17, %v8495_v43  ;;  %v8503_v55 = vld [vmem:[#allocation30_spill] sm:$0xff] }
 0xcd6   : > { %v5896_v56 = vpop.eup %5895  ;;  %v3929_v52 = vmul.f32 %v3897_v44, %v3673_v33  ;;  %v3895_v13 = vadd.f32 1.0, %v5894_v53  ;;  %5915 = vtanh.f32 %v3849_v2  ;;  %v3676_v46 = vmul.f32 0.5, %v7846_v50 }
 0xcd7   : > { %v3899_v59 = vadd.f32 1.0, %v5896_v56  ;;  %5917 = vtanh.f32 %v3847_v31  ;;  %v3816_v38 = vadd.f32 %v8498_v7, %v8497_v47  ;;  %v3680_v30 = vmul.f32 0.5, %v7878_v51 }
 0xcd8   : > { %v3957_v4 = vpack.c.bf16 %v3929_v52, %v3925_v42  ;;  %5919 = vtanh.f32 %v3851_v22  ;;  %v3844_v16 = vmul.f32 0.7978846, %v3812_v54  ;;  %v3927_v33 = vmul.f32 %v3895_v13, %v8499_v15 }
 0xcd9   : > { %v5898_v49 = vpop.eup %5897  ;;  %v3931_v11 = vmul.f32 %v3899_v59, %v8061_v5  ;;  %v3848_v34 = vmul.f32 0.7978846, %v3816_v38  ;;  %v3814_v29 = vadd.f32 %v8501_v23, %v8500_v12  ;;  %v3678_v36 = vmul.f32 0.5, %v7849_v10 }
 0xcda   : > { %4400 = vmatprep.mubr.bf16.mxu0 %v3957_v4  ;;  %v3901_v50 = vadd.f32 1.0, %v5898_v49  ;;  %5921 = vtanh.f32 %v3844_v16  ;;  %v3818_v2 = vadd.f32 %v8503_v55, %v8502_v63  ;;  %v3682_v44 = vmul.f32 0.5, %v7883_v37 }
 0xcdb   : > { %v5900_v51 = vpop.eup %5899  ;;  %v3959_v9 = vpack.c.bf16 %v3931_v11, %v3927_v33  ;;  %4401 = vmatmul.mubr.bf16.vlgmr.msra.gmra.mxu0 %v3956_v35  ;;  %5923 = vtanh.f32 %v3848_v34  ;;  %v3846_v31 = vmul.f32 0.7978846, %v3814_v29  ;;  %v3685_v18 = vmul.f32 0.5, %v7905_v26 }
 0xcdc   : > { %v5902_v5 = vpop.eup %5901  ;;  %v3905_v53 = vadd.f32 1.0, %v5900_v51  ;;  %v3850_v42 = vmul.f32 0.7978846, %v3818_v2  ;;  %v3821_v22 = vadd.f32 %v8054_v21, %v7969_v60  ;;  %v3933_v56 = vmul.f32 %v3901_v50, %v8093_v1 }
 0xcdd   : > { %v5904_v10 = vpop.eup %5903  ;;  %4473 = vmatprep.mubr.bf16.mxu1 %v3959_v9  ;;  %v3903_v52 = vadd.f32 1.0, %v5902_v5  ;;  %5925 = vtanh.f32 %v3846_v31  ;;  %v3825_v35 = vadd.f32 %v8072_v19, %v8013_v62  ;;  %v3689_v7 = vmul.f32 0.5, %v7945_v61 }
 0xcde   : > { %v5906_v37 = vpop.eup %5905  ;;  %4474 = vmatmul.mubr.bf16.vlgmr.msra.gmra.mxu1 %v3958_v3  ;;  %v3937_v13 = vmul.f32 %v3905_v53, %v8098_v58  ;;  %v3907_v17 = vadd.f32 1.0, %v5904_v10  ;;  %5927 = vtanh.f32 %v3850_v42  ;;  %v3853_v26 = vmul.f32 0.7978846, %v3821_v22 }
 0xcdf   : > { %v5908_v54 = vpop.eup %5907  ;;  %v3935_v59 = vmul.f32 %v3903_v52, %v8117_v45  ;;  %v3900_v21 = vadd.f32 1.0, %v5906_v37  ;;  %v3857_v38 = vmul.f32 0.7978846, %v3825_v35  ;;  %v3823_v58 = vadd.f32 %v8058_v27, %v7987_v57 }
 0xce0   : > { %v5910_v1 = vpop.eup %5909  ;;  %v3961_v4 = vpack.c.bf16 %v3937_v13, %v3933_v56  ;;  %v3939_v16 = vmul.f32 %v3907_v17, %v3683_v25  ;;  %v3904_v49 = vadd.f32 1.0, %v5908_v54  ;;  %5929 = vtanh.f32 %v3853_v26 }
 0xce1   : > { %v5912_v19 = vpop.eup %5911  ;;  %v3932_v15 = vmul.f32 %v3900_v21, %v3676_v46  ;;  %v3902_v3 = vadd.f32 1.0, %v5910_v1  ;;  %5931 = vtanh.f32 %v3857_v38  ;;  %v3827_v61 = vadd.f32 %v8075_v41, %v8021_v8 }
 0xce2   : > { %v5914_v33 = vpop.eup %5913  ;;  %4410 = vmatprep.mubr.bf16.mxu0 %v3961_v4  ;;  %v3963_v11 = vpack.c.bf16 %v3939_v16, %v3935_v59  ;;  %v3936_v45 = vmul.f32 %v3904_v49, %v3680_v30  ;;  %v3906_v34 = vadd.f32 1.0, %v5912_v19  ;;  %v3687_v50 = vmul.f32 0.5, %v7925_v20 }
 0xce3   : > { %v5916_v23 = vpop.eup %5915  ;;  %v3934_v29 = vmul.f32 %v3902_v3, %v3678_v36  ;;  %v3909_v25 = vadd.f32 1.0, %v5914_v33  ;;  %v3855_v55 = vmul.f32 0.7978846, %v3823_v58  ;;  %v3859_v27 = vmul.f32 0.7978846, %v3827_v61 }
 0xce4   : > { %v5918_v46 = vpop.eup %5917  ;;  %4483 = vmatprep.mubr.bf16.mxu1 %v3963_v11  ;;  %v3960_v2 = vpack.c.bf16 %v3936_v45, %v3932_v15  ;;  %v3938_v51 = vmul.f32 %v3906_v34, %v3682_v44  ;;  %v3913_v9 = vadd.f32 1.0, %v5916_v23  ;;  %v3691_v30 = vmul.f32 0.5, %v7950_v0 }
 0xce5   : > { %v5920_v31 = vpop.eup %5919  ;;  %v3941_v5 = vmul.f32 %v3909_v25, %v3685_v18  ;;  %v3911_v53 = vadd.f32 1.0, %v5918_v46  ;;  %5933 = vtanh.f32 %v3855_v55  ;;  %v3684_v20 = vmul.f32 0.5, %v8495_v43 }
 0xce6   : > { %4411 = vmatmul.mubr.bf16.gmra.mxu0 %v3960_v2  ;;  %v3962_v41 = vpack.c.bf16 %v3938_v51, %v3934_v29  ;;  %v3945_v42 = vmul.f32 %v3913_v9, %v3689_v7  ;;  %v3915_v36 = vadd.f32 1.0, %v5920_v31  ;;  %5935 = vtanh.f32 %v3859_v27 }
 0xce7   : > { %v5922_v22 = vpop.eup %5921  ;;  %v3688_v10 = vmul.f32 0.5, %v8497_v47  ;;  %v3820_v44 = vadd.f32 %v8039_v39, %v7953_v24  ;;  %v3824_v18 = vadd.f32 %v8066_v48, %v7999_v40  ;;  %v3943_v52 = vmul.f32 %v3911_v53, %v3687_v50 }
 0xce8   : > { %v5924_v56 = vpop.eup %5923  ;;  %4484 = vmatmul.mubr.bf16.gmra.mxu1 %v3962_v41  ;;  %v3965_v0 = vpack.c.bf16 %v3945_v42, %v3941_v5  ;;  %v3947_v35 = vmul.f32 %v3915_v36, %v3691_v30  ;;  %v3908_v37 = vadd.f32 1.0, %v5922_v22  ;;  %v3822_v43 = vadd.f32 %v8051_v6, %v7966_v14 }
 0xce9   : > { %v3912_v13 = vadd.f32 1.0, %v5924_v56  ;;  %v3852_v17 = vmul.f32 0.7978846, %v3820_v44  ;;  %v3856_v26 = vmul.f32 0.7978846, %v3824_v18  ;;  %v3686_v39 = vmul.f32 0.5, %v8500_v12 }
 0xcea   : > { %v5926_v54 = vpop.eup %5925  ;;  %4420 = vmatprep.mubr.bf16.mxu0 %v3965_v0  ;;  %v3967_v47 = vpack.c.bf16 %v3947_v35, %v3943_v52  ;;  %v3940_v59 = vmul.f32 %v3908_v37, %v3684_v20  ;;  %v3826_v48 = vadd.f32 %v8069_v28, %v8005_v32  ;;  %v3854_v1 = vmul.f32 0.7978846, %v3822_v43 }
 0xceb   : > { %v5928_v21 = vpop.eup %5927  ;;  %v3944_v7 = vmul.f32 %v3912_v13, %v3688_v10  ;;  %v3910_v38 = vadd.f32 1.0, %v5926_v54  ;;  %5937 = vtanh.f32 %v3852_v17  ;;  %v3690_v4 = vmul.f32 0.5, %v8502_v63 }
 0xcec   : > { %4493 = vmatprep.mubr.bf16.mxu1 %v3967_v47  ;;  %v3914_v16 = vadd.f32 1.0, %v5928_v21  ;;  %5939 = vtanh.f32 %v3856_v26  ;;  %v3858_v6 = vmul.f32 0.7978846, %v3826_v48  ;;  %v3693_v28 = vmul.f32 0.5, %v7969_v60 }
 0xced   : > { %v5930_v49 = vpop.eup %5929  ;;  %v3964_v19 = vpack.c.bf16 %v3944_v7, %v3940_v59  ;;  %5941 = vtanh.f32 %v3854_v1  ;;  %v3942_v3 = vmul.f32 %v3910_v38, %v3686_v39  ;;  %v3697_v33 = vmul.f32 0.5, %v8013_v62  ;;  %v8506_v7 = vld [vmem:[#allocation5_spill] sm:$0xff]  ;;  %v8507_v1 = vld [vmem:[#allocation4_spill] sm:$0xff] }
 0xcee   : > { %v5932_v15 = vpop.eup %5931  ;;  %v3946_v12 = vmul.f32 %v3914_v16, %v3690_v4  ;;  %v3917_v58 = vadd.f32 1.0, %v5930_v49  ;;  %5943 = vtanh.f32 %v3858_v6  ;;  %v3695_v50 = vmul.f32 0.5, %v7987_v57 }
 0xcef   : > { %4421 = vmatmul.mubr.bf16.gmra.mxu0 %v3964_v19  ;;  %v3921_v11 = vadd.f32 1.0, %v5932_v15  ;;  %v3699_v55 = vmul.f32 0.5, %v8021_v8  ;;  %v3692_v5 = vmul.f32 0.5, %v7953_v24  ;;  %v3696_v30 = vmul.f32 0.5, %v7999_v40  ;;  %v4036_v24 = vld [vmem:[%s8432_s11] sm:$0x3] }
 0xcf0   : > { %v3966_v45 = vpack.c.bf16 %v3946_v12, %v3942_v3  ;;  %v3949_v34 = vmul.f32 %v3917_v58, %v3693_v28  ;;  %v3694_v57 = vmul.f32 0.5, %v7966_v14  ;;  %v3698_v22 = vmul.f32 0.5, %v8005_v32  ;;  %v8504_v40 = vld [vmem:[#allocation2_spill] sm:$0xff]  ;;  %v8505_v14 = vld [vmem:[#allocation3_spill] sm:$0xff] }
 0xcf1   : > { %v3953_v63 = vmul.f32 %v3921_v11, %v3697_v33  ;;  %v8180_v0 = vrot.slane %v4036_v24, %v8504_v40  ;;  %v8183_v52 = vrot.slane %v4036_v24, %v8505_v14  ;;  %v8508_v3 = vld [vmem:[#allocation7_spill] sm:$0xff]  ;;  %v8509_v58 = vld [vmem:[#allocation6_spill] sm:$0xff] }
 0xcf2   : > { %v5934_v61 = vpop.eup %5933  ;;  %4494 = vmatmul.mubr.bf16.gmra.mxu1 %v3966_v45 }
 0xcf3   : > { %v5936_v23 = vpop.eup %5935  ;;  %v3969_v29 = vpack.c.bf16 %v3953_v63, %v3949_v34  ;;  %v3919_v25 = vadd.f32 1.0, %v5934_v61 }
 0xcf4   : > { %v3923_v46 = vadd.f32 1.0, %v5936_v23 }
 0xcf5   : > { %4430 = vmatprep.mubr.bf16.mxu0 %v3969_v29  ;;  %v3951_v2 = vmul.f32 %v3919_v25, %v3695_v50 }
 0xcf6   : > { %v3955_v51 = vmul.f32 %v3923_v46, %v3699_v55 }
 0xcf8   : > { %v5938_v60 = vpop.eup %5937  ;;  %v3971_v9 = vpack.c.bf16 %v3955_v51, %v3951_v2  ;;  %v8510_v2 = vld [vmem:[#allocation9_spill] sm:$0xff] }
 0xcf9   : > { %v5940_v62 = vpop.eup %5939  ;;  %v3916_v27 = vadd.f32 1.0, %v5938_v60  ;;  %v8511_v60 = vld [vmem:[#allocation8_spill] sm:$0xff] }
 0xcfa   : > { %v5942_v31 = vpop.eup %5941  ;;  %4503 = vmatprep.mubr.bf16.mxu1 %v3971_v9  ;;  %v3920_v53 = vadd.f32 1.0, %v5940_v62 }
 0xcfb   : > { %v5944_v41 = vpop.eup %5943  ;;  %v3918_v42 = vadd.f32 1.0, %v5942_v31  ;;  %v3948_v8 = vmul.f32 %v3916_v27, %v3692_v5 }
 0xcfc   : > { %v3952_v36 = vmul.f32 %v3920_v53, %v3696_v30  ;;  %v3922_v20 = vadd.f32 1.0, %v5944_v41 }
 0xcfd   : > { %v3950_v44 = vmul.f32 %v3918_v42, %v3694_v57  ;;  %v8512_v57 = vld [vmem:[#allocation11_spill] sm:$0xff] }
 0xcfe   : > { %v3968_v10 = vpack.c.bf16 %v3952_v36, %v3948_v8  ;;  %v3954_v18 = vmul.f32 %v3922_v20, %v3698_v22  ;;  %v8513_v8 = vld [vmem:[#allocation10_spill] sm:$0xff] }
 0xd00   : > { %4431 = vmatmul.mubr.bf16.gmra.mxu0 %v3968_v10  ;;  %v3970_v56 = vpack.c.bf16 %v3954_v18, %v3950_v44 }
 0xd02   : > { %4504 = vmatmul.mubr.bf16.gmra.mxu1 %v3970_v56 }
 0xd9b   : > { %v4402_v35 = vpop.f32.mrf.mxu0 }
 0xd9c   : > { %v4403_v32 = vadd.f32 %v4402_v35, %v8180_v0 }
 0xd9d   : > { %v4404_v37 = vpop.f32.mrf.mxu0 }
 0xd9e   : > { %v4475_v13 = vpop.f32.mrf.mxu1  ;;  %v4405_v17 = vadd.f32 %v4404_v37, %v8183_v52 }
 0xd9f   : > { %v4476_v26 = vadd.f32 %v4475_v13, %v4403_v32  ;;  %v4406_v43 = vpop.f32.mrf.mxu0 }
 0xda0   : > { %v4477_v54 = vpop.f32.mrf.mxu1  ;;  %v4407_v47 = vadd.f32 %v4406_v43, %v8180_v0 }
 0xda1   : > { %v4478_v59 = vadd.f32 %v4477_v54, %v4405_v17  ;;  %v4408_v39 = vpop.f32.mrf.mxu0  ;;  %v8190_v38 = vadd.f32 %v4476_v26, %v8506_v7  ;;  %v8514_v26 = vld [vmem:[#allocation13_spill] sm:$0xff]  ;;  %v8515_v54 = vld [vmem:[#allocation12_spill] sm:$0xff]  ;;  %v8516_v7 = vld [vmem:[#allocation15_spill] sm:$0xff] }
 0xda2   : > { %v4479_v48 = vpop.f32.mrf.mxu1  ;;  %v4409_v21 = vadd.f32 %v4408_v39, %v8183_v52 }
 0xda3   : > { %v8193_v4 = vadd.f32 %v4478_v59, %v8507_v1  ;;  %v4480_v16 = vadd.f32 %v4479_v48, %v4407_v47 }
 0xda4   : > { %v4481_v6 = vpop.f32.mrf.mxu1 }
 0xda5   : > { %v4482_v49 = vadd.f32 %v4481_v6, %v4409_v21  ;;  %v4532_v19 = vadd.f32 %v8193_v4, %v8190_v38  ;;  %v8198_v12 = vadd.f32 %v4480_v16, %v8508_v3  ;;  %v8517_v16 = vld [vmem:[#allocation14_spill] sm:$0xff] }
 0xda6   : > { %v4412_v15 = vpop.f32.mrf.mxu0 }
 0xda7   : > { %v8201_v28 = vadd.f32 %v4482_v49, %v8509_v58  ;;  %v4413_v33 = vadd.f32 %v4412_v15, %v8180_v0  ;;  %4533 = vadd.xlane.f32.xlu0 %v4532_v19 }
 0xda8   : > { %v4485_v11 = vpop.f32.mrf.mxu1  ;;  %v4414_v45 = vpop.f32.mrf.mxu0 }
 0xda9   : > { %v4486_v34 = vadd.f32 %v4485_v11, %v4413_v33  ;;  %v4415_v63 = vadd.f32 %v4414_v45, %v8183_v52  ;;  %v4535_v61 = vadd.f32 %v8201_v28, %v8198_v12 }
 0xdaa   : > { %v4487_v23 = vpop.f32.mrf.mxu1  ;;  %v4416_v29 = vpop.f32.mrf.mxu0 }
 0xdab   : > { %v4488_v25 = vadd.f32 %v4487_v23, %v4415_v63  ;;  %v4417_v50 = vadd.f32 %v4416_v29, %v8180_v0  ;;  %4536 = vadd.xlane.f32.xlu1 %v4535_v61  ;;  %v8209_v51 = vadd.f32 %v4486_v34, %v8510_v2 }
 0xdac   : > { %v4489_v55 = vpop.f32.mrf.mxu1  ;;  %v4418_v46 = vpop.f32.mrf.mxu0 }
 0xdad   : > { %v8212_v9 = vadd.f32 %v4488_v25, %v8511_v60  ;;  %v4490_v62 = vadd.f32 %v4489_v55, %v4417_v50  ;;  %v4419_v27 = vadd.f32 %v4418_v46, %v8183_v52  ;;  %v8518_v25 = vld [vmem:[#allocation18_spill] sm:$0xff]  ;;  %v8519_v55 = vld [vmem:[#allocation16_spill] sm:$0xff] }
 0xdae   : > { %v4491_v31 = vpop.f32.mrf.mxu1 }
 0xdaf   : > { %v4492_v5 = vadd.f32 %v4491_v31, %v4419_v27  ;;  %v4422_v30 = vpop.f32.mrf.mxu0  ;;  %v4538_v53 = vadd.f32 %v8212_v9, %v8209_v51  ;;  %v8219_v42 = vadd.f32 %v4490_v62, %v8512_v57 }
 0xdb0   : > { %v4423_v41 = vadd.f32 %v4422_v30, %v8180_v0 }
 0xdb1   : > { %v8222_v36 = vadd.f32 %v4492_v5, %v8513_v8  ;;  %v4424_v22 = vpop.f32.mrf.mxu0  ;;  %4539 = vadd.xlane.f32.xlu0 %v4538_v53  ;;  %v8520_v5 = vld [vmem:[#allocation19_spill] sm:$0xff]  ;;  %v8521_v53 = vld [vmem:[#allocation17_spill] sm:$0xff] }
 0xdb2   : > { %v4495_v20 = vpop.f32.mrf.mxu1  ;;  %v4425_v10 = vadd.f32 %v4424_v22, %v8183_v52 }
 0xdb3   : > { %v4496_v44 = vadd.f32 %v4495_v20, %v4423_v41  ;;  %v4426_v18 = vpop.f32.mrf.mxu0  ;;  %v4541_v56 = vadd.f32 %v8222_v36, %v8219_v42 }
 0xdb4   : > { %v4497_v24 = vpop.f32.mrf.mxu1  ;;  %v4427_v35 = vadd.f32 %v4426_v18, %v8180_v0 }
 0xdb5   : > { %v4498_v32 = vadd.f32 %v4497_v24, %v4425_v10  ;;  %v4428_v37 = vpop.f32.mrf.mxu0  ;;  %4542 = vadd.xlane.f32.xlu1 %v4541_v56  ;;  %v8230_v43 = vadd.f32 %v4496_v44, %v8514_v26 }
 0xdb6   : > { %v4499_v13 = vpop.f32.mrf.mxu1  ;;  %v4429_v17 = vadd.f32 %v4428_v37, %v8183_v52 }
 0xdb7   : > { %v8233_v47 = vadd.f32 %v4498_v32, %v8515_v54  ;;  %v4500_v59 = vadd.f32 %v4499_v13, %v4427_v35 }
 0xdb8   : > { %v4501_v39 = vpop.f32.mrf.mxu1 }
 0xdb9   : > { %v4502_v48 = vadd.f32 %v4501_v39, %v4429_v17  ;;  %v4544_v21 = vadd.f32 %v8233_v47, %v8230_v43  ;;  %v8238_v1 = vadd.f32 %v4500_v59, %v8516_v7 }
 0xdbb   : > { %v8241_v6 = vadd.f32 %v4502_v48, %v8517_v16  ;;  %4545 = vadd.xlane.f32.xlu0 %v4544_v21 }
 0xdbd   : > { %v4547_v49 = vadd.f32 %v8241_v6, %v8238_v1 }
 0xdbf   : > { %4548 = vadd.xlane.f32.xlu1 %v4547_v49 }
 0xdc0   : > { %v4432_v19 = vpop.f32.mrf.mxu0 }
 0xdc1   : > { %v4433_v15 = vadd.f32 %v4432_v19, %v8180_v0 }
 0xdc2   : > { %v4505_v3 = vpop.f32.mrf.mxu1  ;;  %v4434_v58 = vpop.f32.mrf.mxu0 }
 0xdc3   : > { %v4506_v33 = vadd.f32 %v4505_v3, %v4433_v15  ;;  %v4435_v11 = vadd.f32 %v4434_v58, %v8183_v52 }
 0xdc4   : > { %v4507_v45 = vpop.f32.mrf.mxu1  ;;  %v4436_v34 = vpop.f32.mrf.mxu0 }
 0xdc5   : > { %v4508_v63 = vadd.f32 %v4507_v45, %v4435_v11  ;;  %v4437_v61 = vadd.f32 %v4436_v34, %v8180_v0  ;;  %v4526_v50 = vadd.f32 %v4506_v33, %v8518_v25 }
 0xdc6   : > { %v4509_v23 = vpop.f32.mrf.mxu1  ;;  %v4438_v29 = vpop.f32.mrf.mxu0 }
 0xdc7   : > { %v4527_v46 = vadd.f32 %v4508_v63, %v8519_v55  ;;  %v4510_v2 = vadd.f32 %v4509_v23, %v4437_v61  ;;  %v4439_v60 = vadd.f32 %v4438_v29, %v8183_v52 }
 0xdc8   : > { %v4511_v62 = vpop.f32.mrf.mxu1 }
 0xdc9   : > { %v4512_v27 = vadd.f32 %v4511_v62, %v4439_v60  ;;  %v4550_v31 = vadd.f32 %v4527_v46, %v4526_v50  ;;  %v4528_v30 = vadd.f32 %v4510_v2, %v8520_v5 }
 0xdcb   : > { %v4529_v41 = vadd.f32 %v4512_v27, %v8521_v53  ;;  %4551 = vadd.xlane.f32.xlu0 %v4550_v31 }
 0xdcd   : > { %v4553_v57 = vadd.f32 %v4529_v41, %v4528_v30 }
 0xdcf   : > { %4554 = vadd.xlane.f32.xlu1 %v4553_v57 }
 0xe30   : > { %v4534_v0 = vpop.xlane.xlu0 %4533 }
 0xe31   : > { %v4556_v8 = vmul.f32 0.00390625, %v4534_v0 }
 0xe33   : > { %v8254_v22 = vsub.f32 %v8190_v38, %v4556_v8  ;;  %v8257_v20 = vsub.f32 %v8193_v4, %v4556_v8 }
 0xe34   : > { %v4537_v10 = vpop.xlane.xlu1 %4536 }
 0xe35   : > { %v4580_v52 = vmul.f32 %v8254_v22, %v8254_v22  ;;  %v4581_v44 = vmul.f32 %v8257_v20, %v8257_v20  ;;  %v4557_v18 = vmul.f32 0.00390625, %v4537_v10 }
 0xe37   : > { %v8264_v56 = vsub.f32 %v8198_v12, %v4557_v18  ;;  %v8267_v24 = vsub.f32 %v8201_v28, %v4557_v18  ;;  %v4596_v35 = vadd.f32 %v4581_v44, %v4580_v52  ;;  %v4530_v52 = vld [vmem:[%s8433_s12] sm:$0x3] }
 0xe38   : > { %v4531_v18 = vld [vmem:[%s8434_s13] sm:$0x3] }
 0xe39   : > { %v4582_v38 = vmul.f32 %v8264_v56, %v8264_v56  ;;  %v4583_v4 = vmul.f32 %v8267_v24, %v8267_v24  ;;  %4597 = vadd.xlane.f32.xlu0 %v4596_v35 }
 0xe3a   : > { %v4540_v32 = vpop.xlane.xlu0 %4539 }
 0xe3b   : > { %v4558_v37 = vmul.f32 0.00390625, %v4540_v32  ;;  %v4599_v13 = vadd.f32 %v4583_v4, %v4582_v38  ;;  %v8336_v38 = vrot.slane %v4530_v52, %v8504_v40  ;;  %v8339_v4 = vrot.slane %v4530_v52, %v8505_v14 }
 0xe3d   : > { %v8274_v17 = vsub.f32 %v8209_v51, %v4558_v37  ;;  %v8277_v12 = vsub.f32 %v8212_v9, %v4558_v37  ;;  %4600 = vadd.xlane.f32.xlu1 %v4599_v13  ;;  %v8342_v13 = vrot.slane %v4531_v18, %v8504_v40 }
 0xe3e   : > { %v4543_v28 = vpop.xlane.xlu1 %4542 }
 0xe3f   : > { %v4584_v26 = vmul.f32 %v8274_v17, %v8274_v17  ;;  %v4585_v54 = vmul.f32 %v8277_v12, %v8277_v12  ;;  %v4559_v59 = vmul.f32 0.00390625, %v4543_v28  ;;  %v8345_v28 = vrot.slane %v4531_v18, %v8505_v14 }
 0xe41   : > { %v8284_v39 = vsub.f32 %v8219_v42, %v4559_v59  ;;  %v8287_v48 = vsub.f32 %v8222_v36, %v4559_v59  ;;  %v4602_v51 = vadd.f32 %v4585_v54, %v4584_v26 }
 0xe43   : > { %v4586_v9 = vmul.f32 %v8284_v39, %v8284_v39  ;;  %v4587_v21 = vmul.f32 %v8287_v48, %v8287_v48  ;;  %4603 = vadd.xlane.f32.xlu0 %v4602_v51 }
 0xe44   : > { %v4546_v7 = vpop.xlane.xlu0 %4545 }
 0xe45   : > { %v4560_v16 = vmul.f32 0.00390625, %v4546_v7  ;;  %v4605_v49 = vadd.f32 %v4587_v21, %v4586_v9 }
 0xe47   : > { %v8294_v19 = vsub.f32 %v8230_v43, %v4560_v16  ;;  %v8297_v42 = vsub.f32 %v8233_v47, %v4560_v16  ;;  %4606 = vadd.xlane.f32.xlu1 %v4605_v49 }
 0xe48   : > { %v4549_v36 = vpop.xlane.xlu1 %4548 }
 0xe49   : > { %v4588_v15 = vmul.f32 %v8294_v19, %v8294_v19  ;;  %v4589_v3 = vmul.f32 %v8297_v42, %v8297_v42  ;;  %v4561_v58 = vmul.f32 0.00390625, %v4549_v36 }
 0xe4b   : > { %v8304_v33 = vsub.f32 %v8238_v1, %v4561_v58  ;;  %v8307_v11 = vsub.f32 %v8241_v6, %v4561_v58  ;;  %v4608_v43 = vadd.f32 %v4589_v3, %v4588_v15 }
 0xe4d   : > { %v4590_v47 = vmul.f32 %v8304_v33, %v8304_v33  ;;  %v4591_v45 = vmul.f32 %v8307_v11, %v8307_v11  ;;  %4609 = vadd.xlane.f32.xlu0 %v4608_v43 }
 0xe4f   : > { %v4611_v34 = vadd.f32 %v4591_v45, %v4590_v47 }
 0xe51   : > { %4612 = vadd.xlane.f32.xlu1 %v4611_v34 }
 0xe54   : > { %v4552_v63 = vpop.xlane.xlu0 %4551 }
 0xe55   : > { %v4562_v61 = vmul.f32 0.00390625, %v4552_v63 }
 0xe57   : > { %v8313_v23 = vsub.f32 %v4526_v50, %v4562_v61  ;;  %v8315_v29 = vsub.f32 %v4527_v46, %v4562_v61 }
 0xe58   : > { %v4555_v1 = vpop.xlane.xlu1 %4554 }
 0xe59   : > { %v4592_v6 = vmul.f32 %v8313_v23, %v8313_v23  ;;  %v4593_v25 = vmul.f32 %v8315_v29, %v8315_v29  ;;  %v4563_v55 = vmul.f32 0.00390625, %v4555_v1 }
 0xe5b   : > { %v8321_v2 = vsub.f32 %v4528_v30, %v4563_v55  ;;  %v8323_v60 = vsub.f32 %v4529_v41, %v4563_v55  ;;  %v4614_v62 = vadd.f32 %v4593_v25, %v4592_v6 }
 0xe5d   : > { %v4594_v27 = vmul.f32 %v8321_v2, %v8321_v2  ;;  %v4595_v50 = vmul.f32 %v8323_v60, %v8323_v60  ;;  %4615 = vadd.xlane.f32.xlu0 %v4614_v62 }
 0xe5f   : > { %v4617_v46 = vadd.f32 %v4595_v50, %v4594_v27 }
 0xe61   : > { %4618 = vadd.xlane.f32.xlu1 %v4617_v46 }
 0xec2   : > { %v4598_v31 = vpop.xlane.xlu0 %4597 }
 0xec3   : > { %v4620_v5 = vmul.f32 0.00390625, %v4598_v31 }
 0xec5   : > { %v4628_v53 = vadd.f32 1e-12, %v4620_v5 }
 0xec6   : > { %v4601_v57 = vpop.xlane.xlu1 %4600 }
 0xec7   : > { %5945 = vrsqrt.f32 %v4628_v53  ;;  %v4621_v0 = vmul.f32 0.00390625, %v4601_v57 }
 0xec9   : > { %v4629_v30 = vadd.f32 1e-12, %v4621_v0 }
 0xecb   : > { %5947 = vrsqrt.f32 %v4629_v30 }
 0xecc   : > { %v4604_v41 = vpop.xlane.xlu0 %4603 }
 0xecd   : > { %v4622_v8 = vmul.f32 0.00390625, %v4604_v41 }
 0xecf   : > { %v4630_v10 = vadd.f32 1e-12, %v4622_v8 }
 0xed0   : > { %v4607_v44 = vpop.xlane.xlu1 %4606 }
 0xed1   : > { %5949 = vrsqrt.f32 %v4630_v10  ;;  %v4623_v35 = vmul.f32 0.00390625, %v4607_v44 }
 0xed3   : > { %v4631_v32 = vadd.f32 1e-12, %v4623_v35 }
 0xed4   : > { %v5946_v37 = vpop.eup %5945 }
 0xed5   : > { %v4644_v26 = vmul.f32 %v5946_v37, %v8254_v22  ;;  %v4645_v54 = vmul.f32 %v5946_v37, %v8257_v20  ;;  %5951 = vrsqrt.f32 %v4631_v32 }
 0xed6   : > { %v4610_v59 = vpop.xlane.xlu0 %4609 }
 0xed7   : > { %v4671_v51 = vmul.f32 %v8336_v38, %v4644_v26  ;;  %v4672_v9 = vmul.f32 %v8339_v4, %v4645_v54  ;;  %v4624_v21 = vmul.f32 0.00390625, %v4610_v59 }
 0xed8   : > { %v5948_v7 = vpop.eup %5947 }
 0xed9   : > { %v4698_v40 = vadd.f32 %v8342_v13, %v4671_v51  ;;  %v4699_v14 = vadd.f32 %v8345_v28, %v4672_v9  ;;  %v4646_v22 = vmul.f32 %v5948_v7, %v8264_v56  ;;  %v4647_v20 = vmul.f32 %v5948_v7, %v8267_v24 }
 0xeda   : > { %v4632_v16 = vadd.f32 1e-12, %v4624_v21  ;;  %v4613_v49 = vpop.xlane.xlu1 %4612 }
 0xedb   : > { %4714 = vst [vmem:[%s8356_s20] sm:$0xff] %v4698_v40  ;;  %4715 = vst [vmem:[%s8356_s20 + $0x8] sm:$0xff] %v4699_v14  ;;  %v4673_v36 = vmul.f32 %v8336_v38, %v4646_v22  ;;  %v4674_v15 = vmul.f32 %v8339_v4, %v4647_v20  ;;  %v4625_v3 = vmul.f32 0.00390625, %v4613_v49 }
 0xedc   : > { %5953 = vrsqrt.f32 %v4632_v16 }
 0xedd   : > { %v4700_v58 = vadd.f32 %v8342_v13, %v4673_v36  ;;  %v4701_v43 = vadd.f32 %v8345_v28, %v4674_v15  ;;  %v4633_v47 = vadd.f32 1e-12, %v4625_v3 }
 0xede   : > { %v5950_v56 = vpop.eup %5949 }
 0xedf   : > { %4716 = vst [vmem:[%s8356_s20 + $0x10] sm:$0xff] %v4700_v58  ;;  %4717 = vst [vmem:[%s8356_s20 + $0x18] sm:$0xff] %v4701_v43  ;;  %v4648_v24 = vmul.f32 %v5950_v56, %v8274_v17  ;;  %v4649_v45 = vmul.f32 %v5950_v56, %v8277_v12  ;;  %5955 = vrsqrt.f32 %v4633_v47 }
 0xee1   : > { %v4675_v34 = vmul.f32 %v8336_v38, %v4648_v24  ;;  %v4676_v63 = vmul.f32 %v8339_v4, %v4649_v45 }
 0xee2   : > { %v5952_v61 = vpop.eup %5951 }
 0xee3   : > { %v4702_v1 = vadd.f32 %v8342_v13, %v4675_v34  ;;  %v4703_v6 = vadd.f32 %v8345_v28, %v4676_v63  ;;  %v4650_v25 = vmul.f32 %v5952_v61, %v8284_v39  ;;  %v4651_v55 = vmul.f32 %v5952_v61, %v8287_v48 }
 0xee5   : > { %4718 = vst [vmem:[%s8356_s20 + $0x20] sm:$0xff] %v4702_v1  ;;  %4719 = vst [vmem:[%s8356_s20 + $0x28] sm:$0xff] %v4703_v6  ;;  %v4677_v17 = vmul.f32 %v8336_v38, %v4650_v25  ;;  %v4678_v12 = vmul.f32 %v8339_v4, %v4651_v55 }
 0xee6   : > { %v4616_v62 = vpop.xlane.xlu0 %4615 }
 0xee7   : > { %v4704_v27 = vadd.f32 %v8342_v13, %v4677_v17  ;;  %v4705_v50 = vadd.f32 %v8345_v28, %v4678_v12  ;;  %v4626_v46 = vmul.f32 0.00390625, %v4616_v62 }
 0xee9   : > { %v5954_v31 = vpop.eup %5953  ;;  %4720 = vst [vmem:[%s8356_s20 + $0x30] sm:$0xff] %v4704_v27  ;;  %4721 = vst [vmem:[%s8356_s20 + $0x38] sm:$0xff] %v4705_v50  ;;  %v4634_v5 = vadd.f32 1e-12, %v4626_v46 }
 0xeea   : > { %v4652_v39 = vmul.f32 %v5954_v31, %v8294_v19  ;;  %v4653_v48 = vmul.f32 %v5954_v31, %v8297_v42  ;;  %v4619_v53 = vpop.xlane.xlu1 %4618 }
 0xeeb   : > { %5957 = vrsqrt.f32 %v4634_v5  ;;  %v4627_v57 = vmul.f32 0.00390625, %v4619_v53 }
 0xeec   : > { %v5956_v0 = vpop.eup %5955  ;;  %v4679_v30 = vmul.f32 %v8336_v38, %v4652_v39  ;;  %v4680_v41 = vmul.f32 %v8339_v4, %v4653_v48 }
 0xeed   : > { %v4654_v8 = vmul.f32 %v5956_v0, %v8304_v33  ;;  %v4655_v10 = vmul.f32 %v5956_v0, %v8307_v11  ;;  %v4635_v52 = vadd.f32 1e-12, %v4627_v57 }
 0xeee   : > { %v4706_v19 = vadd.f32 %v8342_v13, %v4679_v30  ;;  %v4707_v42 = vadd.f32 %v8345_v28, %v4680_v41 }
 0xeef   : > { %v4681_v44 = vmul.f32 %v8336_v38, %v4654_v8  ;;  %v4682_v18 = vmul.f32 %v8339_v4, %v4655_v10  ;;  %5959 = vrsqrt.f32 %v4635_v52 }
 0xef0   : > { %4722 = vst [vmem:[%s8356_s20 + $0x40] sm:$0xff] %v4706_v19  ;;  %4723 = vst [vmem:[%s8356_s20 + $0x48] sm:$0xff] %v4707_v42 }
 0xef1   : > { %v4708_v35 = vadd.f32 %v8342_v13, %v4681_v44  ;;  %v4709_v33 = vadd.f32 %v8345_v28, %v4682_v18 }
 0xef3   : > { %4724 = vst [vmem:[%s8356_s20 + $0x50] sm:$0xff] %v4708_v35  ;;  %4725 = vst [vmem:[%s8356_s20 + $0x58] sm:$0xff] %v4709_v33 }
 0xef8   : > { %v5958_v11 = vpop.eup %5957 }
 0xef9   : > { %v4656_v32 = vmul.f32 %v5958_v11, %v8313_v23  ;;  %v4657_v37 = vmul.f32 %v5958_v11, %v8315_v29 }
 0xefb   : > { %v4683_v26 = vmul.f32 %v8336_v38, %v4656_v32  ;;  %v4684_v54 = vmul.f32 %v8339_v4, %v4657_v37 }
 0xefc   : > { %v5960_v59 = vpop.eup %5959 }
 0xefd   : > { %v4710_v51 = vadd.f32 %v8342_v13, %v4683_v26  ;;  %v4711_v9 = vadd.f32 %v8345_v28, %v4684_v54  ;;  %v4658_v21 = vmul.f32 %v5960_v59, %v8321_v2  ;;  %v4659_v7 = vmul.f32 %v5960_v59, %v8323_v60 }
 0xeff   : > { %4726 = vst [vmem:[%s8356_s20 + $0x60] sm:$0xff] %v4710_v51  ;;  %4727 = vst [vmem:[%s8356_s20 + $0x68] sm:$0xff] %v4711_v9  ;;  %v4685_v23 = vmul.f32 %v8336_v38, %v4658_v21  ;;  %v4686_v40 = vmul.f32 %v8339_v4, %v4659_v7 }
 0xf01   : > { %v4712_v29 = vadd.f32 %v8342_v13, %v4685_v23  ;;  %v4713_v14 = vadd.f32 %v8345_v28, %v4686_v40 }
 0xf03   : > { %4728 = vst [vmem:[%s8356_s20 + $0x70] sm:$0xff] %v4712_v29  ;;  %4729 = vst [vmem:[%s8356_s20 + $0x78] sm:$0xff] %v4713_v14 }
 0xf04 PF: > { %s24_s29 = sadd.s32 1, %s5984_s29  }
 0xf05   : > { %p21_p4 = scmp.ge.s32.totalorder %s24_s29, 4  }
 0xf07   :  { %23 = sbr.rel (!%p21_p4) target bundleno = 1 (0x1), region = 109 }

</bundles_post_ra>
